<compile_context>
chip_gen: v7x
topology: tpu7x:2x2x1
jax: 0.10.0
libtpu: 0.0.40
codegen_flags: <defaults>
</compile_context>

<pallas_src>
import jax
import jax.numpy as jnp
from jax import lax
from jax.experimental import pallas as pl
from jax.experimental.pallas import tpu as pltpu


# ----------------------------------------------------------------------------
# Kernel
# ----------------------------------------------------------------------------
def lstm_attn_kernel(
    x_ref,      # (S*TB, Ep)    embeddings for this batch tile, row = s*TB + b, bf16
    wih_ref,    # (Ep, 4*Hp)    LSTM input weights, gate-blocked/padded, bf16
    whh_ref,    # (Hp, 4*Hp)    LSTM recurrent weights, gate-blocked/padded, bf16
    b_ref,      # (1, 4*Hp)     b_ih + b_hh, gate-blocked/padded, f32
    wa1_ref,    # (Hp, Ap)      attention Linear 1 (transposed, padded), f32
    ba1_ref,    # (1, Ap)
    wa2_ref,    # (Ap, R)       attention Linear 2 (transposed, padded), f32
    ba2_ref,    # (1, R)
    wo_ref,     # (R, Hp, Cp)   output Linear regrouped per head, f32
    bo_ref,     # (1, Cp)
    out_ref,    # (TB, Cp)      padded logits for this batch tile
    gx_ref,     # scratch (S*TB, 4*Hp) f32 : hoisted input projection
    hs_ref,     # scratch (S*TB, Hp)   f32 : all hidden states of the tile
):
    STB, _ = x_ref.shape
    Hp = whh_ref.shape[0]
    R = wa2_ref.shape[1]
    TB, Cp = out_ref.shape
    S = STB // TB

    # ---- hoisted input projection: one big MXU matmul, bias folded in ----
    gx_ref[...] = (
        jnp.dot(x_ref[...], wih_ref[...], preferred_element_type=jnp.float32)
        + b_ref[...]
    )

    # ---- LSTM recurrence: h, c live in vregs (fori_loop carry) ----
    def step(t, carry):
        h, c = carry                                    # (TB, Hp) f32 each
        row = pl.multiple_of(t * TB, TB)
        gates = gx_ref[pl.ds(row, TB), :] + jnp.dot(
            h.astype(jnp.bfloat16), whh_ref[...],
            preferred_element_type=jnp.float32,
        )                                               # (TB, 4*Hp) f32
        # lane-aligned gate slices (each Hp is a multiple of 128)
        i_g = jax.nn.sigmoid(gates[:, 0 * Hp:1 * Hp])
        f_g = jax.nn.sigmoid(gates[:, 1 * Hp:2 * Hp])
        g_g = jnp.tanh(gates[:, 2 * Hp:3 * Hp])
        o_g = jax.nn.sigmoid(gates[:, 3 * Hp:4 * Hp])
        c_new = f_g * c + i_g * g_g
        h_new = o_g * jnp.tanh(c_new)
        hs_ref[pl.ds(row, TB), :] = h_new
        return h_new, c_new

    zeros = jnp.zeros((TB, Hp), jnp.float32)
    lax.fori_loop(0, S, step, (zeros, zeros), unroll=(S <= 16))

    # ---- self-attentive sentence embedding (dropout p=0 -> identity) ----
    enc = hs_ref[...]                                   # (S*TB, Hp) f32
    a1 = jnp.tanh(
        jnp.dot(enc, wa1_ref[...], preferred_element_type=jnp.float32)
        + ba1_ref[...]
    )                                                   # (S*TB, Ap)
    scores = (
        jnp.dot(a1, wa2_ref[...], preferred_element_type=jnp.float32)
        + ba2_ref[...]
    ).reshape(S, TB, R)                                 # (S, TB, R)

    # softmax over the sequence dimension (torch Softmax(dim=1) on (B,S,R))
    m = jnp.max(scores, axis=0, keepdims=True)
    e = jnp.exp(scores - m)
    attn = e / jnp.sum(e, axis=0, keepdims=True)        # (S, TB, R)

    # einsum('bsd,bsr->bdr') + flatten + output Linear, folded:
    #   logits[b,c] = sum_r (sum_s attn[s,b,r] * enc[s,b,:]) @ Wo_r + bo
    enc3 = enc.reshape(S, TB, Hp)                       # tile-clean reshape
    acc = jnp.zeros((TB, Cp), jnp.float32)
    for r in range(R):                                  # R small, unrolled
        feat_r = jnp.sum(enc3 * attn[:, :, r:r + 1], axis=0)   # (TB, Hp) VPU
        acc = acc + jnp.dot(feat_r, wo_ref[r],
                            preferred_element_type=jnp.float32)
    out_ref[...] = acc + bo_ref[...]                    # lane-dense (TB, 128)


# ----------------------------------------------------------------------------
# Wrapper: padding, layout packing, pallas_call
# ----------------------------------------------------------------------------
def _round_up(v, m):
    return ((v + m - 1) // m) * m


def _pad2(a, rows, cols):
    return jnp.pad(a, ((0, rows - a.shape[0]), (0, cols - a.shape[1])))


def lstm_attn_classifier(x, params, *, tb=8):
    """x: (B, S, E) float32 embeddings (batch_first, like nn.LSTM input).

    params: raw PyTorch-layout weights (see init_params). Returns (B, C) logits.
    """
    B, S, E = x.shape
    H = params["w_hh"].shape[1]
    A = params["w_a1"].shape[0]
    R = params["w_a2"].shape[0]
    C = params["w_o"].shape[0]

    Hp = _round_up(H, 128)
    Ep = _round_up(E, 128)
    Ap = _round_up(A, 128)
    Cp = _round_up(C, 128)
    TB = _round_up(max(tb, 8), 8)
    Bp = _round_up(B, TB)
    nb = Bp // TB

    # --- LSTM weights: transpose to (in, 4H), pad each gate block to Hp lanes
    def pack_lstm(w, in_p):                      # w: (4H, In) PyTorch layout
        wt = jnp.transpose(w)                    # (In, 4H), gate order i,f,g,o
        blocks = [_pad2(wt[:, g * H:(g + 1) * H], in_p, Hp) for g in range(4)]
        return jnp.concatenate(blocks, axis=1)   # (In_p, 4*Hp)

    wih = pack_lstm(params["w_ih"], Ep).astype(jnp.bfloat16)
    whh = pack_lstm(params["w_hh"], Hp).astype(jnp.bfloat16)
    b_fused = params["b_ih"] + params["b_hh"]    # (4H,)
    b = jnp.concatenate(
        [jnp.pad(b_fused[g * H:(g + 1) * H], (0, Hp - H)) for g in range(4)]
    ).reshape(1, 4 * Hp).astype(jnp.float32)

    # --- attention weights (padded, transposed to (in, out)) ---
    wa1 = _pad2(jnp.transpose(params["w_a1"]), Hp, Ap)          # (Hp, Ap)
    ba1 = jnp.pad(params["b_a1"], (0, Ap - A)).reshape(1, Ap)
    wa2 = _pad2(jnp.transpose(params["w_a2"]), Ap, R)           # (Ap, R)
    ba2 = params["b_a2"].reshape(1, R)

    # --- output layer regrouped per attention head:
    #     wo[r, h, c] = W_o[c, h*R + r]  (row-major flatten of (B, H, R)) ---
    wo = jnp.transpose(params["w_o"]).reshape(H, R, C).transpose(1, 0, 2)
    wo = jnp.pad(wo, ((0, 0), (0, Hp - H), (0, Cp - C)))        # (R, Hp, Cp)
    bo = jnp.pad(params["b_o"], (0, Cp - C)).reshape(1, Cp)

    # --- inputs: pad batch & embedding, lay out rows as (tile, s, b_local) ---
    xp = jnp.pad(x, ((0, Bp - B), (0, 0), (0, Ep - E)))         # (Bp, S, Ep)
    xk = (xp.reshape(nb, TB, S, Ep)
             .transpose(0, 2, 1, 3)                              # (nb, S, TB, Ep)
             .reshape(nb * S * TB, Ep)
             .astype(jnp.bfloat16))

    out = pl.pallas_call(
        lstm_attn_kernel,
        out_shape=jax.ShapeDtypeStruct((Bp, Cp), jnp.float32),
        grid_spec=pltpu.PrefetchScalarGridSpec(
            num_scalar_prefetch=0,
            grid=(nb,),
            in_specs=[
                pl.BlockSpec((S * TB, Ep), lambda i: (i, 0)),     # x (per tile)
                pl.BlockSpec((Ep, 4 * Hp), lambda i: (0, 0)),     # wih
                pl.BlockSpec((Hp, 4 * Hp), lambda i: (0, 0)),     # whh
                pl.BlockSpec((1, 4 * Hp), lambda i: (0, 0)),      # b
                pl.BlockSpec((Hp, Ap), lambda i: (0, 0)),         # wa1
                pl.BlockSpec((1, Ap), lambda i: (0, 0)),          # ba1
                pl.BlockSpec((Ap, R), lambda i: (0, 0)),          # wa2
                pl.BlockSpec((1, R), lambda i: (0, 0)),           # ba2
                pl.BlockSpec((R, Hp, Cp), lambda i: (0, 0, 0)),   # wo
                pl.BlockSpec((1, Cp), lambda i: (0, 0)),          # bo
            ],
            out_specs=pl.BlockSpec((TB, Cp), lambda i: (i, 0)),
            scratch_shapes=[
                pltpu.VMEM((S * TB, 4 * Hp), jnp.float32),        # gates_x
                pltpu.VMEM((S * TB, Hp), jnp.float32),            # hidden states
            ],
        ),
        compiler_params=pltpu.CompilerParams(
            dimension_semantics=("parallel",),   # batch tiles across TCs (v7x)
        ),
    )(xk, wih, whh, b, wa1, ba1, wa2, ba2, wo, bo)

    return out[:B, :C]


# ----------------------------------------------------------------------------
# Deterministic parameter init (shapes match the PyTorch module)
# ----------------------------------------------------------------------------
def init_params(key, E, H, A, R, C):
    ks = jax.random.split(key, 10)

    def u(k, shape, bound):
        return jax.random.uniform(k, shape, jnp.float32, -bound, bound)

    k_lstm = 1.0 / float(H) ** 0.5
    k_a1 = 1.0 / float(H) ** 0.5
    k_a2 = 1.0 / float(A) ** 0.5
    k_o = 1.0 / float(H * R) ** 0.5

    return {
        "w_ih": u(ks[0], (4 * H, E), k_lstm),    # nn.LSTM weight_ih_l0
        "w_hh": u(ks[1], (4 * H, H), k_lstm),    # nn.LSTM weight_hh_l0
        "b_ih": u(ks[2], (4 * H,), k_lstm),
        "b_hh": u(ks[3], (4 * H,), k_lstm),
        "w_a1": u(ks[4], (A, H), k_a1),          # Linear(H, A)
        "b_a1": u(ks[5], (A,), k_a1),
        "w_a2": u(ks[6], (R, A), k_a2),          # Linear(A, R)
        "b_a2": u(ks[7], (R,), k_a2),
        "w_o": u(ks[8], (C, H * R), k_o),        # Linear(H*R, C)
        "b_o": u(ks[9], (C,), k_o),
    }


if __name__ == "__main__":
    # Small, forward-consistent shapes.
    B, S, E = 2, 8, 16          # batch, sequence length, embedding_dim
    H = 32                      # lstm hidden_size (unidirectional, 1 layer)
    A = 16                      # attention_dim
    R = 4                       # num_attention_heads
    C = 5                       # num_classes

    key = jax.random.PRNGKey(0)
    k_x, k_p = jax.random.split(key)
    x = jax.random.normal(k_x, (B, S, E), jnp.float32)   # "embedded" token batch
    params = init_params(k_p, E, H, A, R, C)

    logits = lstm_attn_classifier(x, params)
    jax.block_until_ready(logits)
    assert logits.shape == (B, C), logits.shape
    assert bool(jnp.all(jnp.isfinite(logits)))
    print("KERNEL_OK")
</pallas_src>

<mosaic_0001>
module attributes {stable_mosaic.version = 11 : i64} {
  func.func @lstm_attn_kernel(%arg0: i32, %arg1: memref<64x128xbf16, #tpu.memory_space<vmem>>, %arg2: memref<128x512xbf16, #tpu.memory_space<vmem>>, %arg3: memref<128x512xbf16, #tpu.memory_space<vmem>>, %arg4: memref<1x512xf32, #tpu.memory_space<vmem>>, %arg5: memref<128x128xf32, #tpu.memory_space<vmem>>, %arg6: memref<1x128xf32, #tpu.memory_space<vmem>>, %arg7: memref<128x4xf32, #tpu.memory_space<vmem>>, %arg8: memref<1x4xf32, #tpu.memory_space<vmem>>, %arg9: memref<4x128x128xf32, #tpu.memory_space<vmem>>, %arg10: memref<1x128xf32, #tpu.memory_space<vmem>>, %arg11: memref<8x128xf32, #tpu.memory_space<vmem>>, %arg12: memref<64x512xf32, #tpu.memory_space<vmem>>, %arg13: memref<64x128xf32, #tpu.memory_space<vmem>>) attributes {dimension_semantics = [#tpu.dimension_semantics<parallel>], iteration_bounds = array<i64: 1>, scalar_prefetch = 0 : i64, scratch_operands = 2 : i64, tpu.core_type = #tpu.core_type<tc>, window_params = [{transform_indices = @transform_0, window_bounds = array<i64: 64, 128>}, {pipeline_mode = #tpu.pipeline_mode<synchronous>, transform_indices = @transform_1, window_bounds = array<i64: 128, 512>}, {pipeline_mode = #tpu.pipeline_mode<synchronous>, transform_indices = @transform_2, window_bounds = array<i64: 128, 512>}, {pipeline_mode = #tpu.pipeline_mode<synchronous>, transform_indices = @transform_3, window_bounds = array<i64: 1, 512>}, {pipeline_mode = #tpu.pipeline_mode<synchronous>, transform_indices = @transform_4, window_bounds = array<i64: 128, 128>}, {pipeline_mode = #tpu.pipeline_mode<synchronous>, transform_indices = @transform_5, window_bounds = array<i64: 1, 128>}, {pipeline_mode = #tpu.pipeline_mode<synchronous>, transform_indices = @transform_6, window_bounds = array<i64: 128, 4>}, {pipeline_mode = #tpu.pipeline_mode<synchronous>, transform_indices = @transform_7, window_bounds = array<i64: 1, 4>}, {pipeline_mode = #tpu.pipeline_mode<synchronous>, transform_indices = @transform_8, window_bounds = array<i64: 4, 128, 128>}, {pipeline_mode = #tpu.pipeline_mode<synchronous>, transform_indices = @transform_9, window_bounds = array<i64: 1, 128>}, {transform_indices = @transform_10, window_bounds = array<i64: 8, 128>}]} {
    %c0 = arith.constant 0 : index
    %c0_0 = arith.constant 0 : index
    %0 = vector.load %arg1[%c0, %c0_0] : memref<64x128xbf16, #tpu.memory_space<vmem>>, vector<64x128xbf16>
    %c0_1 = arith.constant 0 : index
    %c0_2 = arith.constant 0 : index
    %1 = vector.load %arg2[%c0_1, %c0_2] : memref<128x512xbf16, #tpu.memory_space<vmem>>, vector<128x512xbf16>
    %cst = arith.constant dense<0.000000e+00> : vector<64x512xf32>
    %2 = tpu.matmul %0, %1, %cst {dimension_numbers = #tpu.dot_dimension_numbers<[1], [0], [0], [1], [0, 0, 1, 1], [], []>} : vector<64x128xbf16>, vector<128x512xbf16>, vector<64x512xf32> -> vector<64x512xf32>
    %c0_3 = arith.constant 0 : index
    %c0_4 = arith.constant 0 : index
    %3 = vector.load %arg4[%c0_3, %c0_4] : memref<1x512xf32, #tpu.memory_space<vmem>>, vector<1x512xf32>
    %4 = vector.broadcast %3 : vector<1x512xf32> to vector<64x512xf32>
    %5 = arith.addf %2, %4 : vector<64x512xf32>
    %c0_5 = arith.constant 0 : index
    %c0_6 = arith.constant 0 : index
    %6 = vector.load %arg12[%c0_5, %c0_6] : memref<64x512xf32, #tpu.memory_space<vmem>>, vector<64x512xf32>
    tpu.vector_store %arg12[%c0_5, %c0_6], %5 {strides = array<i32>} : memref<64x512xf32, #tpu.memory_space<vmem>>, vector<64x512xf32>,
    %cst_7 = arith.constant 0.000000e+00 : f32
    %7 = vector.broadcast %cst_7 : f32 to vector<8x128xf32>
    %c0_i32 = arith.constant 0 : i32
    %c8_i32 = arith.constant 8 : i32
    %8 = arith.muli %c0_i32, %c8_i32 : i32
    %9 = tpu.assume_multiple %8, 8 : i32
    %10 = arith.index_cast %9 : i32 to index
    %c0_8 = arith.constant 0 : index
    %11 = vector.load %arg12[%10, %c0_8] : memref<64x512xf32, #tpu.memory_space<vmem>>, vector<8x512xf32>
    %12 = arith.truncf %7 : vector<8x128xf32> to vector<8x128xbf16>
    %c0_9 = arith.constant 0 : index
    %c0_10 = arith.constant 0 : index
    %13 = vector.load %arg3[%c0_9, %c0_10] : memref<128x512xbf16, #tpu.memory_space<vmem>>, vector<128x512xbf16>
    %cst_11 = arith.constant dense<0.000000e+00> : vector<8x512xf32>
    %14 = tpu.matmul %12, %13, %cst_11 {dimension_numbers = #tpu.dot_dimension_numbers<[1], [0], [0], [1], [0, 0, 1, 1], [], []>} : vector<8x128xbf16>, vector<128x512xbf16>, vector<8x512xf32> -> vector<8x512xf32>
    %15 = arith.addf %11, %14 : vector<8x512xf32>
    %16 = vector.extract_strided_slice %15 {offsets = [0, 0], sizes = [8, 128], strides = [1, 1]} : vector<8x512xf32> to vector<8x128xf32>
    %17 = arith.negf %16 : vector<8x128xf32>
    %18 = math.exp %17 : vector<8x128xf32>
    %cst_12 = arith.constant 1.000000e+00 : f32
    %19 = vector.broadcast %cst_12 : f32 to vector<8x128xf32>
    %20 = arith.addf %19, %18 : vector<8x128xf32>
    %21 = arith.divf %19, %20 : vector<8x128xf32>
    %22 = vector.extract_strided_slice %15 {offsets = [0, 128], sizes = [8, 128], strides = [1, 1]} : vector<8x512xf32> to vector<8x128xf32>
    %23 = arith.negf %22 : vector<8x128xf32>
    %24 = math.exp %23 : vector<8x128xf32>
    %cst_13 = arith.constant 1.000000e+00 : f32
    %25 = vector.broadcast %cst_13 : f32 to vector<8x128xf32>
    %26 = arith.addf %25, %24 : vector<8x128xf32>
    %27 = arith.divf %25, %26 : vector<8x128xf32>
    %28 = vector.extract_strided_slice %15 {offsets = [0, 256], sizes = [8, 128], strides = [1, 1]} : vector<8x512xf32> to vector<8x128xf32>
    %29 = math.tanh %28 : vector<8x128xf32>
    %30 = vector.extract_strided_slice %15 {offsets = [0, 384], sizes = [8, 128], strides = [1, 1]} : vector<8x512xf32> to vector<8x128xf32>
    %31 = arith.negf %30 : vector<8x128xf32>
    %32 = math.exp %31 : vector<8x128xf32>
    %cst_14 = arith.constant 1.000000e+00 : f32
    %33 = vector.broadcast %cst_14 : f32 to vector<8x128xf32>
    %34 = arith.addf %33, %32 : vector<8x128xf32>
    %35 = arith.divf %33, %34 : vector<8x128xf32>
    %36 = arith.mulf %27, %7 : vector<8x128xf32>
    %37 = arith.mulf %21, %29 : vector<8x128xf32>
    %38 = arith.addf %36, %37 : vector<8x128xf32>
    %39 = math.tanh %38 : vector<8x128xf32>
    %40 = arith.mulf %35, %39 : vector<8x128xf32>
    %41 = arith.index_cast %9 : i32 to index
    %c0_15 = arith.constant 0 : index
    %42 = vector.load %arg13[%41, %c0_15] : memref<64x128xf32, #tpu.memory_space<vmem>>, vector<8x128xf32>
    tpu.vector_store %arg13[%41, %c0_15], %40 {strides = array<i32>} : memref<64x128xf32, #tpu.memory_space<vmem>>, vector<8x128xf32>,
    %c1_i32 = arith.constant 1 : i32
    %c8_i32_16 = arith.constant 8 : i32
    %43 = arith.muli %c1_i32, %c8_i32_16 : i32
    %44 = tpu.assume_multiple %43, 8 : i32
    %45 = arith.index_cast %44 : i32 to index
    %c0_17 = arith.constant 0 : index
    %46 = vector.load %arg12[%45, %c0_17] : memref<64x512xf32, #tpu.memory_space<vmem>>, vector<8x512xf32>
    %47 = arith.truncf %40 : vector<8x128xf32> to vector<8x128xbf16>
    %c0_18 = arith.constant 0 : index
    %c0_19 = arith.constant 0 : index
    %48 = vector.load %arg3[%c0_18, %c0_19] : memref<128x512xbf16, #tpu.memory_space<vmem>>, vector<128x512xbf16>
    %cst_20 = arith.constant dense<0.000000e+00> : vector<8x512xf32>
    %49 = tpu.matmul %47, %48, %cst_20 {dimension_numbers = #tpu.dot_dimension_numbers<[1], [0], [0], [1], [0, 0, 1, 1], [], []>} : vector<8x128xbf16>, vector<128x512xbf16>, vector<8x512xf32> -> vector<8x512xf32>
    %50 = arith.addf %46, %49 : vector<8x512xf32>
    %51 = vector.extract_strided_slice %50 {offsets = [0, 0], sizes = [8, 128], strides = [1, 1]} : vector<8x512xf32> to vector<8x128xf32>
    %52 = arith.negf %51 : vector<8x128xf32>
    %53 = math.exp %52 : vector<8x128xf32>
    %cst_21 = arith.constant 1.000000e+00 : f32
    %54 = vector.broadcast %cst_21 : f32 to vector<8x128xf32>
    %55 = arith.addf %54, %53 : vector<8x128xf32>
    %56 = arith.divf %54, %55 : vector<8x128xf32>
    %57 = vector.extract_strided_slice %50 {offsets = [0, 128], sizes = [8, 128], strides = [1, 1]} : vector<8x512xf32> to vector<8x128xf32>
    %58 = arith.negf %57 : vector<8x128xf32>
    %59 = math.exp %58 : vector<8x128xf32>
    %cst_22 = arith.constant 1.000000e+00 : f32
    %60 = vector.broadcast %cst_22 : f32 to vector<8x128xf32>
    %61 = arith.addf %60, %59 : vector<8x128xf32>
    %62 = arith.divf %60, %61 : vector<8x128xf32>
    %63 = vector.extract_strided_slice %50 {offsets = [0, 256], sizes = [8, 128], strides = [1, 1]} : vector<8x512xf32> to vector<8x128xf32>
    %64 = math.tanh %63 : vector<8x128xf32>
    %65 = vector.extract_strided_slice %50 {offsets = [0, 384], sizes = [8, 128], strides = [1, 1]} : vector<8x512xf32> to vector<8x128xf32>
    %66 = arith.negf %65 : vector<8x128xf32>
    %67 = math.exp %66 : vector<8x128xf32>
    %cst_23 = arith.constant 1.000000e+00 : f32
    %68 = vector.broadcast %cst_23 : f32 to vector<8x128xf32>
    %69 = arith.addf %68, %67 : vector<8x128xf32>
    %70 = arith.divf %68, %69 : vector<8x128xf32>
    %71 = arith.mulf %62, %38 : vector<8x128xf32>
    %72 = arith.mulf %56, %64 : vector<8x128xf32>
    %73 = arith.addf %71, %72 : vector<8x128xf32>
    %74 = math.tanh %73 : vector<8x128xf32>
    %75 = arith.mulf %70, %74 : vector<8x128xf32>
    %76 = arith.index_cast %44 : i32 to index
    %c0_24 = arith.constant 0 : index
    %77 = vector.load %arg13[%76, %c0_24] : memref<64x128xf32, #tpu.memory_space<vmem>>, vector<8x128xf32>
    tpu.vector_store %arg13[%76, %c0_24], %75 {strides = array<i32>} : memref<64x128xf32, #tpu.memory_space<vmem>>, vector<8x128xf32>,
    %c2_i32 = arith.constant 2 : i32
    %c8_i32_25 = arith.constant 8 : i32
    %78 = arith.muli %c2_i32, %c8_i32_25 : i32
    %79 = tpu.assume_multiple %78, 8 : i32
    %80 = arith.index_cast %79 : i32 to index
    %c0_26 = arith.constant 0 : index
    %81 = vector.load %arg12[%80, %c0_26] : memref<64x512xf32, #tpu.memory_space<vmem>>, vector<8x512xf32>
    %82 = arith.truncf %75 : vector<8x128xf32> to vector<8x128xbf16>
    %c0_27 = arith.constant 0 : index
    %c0_28 = arith.constant 0 : index
    %83 = vector.load %arg3[%c0_27, %c0_28] : memref<128x512xbf16, #tpu.memory_space<vmem>>, vector<128x512xbf16>
    %cst_29 = arith.constant dense<0.000000e+00> : vector<8x512xf32>
    %84 = tpu.matmul %82, %83, %cst_29 {dimension_numbers = #tpu.dot_dimension_numbers<[1], [0], [0], [1], [0, 0, 1, 1], [], []>} : vector<8x128xbf16>, vector<128x512xbf16>, vector<8x512xf32> -> vector<8x512xf32>
    %85 = arith.addf %81, %84 : vector<8x512xf32>
    %86 = vector.extract_strided_slice %85 {offsets = [0, 0], sizes = [8, 128], strides = [1, 1]} : vector<8x512xf32> to vector<8x128xf32>
    %87 = arith.negf %86 : vector<8x128xf32>
    %88 = math.exp %87 : vector<8x128xf32>
    %cst_30 = arith.constant 1.000000e+00 : f32
    %89 = vector.broadcast %cst_30 : f32 to vector<8x128xf32>
    %90 = arith.addf %89, %88 : vector<8x128xf32>
    %91 = arith.divf %89, %90 : vector<8x128xf32>
    %92 = vector.extract_strided_slice %85 {offsets = [0, 128], sizes = [8, 128], strides = [1, 1]} : vector<8x512xf32> to vector<8x128xf32>
    %93 = arith.negf %92 : vector<8x128xf32>
    %94 = math.exp %93 : vector<8x128xf32>
    %cst_31 = arith.constant 1.000000e+00 : f32
    %95 = vector.broadcast %cst_31 : f32 to vector<8x128xf32>
    %96 = arith.addf %95, %94 : vector<8x128xf32>
    %97 = arith.divf %95, %96 : vector<8x128xf32>
    %98 = vector.extract_strided_slice %85 {offsets = [0, 256], sizes = [8, 128], strides = [1, 1]} : vector<8x512xf32> to vector<8x128xf32>
    %99 = math.tanh %98 : vector<8x128xf32>
    %100 = vector.extract_strided_slice %85 {offsets = [0, 384], sizes = [8, 128], strides = [1, 1]} : vector<8x512xf32> to vector<8x128xf32>
    %101 = arith.negf %100 : vector<8x128xf32>
    %102 = math.exp %101 : vector<8x128xf32>
    %cst_32 = arith.constant 1.000000e+00 : f32
    %103 = vector.broadcast %cst_32 : f32 to vector<8x128xf32>
    %104 = arith.addf %103, %102 : vector<8x128xf32>
    %105 = arith.divf %103, %104 : vector<8x128xf32>
    %106 = arith.mulf %97, %73 : vector<8x128xf32>
    %107 = arith.mulf %91, %99 : vector<8x128xf32>
    %108 = arith.addf %106, %107 : vector<8x128xf32>
    %109 = math.tanh %108 : vector<8x128xf32>
    %110 = arith.mulf %105, %109 : vector<8x128xf32>
    %111 = arith.index_cast %79 : i32 to index
    %c0_33 = arith.constant 0 : index
    %112 = vector.load %arg13[%111, %c0_33] : memref<64x128xf32, #tpu.memory_space<vmem>>, vector<8x128xf32>
    tpu.vector_store %arg13[%111, %c0_33], %110 {strides = array<i32>} : memref<64x128xf32, #tpu.memory_space<vmem>>, vector<8x128xf32>,
    %c3_i32 = arith.constant 3 : i32
    %c8_i32_34 = arith.constant 8 : i32
    %113 = arith.muli %c3_i32, %c8_i32_34 : i32
    %114 = tpu.assume_multiple %113, 8 : i32
    %115 = arith.index_cast %114 : i32 to index
    %c0_35 = arith.constant 0 : index
    %116 = vector.load %arg12[%115, %c0_35] : memref<64x512xf32, #tpu.memory_space<vmem>>, vector<8x512xf32>
    %117 = arith.truncf %110 : vector<8x128xf32> to vector<8x128xbf16>
    %c0_36 = arith.constant 0 : index
    %c0_37 = arith.constant 0 : index
    %118 = vector.load %arg3[%c0_36, %c0_37] : memref<128x512xbf16, #tpu.memory_space<vmem>>, vector<128x512xbf16>
    %cst_38 = arith.constant dense<0.000000e+00> : vector<8x512xf32>
    %119 = tpu.matmul %117, %118, %cst_38 {dimension_numbers = #tpu.dot_dimension_numbers<[1], [0], [0], [1], [0, 0, 1, 1], [], []>} : vector<8x128xbf16>, vector<128x512xbf16>, vector<8x512xf32> -> vector<8x512xf32>
    %120 = arith.addf %116, %119 : vector<8x512xf32>
    %121 = vector.extract_strided_slice %120 {offsets = [0, 0], sizes = [8, 128], strides = [1, 1]} : vector<8x512xf32> to vector<8x128xf32>
    %122 = arith.negf %121 : vector<8x128xf32>
    %123 = math.exp %122 : vector<8x128xf32>
    %cst_39 = arith.constant 1.000000e+00 : f32
    %124 = vector.broadcast %cst_39 : f32 to vector<8x128xf32>
    %125 = arith.addf %124, %123 : vector<8x128xf32>
    %126 = arith.divf %124, %125 : vector<8x128xf32>
    %127 = vector.extract_strided_slice %120 {offsets = [0, 128], sizes = [8, 128], strides = [1, 1]} : vector<8x512xf32> to vector<8x128xf32>
    %128 = arith.negf %127 : vector<8x128xf32>
    %129 = math.exp %128 : vector<8x128xf32>
    %cst_40 = arith.constant 1.000000e+00 : f32
    %130 = vector.broadcast %cst_40 : f32 to vector<8x128xf32>
    %131 = arith.addf %130, %129 : vector<8x128xf32>
    %132 = arith.divf %130, %131 : vector<8x128xf32>
    %133 = vector.extract_strided_slice %120 {offsets = [0, 256], sizes = [8, 128], strides = [1, 1]} : vector<8x512xf32> to vector<8x128xf32>
    %134 = math.tanh %133 : vector<8x128xf32>
    %135 = vector.extract_strided_slice %120 {offsets = [0, 384], sizes = [8, 128], strides = [1, 1]} : vector<8x512xf32> to vector<8x128xf32>
    %136 = arith.negf %135 : vector<8x128xf32>
    %137 = math.exp %136 : vector<8x128xf32>
    %cst_41 = arith.constant 1.000000e+00 : f32
    %138 = vector.broadcast %cst_41 : f32 to vector<8x128xf32>
    %139 = arith.addf %138, %137 : vector<8x128xf32>
    %140 = arith.divf %138, %139 : vector<8x128xf32>
    %141 = arith.mulf %132, %108 : vector<8x128xf32>
    %142 = arith.mulf %126, %134 : vector<8x128xf32>
    %143 = arith.addf %141, %142 : vector<8x128xf32>
    %144 = math.tanh %143 : vector<8x128xf32>
    %145 = arith.mulf %140, %144 : vector<8x128xf32>
    %146 = arith.index_cast %114 : i32 to index
    %c0_42 = arith.constant 0 : index
    %147 = vector.load %arg13[%146, %c0_42] : memref<64x128xf32, #tpu.memory_space<vmem>>, vector<8x128xf32>
    tpu.vector_store %arg13[%146, %c0_42], %145 {strides = array<i32>} : memref<64x128xf32, #tpu.memory_space<vmem>>, vector<8x128xf32>,
    %c4_i32 = arith.constant 4 : i32
    %c8_i32_43 = arith.constant 8 : i32
    %148 = arith.muli %c4_i32, %c8_i32_43 : i32
    %149 = tpu.assume_multiple %148, 8 : i32
    %150 = arith.index_cast %149 : i32 to index
    %c0_44 = arith.constant 0 : index
    %151 = vector.load %arg12[%150, %c0_44] : memref<64x512xf32, #tpu.memory_space<vmem>>, vector<8x512xf32>
    %152 = arith.truncf %145 : vector<8x128xf32> to vector<8x128xbf16>
    %c0_45 = arith.constant 0 : index
    %c0_46 = arith.constant 0 : index
    %153 = vector.load %arg3[%c0_45, %c0_46] : memref<128x512xbf16, #tpu.memory_space<vmem>>, vector<128x512xbf16>
    %cst_47 = arith.constant dense<0.000000e+00> : vector<8x512xf32>
    %154 = tpu.matmul %152, %153, %cst_47 {dimension_numbers = #tpu.dot_dimension_numbers<[1], [0], [0], [1], [0, 0, 1, 1], [], []>} : vector<8x128xbf16>, vector<128x512xbf16>, vector<8x512xf32> -> vector<8x512xf32>
    %155 = arith.addf %151, %154 : vector<8x512xf32>
    %156 = vector.extract_strided_slice %155 {offsets = [0, 0], sizes = [8, 128], strides = [1, 1]} : vector<8x512xf32> to vector<8x128xf32>
    %157 = arith.negf %156 : vector<8x128xf32>
    %158 = math.exp %157 : vector<8x128xf32>
    %cst_48 = arith.constant 1.000000e+00 : f32
    %159 = vector.broadcast %cst_48 : f32 to vector<8x128xf32>
    %160 = arith.addf %159, %158 : vector<8x128xf32>
    %161 = arith.divf %159, %160 : vector<8x128xf32>
    %162 = vector.extract_strided_slice %155 {offsets = [0, 128], sizes = [8, 128], strides = [1, 1]} : vector<8x512xf32> to vector<8x128xf32>
    %163 = arith.negf %162 : vector<8x128xf32>
    %164 = math.exp %163 : vector<8x128xf32>
    %cst_49 = arith.constant 1.000000e+00 : f32
    %165 = vector.broadcast %cst_49 : f32 to vector<8x128xf32>
    %166 = arith.addf %165, %164 : vector<8x128xf32>
    %167 = arith.divf %165, %166 : vector<8x128xf32>
    %168 = vector.extract_strided_slice %155 {offsets = [0, 256], sizes = [8, 128], strides = [1, 1]} : vector<8x512xf32> to vector<8x128xf32>
    %169 = math.tanh %168 : vector<8x128xf32>
    %170 = vector.extract_strided_slice %155 {offsets = [0, 384], sizes = [8, 128], strides = [1, 1]} : vector<8x512xf32> to vector<8x128xf32>
    %171 = arith.negf %170 : vector<8x128xf32>
    %172 = math.exp %171 : vector<8x128xf32>
    %cst_50 = arith.constant 1.000000e+00 : f32
    %173 = vector.broadcast %cst_50 : f32 to vector<8x128xf32>
    %174 = arith.addf %173, %172 : vector<8x128xf32>
    %175 = arith.divf %173, %174 : vector<8x128xf32>
    %176 = arith.mulf %167, %143 : vector<8x128xf32>
    %177 = arith.mulf %161, %169 : vector<8x128xf32>
    %178 = arith.addf %176, %177 : vector<8x128xf32>
    %179 = math.tanh %178 : vector<8x128xf32>
    %180 = arith.mulf %175, %179 : vector<8x128xf32>
    %181 = arith.index_cast %149 : i32 to index
    %c0_51 = arith.constant 0 : index
    %182 = vector.load %arg13[%181, %c0_51] : memref<64x128xf32, #tpu.memory_space<vmem>>, vector<8x128xf32>
    tpu.vector_store %arg13[%181, %c0_51], %180 {strides = array<i32>} : memref<64x128xf32, #tpu.memory_space<vmem>>, vector<8x128xf32>,
    %c5_i32 = arith.constant 5 : i32
    %c8_i32_52 = arith.constant 8 : i32
    %183 = arith.muli %c5_i32, %c8_i32_52 : i32
    %184 = tpu.assume_multiple %183, 8 : i32
    %185 = arith.index_cast %184 : i32 to index
    %c0_53 = arith.constant 0 : index
    %186 = vector.load %arg12[%185, %c0_53] : memref<64x512xf32, #tpu.memory_space<vmem>>, vector<8x512xf32>
    %187 = arith.truncf %180 : vector<8x128xf32> to vector<8x128xbf16>
    %c0_54 = arith.constant 0 : index
    %c0_55 = arith.constant 0 : index
    %188 = vector.load %arg3[%c0_54, %c0_55] : memref<128x512xbf16, #tpu.memory_space<vmem>>, vector<128x512xbf16>
    %cst_56 = arith.constant dense<0.000000e+00> : vector<8x512xf32>
    %189 = tpu.matmul %187, %188, %cst_56 {dimension_numbers = #tpu.dot_dimension_numbers<[1], [0], [0], [1], [0, 0, 1, 1], [], []>} : vector<8x128xbf16>, vector<128x512xbf16>, vector<8x512xf32> -> vector<8x512xf32>
    %190 = arith.addf %186, %189 : vector<8x512xf32>
    %191 = vector.extract_strided_slice %190 {offsets = [0, 0], sizes = [8, 128], strides = [1, 1]} : vector<8x512xf32> to vector<8x128xf32>
    %192 = arith.negf %191 : vector<8x128xf32>
    %193 = math.exp %192 : vector<8x128xf32>
    %cst_57 = arith.constant 1.000000e+00 : f32
    %194 = vector.broadcast %cst_57 : f32 to vector<8x128xf32>
    %195 = arith.addf %194, %193 : vector<8x128xf32>
    %196 = arith.divf %194, %195 : vector<8x128xf32>
    %197 = vector.extract_strided_slice %190 {offsets = [0, 128], sizes = [8, 128], strides = [1, 1]} : vector<8x512xf32> to vector<8x128xf32>
    %198 = arith.negf %197 : vector<8x128xf32>
    %199 = math.exp %198 : vector<8x128xf32>
    %cst_58 = arith.constant 1.000000e+00 : f32
    %200 = vector.broadcast %cst_58 : f32 to vector<8x128xf32>
    %201 = arith.addf %200, %199 : vector<8x128xf32>
    %202 = arith.divf %200, %201 : vector<8x128xf32>
    %203 = vector.extract_strided_slice %190 {offsets = [0, 256], sizes = [8, 128], strides = [1, 1]} : vector<8x512xf32> to vector<8x128xf32>
    %204 = math.tanh %203 : vector<8x128xf32>
    %205 = vector.extract_strided_slice %190 {offsets = [0, 384], sizes = [8, 128], strides = [1, 1]} : vector<8x512xf32> to vector<8x128xf32>
    %206 = arith.negf %205 : vector<8x128xf32>
    %207 = math.exp %206 : vector<8x128xf32>
    %cst_59 = arith.constant 1.000000e+00 : f32
    %208 = vector.broadcast %cst_59 : f32 to vector<8x128xf32>
    %209 = arith.addf %208, %207 : vector<8x128xf32>
    %210 = arith.divf %208, %209 : vector<8x128xf32>
    %211 = arith.mulf %202, %178 : vector<8x128xf32>
    %212 = arith.mulf %196, %204 : vector<8x128xf32>
    %213 = arith.addf %211, %212 : vector<8x128xf32>
    %214 = math.tanh %213 : vector<8x128xf32>
    %215 = arith.mulf %210, %214 : vector<8x128xf32>
    %216 = arith.index_cast %184 : i32 to index
    %c0_60 = arith.constant 0 : index
    %217 = vector.load %arg13[%216, %c0_60] : memref<64x128xf32, #tpu.memory_space<vmem>>, vector<8x128xf32>
    tpu.vector_store %arg13[%216, %c0_60], %215 {strides = array<i32>} : memref<64x128xf32, #tpu.memory_space<vmem>>, vector<8x128xf32>,
    %c6_i32 = arith.constant 6 : i32
    %c8_i32_61 = arith.constant 8 : i32
    %218 = arith.muli %c6_i32, %c8_i32_61 : i32
    %219 = tpu.assume_multiple %218, 8 : i32
    %220 = arith.index_cast %219 : i32 to index
    %c0_62 = arith.constant 0 : index
    %221 = vector.load %arg12[%220, %c0_62] : memref<64x512xf32, #tpu.memory_space<vmem>>, vector<8x512xf32>
    %222 = arith.truncf %215 : vector<8x128xf32> to vector<8x128xbf16>
    %c0_63 = arith.constant 0 : index
    %c0_64 = arith.constant 0 : index
    %223 = vector.load %arg3[%c0_63, %c0_64] : memref<128x512xbf16, #tpu.memory_space<vmem>>, vector<128x512xbf16>
    %cst_65 = arith.constant dense<0.000000e+00> : vector<8x512xf32>
    %224 = tpu.matmul %222, %223, %cst_65 {dimension_numbers = #tpu.dot_dimension_numbers<[1], [0], [0], [1], [0, 0, 1, 1], [], []>} : vector<8x128xbf16>, vector<128x512xbf16>, vector<8x512xf32> -> vector<8x512xf32>
    %225 = arith.addf %221, %224 : vector<8x512xf32>
    %226 = vector.extract_strided_slice %225 {offsets = [0, 0], sizes = [8, 128], strides = [1, 1]} : vector<8x512xf32> to vector<8x128xf32>
    %227 = arith.negf %226 : vector<8x128xf32>
    %228 = math.exp %227 : vector<8x128xf32>
    %cst_66 = arith.constant 1.000000e+00 : f32
    %229 = vector.broadcast %cst_66 : f32 to vector<8x128xf32>
    %230 = arith.addf %229, %228 : vector<8x128xf32>
    %231 = arith.divf %229, %230 : vector<8x128xf32>
    %232 = vector.extract_strided_slice %225 {offsets = [0, 128], sizes = [8, 128], strides = [1, 1]} : vector<8x512xf32> to vector<8x128xf32>
    %233 = arith.negf %232 : vector<8x128xf32>
    %234 = math.exp %233 : vector<8x128xf32>
    %cst_67 = arith.constant 1.000000e+00 : f32
    %235 = vector.broadcast %cst_67 : f32 to vector<8x128xf32>
    %236 = arith.addf %235, %234 : vector<8x128xf32>
    %237 = arith.divf %235, %236 : vector<8x128xf32>
    %238 = vector.extract_strided_slice %225 {offsets = [0, 256], sizes = [8, 128], strides = [1, 1]} : vector<8x512xf32> to vector<8x128xf32>
    %239 = math.tanh %238 : vector<8x128xf32>
    %240 = vector.extract_strided_slice %225 {offsets = [0, 384], sizes = [8, 128], strides = [1, 1]} : vector<8x512xf32> to vector<8x128xf32>
    %241 = arith.negf %240 : vector<8x128xf32>
    %242 = math.exp %241 : vector<8x128xf32>
    %cst_68 = arith.constant 1.000000e+00 : f32
    %243 = vector.broadcast %cst_68 : f32 to vector<8x128xf32>
    %244 = arith.addf %243, %242 : vector<8x128xf32>
    %245 = arith.divf %243, %244 : vector<8x128xf32>
    %246 = arith.mulf %237, %213 : vector<8x128xf32>
    %247 = arith.mulf %231, %239 : vector<8x128xf32>
    %248 = arith.addf %246, %247 : vector<8x128xf32>
    %249 = math.tanh %248 : vector<8x128xf32>
    %250 = arith.mulf %245, %249 : vector<8x128xf32>
    %251 = arith.index_cast %219 : i32 to index
    %c0_69 = arith.constant 0 : index
    %252 = vector.load %arg13[%251, %c0_69] : memref<64x128xf32, #tpu.memory_space<vmem>>, vector<8x128xf32>
    tpu.vector_store %arg13[%251, %c0_69], %250 {strides = array<i32>} : memref<64x128xf32, #tpu.memory_space<vmem>>, vector<8x128xf32>,
    %c7_i32 = arith.constant 7 : i32
    %c8_i32_70 = arith.constant 8 : i32
    %253 = arith.muli %c7_i32, %c8_i32_70 : i32
    %254 = tpu.assume_multiple %253, 8 : i32
    %255 = arith.index_cast %254 : i32 to index
    %c0_71 = arith.constant 0 : index
    %256 = vector.load %arg12[%255, %c0_71] : memref<64x512xf32, #tpu.memory_space<vmem>>, vector<8x512xf32>
    %257 = arith.truncf %250 : vector<8x128xf32> to vector<8x128xbf16>
    %c0_72 = arith.constant 0 : index
    %c0_73 = arith.constant 0 : index
    %258 = vector.load %arg3[%c0_72, %c0_73] : memref<128x512xbf16, #tpu.memory_space<vmem>>, vector<128x512xbf16>
    %cst_74 = arith.constant dense<0.000000e+00> : vector<8x512xf32>
    %259 = tpu.matmul %257, %258, %cst_74 {dimension_numbers = #tpu.dot_dimension_numbers<[1], [0], [0], [1], [0, 0, 1, 1], [], []>} : vector<8x128xbf16>, vector<128x512xbf16>, vector<8x512xf32> -> vector<8x512xf32>
    %260 = arith.addf %256, %259 : vector<8x512xf32>
    %261 = vector.extract_strided_slice %260 {offsets = [0, 0], sizes = [8, 128], strides = [1, 1]} : vector<8x512xf32> to vector<8x128xf32>
    %262 = arith.negf %261 : vector<8x128xf32>
    %263 = math.exp %262 : vector<8x128xf32>
    %cst_75 = arith.constant 1.000000e+00 : f32
    %264 = vector.broadcast %cst_75 : f32 to vector<8x128xf32>
    %265 = arith.addf %264, %263 : vector<8x128xf32>
    %266 = arith.divf %264, %265 : vector<8x128xf32>
    %267 = vector.extract_strided_slice %260 {offsets = [0, 128], sizes = [8, 128], strides = [1, 1]} : vector<8x512xf32> to vector<8x128xf32>
    %268 = arith.negf %267 : vector<8x128xf32>
    %269 = math.exp %268 : vector<8x128xf32>
    %cst_76 = arith.constant 1.000000e+00 : f32
    %270 = vector.broadcast %cst_76 : f32 to vector<8x128xf32>
    %271 = arith.addf %270, %269 : vector<8x128xf32>
    %272 = arith.divf %270, %271 : vector<8x128xf32>
    %273 = vector.extract_strided_slice %260 {offsets = [0, 256], sizes = [8, 128], strides = [1, 1]} : vector<8x512xf32> to vector<8x128xf32>
    %274 = math.tanh %273 : vector<8x128xf32>
    %275 = vector.extract_strided_slice %260 {offsets = [0, 384], sizes = [8, 128], strides = [1, 1]} : vector<8x512xf32> to vector<8x128xf32>
    %276 = arith.negf %275 : vector<8x128xf32>
    %277 = math.exp %276 : vector<8x128xf32>
    %cst_77 = arith.constant 1.000000e+00 : f32
    %278 = vector.broadcast %cst_77 : f32 to vector<8x128xf32>
    %279 = arith.addf %278, %277 : vector<8x128xf32>
    %280 = arith.divf %278, %279 : vector<8x128xf32>
    %281 = arith.mulf %272, %248 : vector<8x128xf32>
    %282 = arith.mulf %266, %274 : vector<8x128xf32>
    %283 = arith.addf %281, %282 : vector<8x128xf32>
    %284 = math.tanh %283 : vector<8x128xf32>
    %285 = arith.mulf %280, %284 : vector<8x128xf32>
    %286 = arith.index_cast %254 : i32 to index
    %c0_78 = arith.constant 0 : index
    %287 = vector.load %arg13[%286, %c0_78] : memref<64x128xf32, #tpu.memory_space<vmem>>, vector<8x128xf32>
    tpu.vector_store %arg13[%286, %c0_78], %285 {strides = array<i32>} : memref<64x128xf32, #tpu.memory_space<vmem>>, vector<8x128xf32>,
    %c8_i32_79 = arith.constant 8 : i32
    %c0_80 = arith.constant 0 : index
    %c0_81 = arith.constant 0 : index
    %288 = vector.load %arg13[%c0_80, %c0_81] : memref<64x128xf32, #tpu.memory_space<vmem>>, vector<64x128xf32>
    %c0_82 = arith.constant 0 : index
    %c0_83 = arith.constant 0 : index
    %289 = vector.load %arg5[%c0_82, %c0_83] : memref<128x128xf32, #tpu.memory_space<vmem>>, vector<128x128xf32>
    %cst_84 = arith.constant dense<0.000000e+00> : vector<64x128xf32>
    %290 = tpu.matmul %288, %289, %cst_84 {dimension_numbers = #tpu.dot_dimension_numbers<[1], [0], [0], [1], [0, 0, 1, 1], [], []>} : vector<64x128xf32>, vector<128x128xf32>, vector<64x128xf32> -> vector<64x128xf32>
    %c0_85 = arith.constant 0 : index
    %c0_86 = arith.constant 0 : index
    %291 = vector.load %arg6[%c0_85, %c0_86] : memref<1x128xf32, #tpu.memory_space<vmem>>, vector<1x128xf32>
    %292 = vector.broadcast %291 : vector<1x128xf32> to vector<64x128xf32>
    %293 = arith.addf %290, %292 : vector<64x128xf32>
    %294 = math.tanh %293 : vector<64x128xf32>
    %c0_87 = arith.constant 0 : index
    %c0_88 = arith.constant 0 : index
    %295 = vector.load %arg7[%c0_87, %c0_88] : memref<128x4xf32, #tpu.memory_space<vmem>>, vector<128x4xf32>
    %cst_89 = arith.constant dense<0.000000e+00> : vector<64x4xf32>
    %296 = tpu.matmul %294, %295, %cst_89 {dimension_numbers = #tpu.dot_dimension_numbers<[1], [0], [0], [1], [0, 0, 1, 1], [], []>} : vector<64x128xf32>, vector<128x4xf32>, vector<64x4xf32> -> vector<64x4xf32>
    %c0_90 = arith.constant 0 : index
    %c0_91 = arith.constant 0 : index
    %297 = vector.load %arg8[%c0_90, %c0_91] : memref<1x4xf32, #tpu.memory_space<vmem>>, vector<1x4xf32>
    %298 = vector.broadcast %297 : vector<1x4xf32> to vector<64x4xf32>
    %299 = arith.addf %296, %298 : vector<64x4xf32>
    %300 = vector.shape_cast %299 : vector<64x4xf32> to vector<8x8x4xf32>
    %cst_92 = arith.constant dense<0xFF800000> : vector<8x4xf32>
    %301 = vector.multi_reduction <maximumf>, %300, %cst_92 [0] : vector<8x8x4xf32> to vector<8x4xf32>
    %302 = vector.shape_cast %301 : vector<8x4xf32> to vector<1x8x4xf32>
    %303 = vector.broadcast %302 : vector<1x8x4xf32> to vector<8x8x4xf32>
    %304 = arith.subf %300, %303 : vector<8x8x4xf32>
    %305 = math.exp %304 : vector<8x8x4xf32>
    %cst_93 = arith.constant dense<0.000000e+00> : vector<8x4xf32>
    %306 = vector.multi_reduction <add>, %305, %cst_93 [0] : vector<8x8x4xf32> to vector<8x4xf32>
    %307 = vector.shape_cast %306 : vector<8x4xf32> to vector<1x8x4xf32>
    %308 = vector.broadcast %307 : vector<1x8x4xf32> to vector<8x8x4xf32>
    %309 = arith.divf %305, %308 : vector<8x8x4xf32>
    %310 = vector.shape_cast %288 : vector<64x128xf32> to vector<8x8x128xf32>
    %cst_94 = arith.constant 0.000000e+00 : f32
    %311 = vector.broadcast %cst_94 : f32 to vector<8x128xf32>
    %312 = vector.extract_strided_slice %309 {offsets = [0, 0, 0], sizes = [8, 8, 1], strides = [1, 1, 1]} : vector<8x8x4xf32> to vector<8x8x1xf32>
    %313 = vector.broadcast %312 : vector<8x8x1xf32> to vector<8x8x128xf32>
    %314 = arith.mulf %310, %313 : vector<8x8x128xf32>
    %cst_95 = arith.constant dense<0.000000e+00> : vector<8x128xf32>
    %315 = vector.multi_reduction <add>, %314, %cst_95 [0] : vector<8x8x128xf32> to vector<8x128xf32>
    %c0_96 = arith.constant 0 : index
    %c0_97 = arith.constant 0 : index
    %c0_98 = arith.constant 0 : index
    %316 = vector.load %arg9[%c0_96, %c0_97, %c0_98] : memref<4x128x128xf32, #tpu.memory_space<vmem>>, vector<1x128x128xf32>
    %317 = vector.shape_cast %316 : vector<1x128x128xf32> to vector<128x128xf32>
    %cst_99 = arith.constant dense<0.000000e+00> : vector<8x128xf32>
    %318 = tpu.matmul %315, %317, %cst_99 {dimension_numbers = #tpu.dot_dimension_numbers<[1], [0], [0], [1], [0, 0, 1, 1], [], []>} : vector<8x128xf32>, vector<128x128xf32>, vector<8x128xf32> -> vector<8x128xf32>
    %319 = arith.addf %311, %318 : vector<8x128xf32>
    %320 = vector.extract_strided_slice %309 {offsets = [0, 0, 1], sizes = [8, 8, 1], strides = [1, 1, 1]} : vector<8x8x4xf32> to vector<8x8x1xf32>
    %321 = vector.broadcast %320 : vector<8x8x1xf32> to vector<8x8x128xf32>
    %322 = arith.mulf %310, %321 : vector<8x8x128xf32>
    %cst_100 = arith.constant dense<0.000000e+00> : vector<8x128xf32>
    %323 = vector.multi_reduction <add>, %322, %cst_100 [0] : vector<8x8x128xf32> to vector<8x128xf32>
    %c1 = arith.constant 1 : index
    %c0_101 = arith.constant 0 : index
    %c0_102 = arith.constant 0 : index
    %324 = vector.load %arg9[%c1, %c0_101, %c0_102] : memref<4x128x128xf32, #tpu.memory_space<vmem>>, vector<1x128x128xf32>
    %325 = vector.shape_cast %324 : vector<1x128x128xf32> to vector<128x128xf32>
    %cst_103 = arith.constant dense<0.000000e+00> : vector<8x128xf32>
    %326 = tpu.matmul %323, %325, %cst_103 {dimension_numbers = #tpu.dot_dimension_numbers<[1], [0], [0], [1], [0, 0, 1, 1], [], []>} : vector<8x128xf32>, vector<128x128xf32>, vector<8x128xf32> -> vector<8x128xf32>
    %327 = arith.addf %319, %326 : vector<8x128xf32>
    %328 = vector.extract_strided_slice %309 {offsets = [0, 0, 2], sizes = [8, 8, 1], strides = [1, 1, 1]} : vector<8x8x4xf32> to vector<8x8x1xf32>
    %329 = vector.broadcast %328 : vector<8x8x1xf32> to vector<8x8x128xf32>
    %330 = arith.mulf %310, %329 : vector<8x8x128xf32>
    %cst_104 = arith.constant dense<0.000000e+00> : vector<8x128xf32>
    %331 = vector.multi_reduction <add>, %330, %cst_104 [0] : vector<8x8x128xf32> to vector<8x128xf32>
    %c2 = arith.constant 2 : index
    %c0_105 = arith.constant 0 : index
    %c0_106 = arith.constant 0 : index
    %332 = vector.load %arg9[%c2, %c0_105, %c0_106] : memref<4x128x128xf32, #tpu.memory_space<vmem>>, vector<1x128x128xf32>
    %333 = vector.shape_cast %332 : vector<1x128x128xf32> to vector<128x128xf32>
    %cst_107 = arith.constant dense<0.000000e+00> : vector<8x128xf32>
    %334 = tpu.matmul %331, %333, %cst_107 {dimension_numbers = #tpu.dot_dimension_numbers<[1], [0], [0], [1], [0, 0, 1, 1], [], []>} : vector<8x128xf32>, vector<128x128xf32>, vector<8x128xf32> -> vector<8x128xf32>
    %335 = arith.addf %327, %334 : vector<8x128xf32>
    %336 = vector.extract_strided_slice %309 {offsets = [0, 0, 3], sizes = [8, 8, 1], strides = [1, 1, 1]} : vector<8x8x4xf32> to vector<8x8x1xf32>
    %337 = vector.broadcast %336 : vector<8x8x1xf32> to vector<8x8x128xf32>
    %338 = arith.mulf %310, %337 : vector<8x8x128xf32>
    %cst_108 = arith.constant dense<0.000000e+00> : vector<8x128xf32>
    %339 = vector.multi_reduction <add>, %338, %cst_108 [0] : vector<8x8x128xf32> to vector<8x128xf32>
    %c3 = arith.constant 3 : index
    %c0_109 = arith.constant 0 : index
    %c0_110 = arith.constant 0 : index
    %340 = vector.load %arg9[%c3, %c0_109, %c0_110] : memref<4x128x128xf32, #tpu.memory_space<vmem>>, vector<1x128x128xf32>
    %341 = vector.shape_cast %340 : vector<1x128x128xf32> to vector<128x128xf32>
    %cst_111 = arith.constant dense<0.000000e+00> : vector<8x128xf32>
    %342 = tpu.matmul %339, %341, %cst_111 {dimension_numbers = #tpu.dot_dimension_numbers<[1], [0], [0], [1], [0, 0, 1, 1], [], []>} : vector<8x128xf32>, vector<128x128xf32>, vector<8x128xf32> -> vector<8x128xf32>
    %343 = arith.addf %335, %342 : vector<8x128xf32>
    %c0_112 = arith.constant 0 : index
    %c0_113 = arith.constant 0 : index
    %344 = vector.load %arg10[%c0_112, %c0_113] : memref<1x128xf32, #tpu.memory_space<vmem>>, vector<1x128xf32>
    %345 = vector.broadcast %344 : vector<1x128xf32> to vector<8x128xf32>
    %346 = arith.addf %343, %345 : vector<8x128xf32>
    %c0_114 = arith.constant 0 : index
    %c0_115 = arith.constant 0 : index
    %347 = vector.load %arg11[%c0_114, %c0_115] : memref<8x128xf32, #tpu.memory_space<vmem>>, vector<8x128xf32>
    tpu.vector_store %arg11[%c0_114, %c0_115], %346 {strides = array<i32>} : memref<8x128xf32, #tpu.memory_space<vmem>>, vector<8x128xf32>,
    return
  }
  func.func @transform_0(%arg0: i32) -> (i32, i32) {
    %c0_i32 = arith.constant 0 : i32
    %c0_i32_0 = arith.constant 0 : i32
    return %arg0, %c0_i32 : i32, i32
  }
  func.func @transform_1(%arg0: i32) -> (i32, i32) {
    %c0_i32 = arith.constant 0 : i32
    %c0_i32_0 = arith.constant 0 : i32
    %c0_i32_1 = arith.constant 0 : i32
    return %c0_i32, %c0_i32_0 : i32, i32
  }
  func.func @transform_2(%arg0: i32) -> (i32, i32) {
    %c0_i32 = arith.constant 0 : i32
    %c0_i32_0 = arith.constant 0 : i32
    %c0_i32_1 = arith.constant 0 : i32
    return %c0_i32, %c0_i32_0 : i32, i32
  }
  func.func @transform_3(%arg0: i32) -> (i32, i32) {
    %c0_i32 = arith.constant 0 : i32
    %c0_i32_0 = arith.constant 0 : i32
    %c0_i32_1 = arith.constant 0 : i32
    return %c0_i32, %c0_i32_0 : i32, i32
  }
  func.func @transform_4(%arg0: i32) -> (i32, i32) {
    %c0_i32 = arith.constant 0 : i32
    %c0_i32_0 = arith.constant 0 : i32
    %c0_i32_1 = arith.constant 0 : i32
    return %c0_i32, %c0_i32_0 : i32, i32
  }
  func.func @transform_5(%arg0: i32) -> (i32, i32) {
    %c0_i32 = arith.constant 0 : i32
    %c0_i32_0 = arith.constant 0 : i32
    %c0_i32_1 = arith.constant 0 : i32
    return %c0_i32, %c0_i32_0 : i32, i32
  }
  func.func @transform_6(%arg0: i32) -> (i32, i32) {
    %c0_i32 = arith.constant 0 : i32
    %c0_i32_0 = arith.constant 0 : i32
    %c0_i32_1 = arith.constant 0 : i32
    return %c0_i32, %c0_i32_0 : i32, i32
  }
  func.func @transform_7(%arg0: i32) -> (i32, i32) {
    %c0_i32 = arith.constant 0 : i32
    %c0_i32_0 = arith.constant 0 : i32
    %c0_i32_1 = arith.constant 0 : i32
    return %c0_i32, %c0_i32_0 : i32, i32
  }
  func.func @transform_8(%arg0: i32) -> (i32, i32, i32) {
    %c0_i32 = arith.constant 0 : i32
    %c0_i32_0 = arith.constant 0 : i32
    %c0_i32_1 = arith.constant 0 : i32
    %c0_i32_2 = arith.constant 0 : i32
    return %c0_i32, %c0_i32_0, %c0_i32_1 : i32, i32, i32
  }
  func.func @transform_9(%arg0: i32) -> (i32, i32) {
    %c0_i32 = arith.constant 0 : i32
    %c0_i32_0 = arith.constant 0 : i32
    %c0_i32_1 = arith.constant 0 : i32
    return %c0_i32, %c0_i32_0 : i32, i32
  }
  func.func @transform_10(%arg0: i32) -> (i32, i32) {
    %c0_i32 = arith.constant 0 : i32
    %c0_i32_0 = arith.constant 0 : i32
    return %arg0, %c0_i32 : i32, i32
  }
}

</mosaic_0001>

<bundles_post_ra>
// kernel: tpu_custom_call.1
= control target key start
LH: loop header
LB: loop body
LE: loop exit
PB: predicated region body
PF: predicated region fallthrough
CT: control target
= control target key end

     0   :  { %15 = vsyncpa [#allocation5], 0  ;;  %s6178_s0 = inlined_call_operand.hbm [shape: bf16[64,128], index: 0, kind: input, shape index: {}]   ;;  %s6179_s1 = inlined_call_operand.hbm [shape: bf16[128,512], index: 1, kind: input, shape index: {}]   ;;  %s6180_s2 = inlined_call_operand.hbm [shape: bf16[128,512], index: 2, kind: input, shape index: {}]   ;;  %s6181_s3 = inlined_call_operand.vmem [shape: f32[1,512], index: 3, kind: input, shape index: {}]   ;;  %s6182_s4 = inlined_call_operand.vmem [shape: f32[128,128], index: 4, kind: input, shape index: {}]   ;;  %s6183_s5 = inlined_call_operand.vmem [shape: f32[1,128], index: 5, kind: input, shape index: {}]   ;;  %s6184_s6 = inlined_call_operand.vmem [shape: f32[128,4], index: 6, kind: input, shape index: {}]   ;;  %s6185_s7 = inlined_call_operand.vmem [shape: f32[1,4], index: 7, kind: input, shape index: {}]   ;;  %s6186_s8 = inlined_call_operand.hbm [shape: f32[4,128,128], index: 8, kind: input, shape index: {}]   ;;  %s6187_s9 = inlined_call_operand.vmem [shape: f32[1,128], index: 9, kind: input, shape index: {}]   ;;  %s6188_s10 = inlined_call_operand.hbm [shape: f32[8,128], index: 10, kind: output, shape index: {}]  }
   0x1   :  { %16 = vsyncpa [#allocation8], 0 }
   0x2   :  { %17 = vsyncpa [#allocation11], 0 }
   0x3   :  { %18 = vsyncpa [#allocation6], 0  ;;  %s5201_s13 = smov [#allocation7]   ;;  %s5083_s17 = scalar_lea.hbm %s6179_s1, 4096 }
   0x4   :  { %s36_s14 = sshll.u32 %s5201_s13, 4  ;;  %p5084_p0 = scmp.ne.s32.totalorder %s6179_s1, %s5083_s17  ;;  %s37_s14 = int_to_ptr.vmem [resolvable:$true] %s36_s14 }
   0x5   :  { %p5087_p1 = scmp.lt.u32.totalorder %s5083_s17, %s6179_s1 }
   0x7   :  { %p5089_p2 = pnand %p5087_p1, %p5084_p0 }
   0x9   :  { %5092 = shalt.err (!%p5089_p2)
}
   0xa   :  { %s5093_s22 = scalar_lea.vmem %s37_s14, 4096  ;;  %p5098_p4 = scmp.lt.s32.totalorder %s37_s14, %s37_s14 }
   0xb   :  { %p5094_p3 = scmp.ne.s32.totalorder %s37_s14, %s5093_s22  ;;  %p5099_p5 = scmp.lt.s32.totalorder %s5093_s22, %s5093_s22 }
   0xd   :  { %p5100_p6 = por %p5099_p5, %p5098_p4 }
   0xf   :  { %p5101_p7 = pnand %p5100_p6, %p5094_p3 }
  0x11   :  { %5104 = shalt.err (!%p5101_p7)
}
  0x12   :  { %s5202_s23 = smov 256   ;;  %s5203_s24 = smov 16  }
  0x13   :  { %42 = dma.hbm_to_vmem [thread:$0]  %s6179_s1, 4096, %s37_s14, [#allocation8], %s5202_s23, %s5202_s23, %s5203_s24  }
  0x14   :  { %s5204_s27 = smov [#allocation4]   ;;  %s5105_s11 = scalar_lea.hbm %s6178_s0, 512 }
  0x15   :  { %s24_s28 = sshll.u32 %s5204_s27, 4  ;;  %p5106_p8 = scmp.ne.s32.totalorder %s6178_s0, %s5105_s11  ;;  %s25_s28 = int_to_ptr.vmem [resolvable:$true] %s24_s28 }
  0x16   :  { %p5109_p9 = scmp.lt.u32.totalorder %s5105_s11, %s6178_s0 }
  0x18   :  { %p5111_p10 = pnand %p5109_p9, %p5106_p8 }
  0x1a   :  { %5114 = shalt.err (!%p5111_p10)
}
  0x1b   :  { %s5115_s17 = scalar_lea.vmem %s25_s28, 512  ;;  %p5120_p12 = scmp.lt.s32.totalorder %s25_s28, %s25_s28 }
  0x1c   :  { %p5116_p11 = scmp.ne.s32.totalorder %s25_s28, %s5115_s17  ;;  %p5121_p13 = scmp.lt.s32.totalorder %s5115_s17, %s5115_s17 }
  0x1e   :  { %p5122_p0 = por %p5121_p13, %p5120_p12 }
  0x20   :  { %p5123_p1 = pnand %p5122_p0, %p5116_p11 }
  0x22   :  { %5126 = shalt.err (!%p5123_p1)
}
  0x23   :  { %s5205_s1 = smov 64   ;;  %s5206_s14 = smov 4  }
  0x24   :  { %30 = dma.hbm_to_vmem [thread:$0]  %s6178_s0, 512, %s25_s28, [#allocation5], %s5205_s1, %s5205_s1, %s5206_s14  }
  0x25   :  { %s5207_s20 = smov [#allocation9]   ;;  %s5208_s22 = smov [#allocation10]  }
  0x26   :  { %s48_s21 = sshll.u32 %s5207_s20, 4  ;;  %s70_s25 = sshll.u32 %s5208_s22, 4  ;;  %s49_s21 = int_to_ptr.vmem [resolvable:$true] %s48_s21  ;;  %s5301_s25 = int_to_ptr.vmem [resolvable:$true] %s70_s25 }
  0x27   :  { %s5127_s29 = scalar_lea.hbm %s6180_s2, 4096 }
  0x28   :  { %p5128_p2 = scmp.ne.s32.totalorder %s6180_s2, %s5127_s29  ;;  %p5131_p3 = scmp.lt.u32.totalorder %s5127_s29, %s6180_s2 }
  0x2a   :  { %p5133_p4 = pnand %p5131_p3, %p5128_p2 }
  0x2c   :  { %5136 = shalt.err (!%p5133_p4)
}
  0x2d   :  { %s5137_s0 = scalar_lea.vmem %s49_s21, 4096  ;;  %p5142_p6 = scmp.lt.s32.totalorder %s49_s21, %s49_s21 }
  0x2e   :  { %p5138_p5 = scmp.ne.s32.totalorder %s49_s21, %s5137_s0  ;;  %p5143_p7 = scmp.lt.s32.totalorder %s5137_s0, %s5137_s0 }
  0x30   :  { %p5144_p8 = por %p5143_p7, %p5142_p6 }
  0x32   :  { %p5145_p9 = pnand %p5144_p8, %p5138_p5 }
  0x34   :  { %5148 = shalt.err (!%p5145_p9)
}
  0x35   :  { %54 = dma.hbm_to_vmem [thread:$0]  %s6180_s2, 4096, %s49_s21, [#allocation8], %s5202_s23, %s5202_s23, %s5203_s24  }
  0x36   :  { %s5149_s1 = scalar_lea.hbm %s6186_s8, 8192 }
  0x37   :  { %p5150_p10 = scmp.ne.s32.totalorder %s6186_s8, %s5149_s1  ;;  %p5153_p11 = scmp.lt.u32.totalorder %s5149_s1, %s6186_s8 }
  0x39   :  { %p5155_p12 = pnand %p5153_p11, %p5150_p10 }
  0x3b   :  { %5158 = shalt.err (!%p5155_p12)
}
  0x3c   :  { %s5159_s22 = scalar_lea.vmem %s5301_s25, 8192  ;;  %p5164_p0 = scmp.lt.s32.totalorder %s5301_s25, %s5301_s25 }
  0x3d   :  { %p5160_p13 = scmp.ne.s32.totalorder %s5301_s25, %s5159_s22  ;;  %p5165_p1 = scmp.lt.s32.totalorder %s5159_s22, %s5159_s22 }
  0x3f   :  { %p5166_p2 = por %p5165_p1, %p5164_p0 }
  0x41   :  { %p5167_p3 = pnand %p5166_p2, %p5160_p13 }
  0x43   :  { %5170 = shalt.err (!%p5167_p3)
}
  0x44   :  { %s5209_s2 = smov 128   ;;  %s5210_s23 = smov 8  }
  0x45   :  { %76 = dma.hbm_to_vmem [thread:$0]  %s6186_s8, 8192, %s5301_s25, [#allocation11], %s5209_s2, %s5209_s2, %s5210_s23  }
  0x46   :  { %5193 = dma.done.wait [#allocation5], 512  }
  0x47   :  { %5194 = vsyncadd [#allocation5], 4294966784 }
  0x48   :  { %5195 = dma.done.wait [#allocation8], 8192  }
  0x49   :  { %5196 = vsyncadd [#allocation8], 4294959104 }
  0x4a   :  { %5197 = dma.done.wait [#allocation11], 8192  }
  0x4b   :  { %5198 = vsyncadd [#allocation11], 4294959104  ;;  %v6189_v0 = vmov 0   ;;  %v4773_v1 = vld [vmem:[#allocation7 + $0x4] ss:$16 sps:$4 sm:$0xff]   ;;  %v4834_v44 = vld [vmem:[#allocation4 + $0x8] sm:$0xff]  }
  0x4c   :  { %370 = vmatprep.mubr.bf16.mxu0 %v6189_v0  ;;  %443 = vmatprep.mubr.bf16.mxu1 %v6189_v0  ;;  %v4775_v2 = vld [vmem:[#allocation7 + $0xc] ss:$16 sps:$4 sm:$0xff]   ;;  %v4777_v3 = vld [vmem:[#allocation7] ss:$16 sps:$4 sm:$0xff]   ;;  %v4778_v4 = vld [vmem:[#allocation7 + $0x8] ss:$16 sps:$4 sm:$0xff]  }
  0x4d   :  { %4766 = vset.pattern.permute.xlu1 %v6189_v0  ;;  %338 = vmatprep.subr.bf16.mxu0 %v4773_v1  ;;  %v4779_v5 = vld [vmem:[#allocation7 + $0x24] ss:$16 sps:$4 sm:$0xff]   ;;  %v4781_v6 = vld [vmem:[#allocation7 + $0x2c] ss:$16 sps:$4 sm:$0xff]   ;;  %v4783_v7 = vld [vmem:[#allocation7 + $0x20] ss:$16 sps:$4 sm:$0xff]  }
  0x4e   :  { %411 = vmatprep.subr.bf16.mxu1 %v4775_v2  ;;  %339 = vmatpush1.bf16.msra.mxu0 %v4777_v3  ;;  %v4784_v8 = vld [vmem:[#allocation7 + $0x28] ss:$16 sps:$4 sm:$0xff]   ;;  %v4785_v9 = vld [vmem:[#allocation7 + $0x44] ss:$16 sps:$4 sm:$0xff]   ;;  %v4787_v10 = vld [vmem:[#allocation7 + $0x4c] ss:$16 sps:$4 sm:$0xff]  }
  0x4f   :  { %412 = vmatpush1.bf16.msra.mxu1 %v4778_v4  ;;  %340 = vmatprep.subr.bf16.mxu0 %v4779_v5  ;;  %v4789_v11 = vld [vmem:[#allocation7 + $0x40] ss:$16 sps:$4 sm:$0xff]   ;;  %v4790_v12 = vld [vmem:[#allocation7 + $0x48] ss:$16 sps:$4 sm:$0xff]   ;;  %v4791_v13 = vld [vmem:[#allocation7 + $0x64] ss:$16 sps:$4 sm:$0xff]  }
  0x50   :  { %413 = vmatprep.subr.bf16.mxu1 %v4781_v6  ;;  %v4793_v14 = vld [vmem:[#allocation7 + $0x6c] ss:$16 sps:$4 sm:$0xff]   ;;  %v4795_v15 = vld [vmem:[#allocation7 + $0x60] ss:$16 sps:$4 sm:$0xff]   ;;  %v4796_v16 = vld [vmem:[#allocation7 + $0x68] ss:$16 sps:$4 sm:$0xff]   ;;  %v134_v6 = vlaneseq }
  0x51   :  { %v4797_v17 = vld [vmem:[#allocation7 + $0x84] ss:$16 sps:$4 sm:$0xff]   ;;  %v4799_v18 = vld [vmem:[#allocation7 + $0x8c] ss:$16 sps:$4 sm:$0xff]   ;;  %v4801_v19 = vld [vmem:[#allocation7 + $0x80] ss:$16 sps:$4 sm:$0xff]  }
  0x52   :  { %341 = vmatpush1.bf16.msra.mxu0 %v4783_v7  ;;  %v4802_v20 = vld [vmem:[#allocation7 + $0x88] ss:$16 sps:$4 sm:$0xff]   ;;  %v4803_v21 = vld [vmem:[#allocation7 + $0xa4] ss:$16 sps:$4 sm:$0xff]   ;;  %v4805_v22 = vld [vmem:[#allocation7 + $0xac] ss:$16 sps:$4 sm:$0xff]  }
  0x53   :  { %414 = vmatpush1.bf16.msra.mxu1 %v4784_v8  ;;  %342 = vmatprep.subr.bf16.mxu0 %v4785_v9  ;;  %v4807_v23 = vld [vmem:[#allocation7 + $0xa0] ss:$16 sps:$4 sm:$0xff]   ;;  %v4808_v24 = vld [vmem:[#allocation7 + $0xa8] ss:$16 sps:$4 sm:$0xff]   ;;  %v4809_v25 = vld [vmem:[#allocation7 + $0xc4] ss:$16 sps:$4 sm:$0xff]  }
  0x54   :  { %415 = vmatprep.subr.bf16.mxu1 %v4787_v10  ;;  %v4811_v26 = vld [vmem:[#allocation7 + $0xcc] ss:$16 sps:$4 sm:$0xff]   ;;  %v4813_v27 = vld [vmem:[#allocation7 + $0xc0] ss:$16 sps:$4 sm:$0xff]   ;;  %v4814_v28 = vld [vmem:[#allocation7 + $0xc8] ss:$16 sps:$4 sm:$0xff]  }
  0x55   :  { %v4815_v29 = vld [vmem:[#allocation7 + $0xe4] ss:$16 sps:$4 sm:$0xff]   ;;  %v4817_v30 = vld [vmem:[#allocation7 + $0xec] ss:$16 sps:$4 sm:$0xff]   ;;  %v4819_v31 = vld [vmem:[#allocation7 + $0xe0] ss:$16 sps:$4 sm:$0xff]  }
  0x56   :  { %343 = vmatpush1.bf16.msra.mxu0 %v4789_v11  ;;  %v4820_v32 = vld [vmem:[#allocation7 + $0xe8] ss:$16 sps:$4 sm:$0xff]   ;;  %v5338_v33 = vld [vmem:[#allocation9 + $0x4] ss:$16 sps:$4 sm:$0xff]   ;;  %v5340_v34 = vld [vmem:[#allocation9 + $0xc] ss:$16 sps:$4 sm:$0xff]  }
  0x57   :  { %416 = vmatpush1.bf16.msra.mxu1 %v4790_v12  ;;  %344 = vmatprep.subr.bf16.mxu0 %v4791_v13  ;;  %v4821_v35 = vld [vmem:[#allocation4] sm:$0xff]   ;;  %v5344_v37 = vld [vmem:[#allocation9 + $0x8] ss:$16 sps:$4 sm:$0xff]   ;;  %v5350_v39 = vld [vmem:[#allocation9 + $0x2c] ss:$16 sps:$4 sm:$0xff]   ;;  %v135_v7 = vshrl.u32 %v134_v6, 7 }
  0x58   :  { %417 = vmatprep.subr.bf16.mxu1 %v4793_v14  ;;  %v5342_v36 = vld [vmem:[#allocation9] ss:$16 sps:$4 sm:$0xff]   ;;  %v5348_v38 = vld [vmem:[#allocation9 + $0x24] ss:$16 sps:$4 sm:$0xff]   ;;  %v5356_v41 = vld [vmem:[#allocation9 + $0x28] ss:$16 sps:$4 sm:$0xff]  }
  0x59   :  { %v5352_v40 = vld [vmem:[#allocation9 + $0x20] ss:$16 sps:$4 sm:$0xff]   ;;  %v5360_v42 = vld [vmem:[#allocation9 + $0x44] ss:$16 sps:$4 sm:$0xff]   ;;  %v5362_v43 = vld [vmem:[#allocation9 + $0x4c] ss:$16 sps:$4 sm:$0xff]  }
  0x5a   :  { %345 = vmatpush1.bf16.msra.mxu0 %v4795_v15  ;;  %v5366_v45 = vld [vmem:[#allocation9 + $0x40] ss:$16 sps:$4 sm:$0xff]   ;;  %v5368_v46 = vld [vmem:[#allocation9 + $0x48] ss:$16 sps:$4 sm:$0xff]   ;;  %v5372_v47 = vld [vmem:[#allocation9 + $0x64] ss:$16 sps:$4 sm:$0xff]  }
  0x5b   :  { %418 = vmatpush1.bf16.msra.mxu1 %v4796_v16  ;;  %346 = vmatprep.subr.bf16.mxu0 %v4797_v17  ;;  %v5376_v48 = vld [vmem:[#allocation9 + $0x6c] ss:$16 sps:$4 sm:$0xff]   ;;  %v5378_v49 = vld [vmem:[#allocation9 + $0x60] ss:$16 sps:$4 sm:$0xff]   ;;  %v5380_v50 = vld [vmem:[#allocation9 + $0x68] ss:$16 sps:$4 sm:$0xff]  }
  0x5c   :  { %419 = vmatprep.subr.bf16.mxu1 %v4799_v18  ;;  %v5384_v51 = vld [vmem:[#allocation9 + $0x84] ss:$16 sps:$4 sm:$0xff]   ;;  %v5388_v52 = vld [vmem:[#allocation9 + $0x8c] ss:$16 sps:$4 sm:$0xff]   ;;  %v5392_v54 = vld [vmem:[#allocation9 + $0x80] ss:$16 sps:$4 sm:$0xff]  }
  0x5d   :  { %v4847_v53 = vld [vmem:[#allocation4 + $0x10] sm:$0xff]   ;;  %v5394_v55 = vld [vmem:[#allocation9 + $0x88] ss:$16 sps:$4 sm:$0xff]   ;;  %v5398_v57 = vld [vmem:[#allocation9 + $0xac] ss:$16 sps:$4 sm:$0xff]   ;;  %v144_v8 = vsub.s32 2, %v135_v7 }
  0x5e   :  { %347 = vmatpush1.bf16.msra.mxu0 %v4801_v19  ;;  %v5396_v56 = vld [vmem:[#allocation9 + $0xa4] ss:$16 sps:$4 sm:$0xff]   ;;  %v5404_v58 = vld [vmem:[#allocation9 + $0xa0] ss:$16 sps:$4 sm:$0xff]   ;;  %v5406_v59 = vld [vmem:[#allocation9 + $0xa8] ss:$16 sps:$4 sm:$0xff]  }
  0x5f   :  { %420 = vmatpush1.bf16.msra.mxu1 %v4802_v20  ;;  %348 = vmatprep.subr.bf16.mxu0 %v4803_v21  ;;  %v5408_v60 = vld [vmem:[#allocation9 + $0xc4] ss:$16 sps:$4 sm:$0xff]   ;;  %v5410_v61 = vld [vmem:[#allocation9 + $0xcc] ss:$16 sps:$4 sm:$0xff]   ;;  %v5418_v63 = vld [vmem:[#allocation9 + $0xc0] ss:$16 sps:$4 sm:$0xff]  }
  0x60   :  { %421 = vmatprep.subr.bf16.mxu1 %v4805_v22  ;;  %v4860_v62 = vld [vmem:[#allocation4 + $0x18] sm:$0xff]   ;;  %v5422_v2 = vld [vmem:[#allocation9 + $0xe4] ss:$16 sps:$4 sm:$0xff]   ;;  %v5432_v4 = vld [vmem:[#allocation9 + $0xe0] ss:$16 sps:$4 sm:$0xff]   ;;  %v148_v9 = vsub.s32 3, %v135_v7 }
  0x61   :  { %v5420_v1 = vld [vmem:[#allocation9 + $0xc8] ss:$16 sps:$4 sm:$0xff]   ;;  %v5428_v3 = vld [vmem:[#allocation9 + $0xec] ss:$16 sps:$4 sm:$0xff]   ;;  %v136_v10 = vsub.s32 0, %v135_v7  ;;  %v140_v12 = vsub.s32 1, %v135_v7 }
  0x62   :  { %349 = vmatpush1.bf16.msra.mxu0 %v4807_v23  ;;  %v5434_v5 = vld [vmem:[#allocation9 + $0xe8] ss:$16 sps:$4 sm:$0xff]   ;;  %v132_v11 = vld [vmem:[%s6181_s3] sm:$0xf]  ;;  %vm3282_vm0 = vcmask 31744   ;;  %vm5214_vm1 = vmmov 0  }
  0x63   :  { %422 = vmatpush1.bf16.msra.mxu1 %v4808_v24  ;;  %350 = vmatprep.subr.bf16.mxu0 %v4809_v25  ;;  %v5483_v13 = vrot.slane %v132_v11, %v144_v8  ;;  %v5489_v16 = vrot.slane %v132_v11, %v148_v9  ;;  %v137_v17 = vrot.slane %v132_v11, %v136_v10  ;;  %s5218_s18 = smov [#allocation12]  }
  0x64   :  { %423 = vmatprep.subr.bf16.mxu1 %v4811_v26  ;;  %v141_v20 = vrot.slane %v132_v11, %v140_v12  ;;  %s3906_s19 = sshll.u32 %s5218_s18, 4  ;;  %s3907_s19 = int_to_ptr.vmem [resolvable:$true] %s3906_s19 }
  0x65   :  { %s5171_s20 = scalar_lea.vmem %s3907_s19, 128  ;;  %p5176_p5 = scmp.lt.s32.totalorder %s3907_s19, %s3907_s19 }
  0x66   :  { %351 = vmatpush1.bf16.msra.mxu0 %v4813_v27  ;;  %p5172_p4 = scmp.ne.s32.totalorder %s3907_s19, %s5171_s20  ;;  %p5177_p6 = scmp.lt.s32.totalorder %s5171_s20, %s5171_s20 }
  0x67   :  { %424 = vmatpush1.bf16.msra.mxu1 %v4814_v28  ;;  %352 = vmatprep.subr.bf16.mxu0 %v4815_v29 }
  0x68   :  { %425 = vmatprep.subr.bf16.mxu1 %v4817_v30  ;;  %p5178_p7 = por %p5177_p6, %p5176_p5 }
  0x6a   :  { %353 = vmatpush1.bf16.msra.mxu0 %v4819_v31  ;;  %p5179_p8 = pnand %p5178_p7, %p5172_p4 }
  0x6b   :  { %426 = vmatpush1.bf16.msra.mxu1 %v4820_v32  ;;  %715 = vmatprep.subr.bf16.mxu0 %v5338_v33 }
  0x6c   :  { %756 = vmatprep.subr.bf16.mxu1 %v5340_v34 }
  0x6d   :  { %371 = vmatmul.mubr.bf16.vlgmr.msra.gmra.mrb[0].mxu0 %v4821_v35 }
  0x6e   :  { %444 = vmatmul.mubr.bf16.vlgmr.msra.gmra.mrb[0].mxu1 %v4821_v35  ;;  %716 = vmatpush1.bf16.msra.mxu0 %v5342_v36 }
  0x6f   :  { %757 = vmatpush1.bf16.msra.mxu1 %v5344_v37  ;;  %717 = vmatprep.subr.bf16.mxu0 %v5348_v38 }
  0x70   :  { %758 = vmatprep.subr.bf16.mxu1 %v5350_v39  ;;  %380 = vmatprep.mubr.bf16.mxu0 %v6189_v0 }
  0x71   :  { %453 = vmatprep.mubr.bf16.mxu1 %v6189_v0 }
  0x72   :  { %718 = vmatpush1.bf16.msra.mxu0 %v5352_v40 }
  0x73   :  { %759 = vmatpush1.bf16.msra.mxu1 %v5356_v41  ;;  %719 = vmatprep.subr.bf16.mxu0 %v5360_v42 }
  0x74   :  { %760 = vmatprep.subr.bf16.mxu1 %v5362_v43 }
  0x75   :  { %381 = vmatmul.mubr.bf16.gmra.mrb[4].mxu0 %v4834_v44 }
  0x76   :  { %454 = vmatmul.mubr.bf16.gmra.mrb[4].mxu1 %v4834_v44  ;;  %720 = vmatpush1.bf16.msra.mxu0 %v5366_v45 }
  0x77   :  { %761 = vmatpush1.bf16.msra.mxu1 %v5368_v46  ;;  %721 = vmatprep.subr.bf16.mxu0 %v5372_v47 }
  0x78   :  { %762 = vmatprep.subr.bf16.mxu1 %v5376_v48  ;;  %390 = vmatprep.mubr.bf16.mxu0 %v6189_v0 }
  0x79   :  { %463 = vmatprep.mubr.bf16.mxu1 %v6189_v0 }
  0x7a   :  { %722 = vmatpush1.bf16.msra.mxu0 %v5378_v49 }
  0x7b   :  { %763 = vmatpush1.bf16.msra.mxu1 %v5380_v50  ;;  %723 = vmatprep.subr.bf16.mxu0 %v5384_v51 }
  0x7c   :  { %764 = vmatprep.subr.bf16.mxu1 %v5388_v52 }
  0x7d   :  { %391 = vmatmul.mubr.bf16.gmra.mrb[8].mxu0 %v4847_v53 }
  0x7e   :  { %464 = vmatmul.mubr.bf16.gmra.mrb[8].mxu1 %v4847_v53  ;;  %724 = vmatpush1.bf16.msra.mxu0 %v5392_v54 }
  0x7f   :  { %765 = vmatpush1.bf16.msra.mxu1 %v5394_v55  ;;  %725 = vmatprep.subr.bf16.mxu0 %v5396_v56 }
  0x80   :  { %766 = vmatprep.subr.bf16.mxu1 %v5398_v57  ;;  %400 = vmatprep.mubr.bf16.mxu0 %v6189_v0 }
  0x81   :  { %473 = vmatprep.mubr.bf16.mxu1 %v6189_v0 }
  0x82   :  { %726 = vmatpush1.bf16.msra.mxu0 %v5404_v58 }
  0x83   :  { %767 = vmatpush1.bf16.msra.mxu1 %v5406_v59  ;;  %727 = vmatprep.subr.bf16.mxu0 %v5408_v60 }
  0x84   :  { %768 = vmatprep.subr.bf16.mxu1 %v5410_v61 }
  0x85   :  { %401 = vmatmul.mubr.bf16.gmra.mrb[12].mxu0 %v4860_v62 }
  0x86   :  { %474 = vmatmul.mubr.bf16.gmra.mrb[12].mxu1 %v4860_v62  ;;  %728 = vmatpush1.bf16.msra.mxu0 %v5418_v63 }
  0x87   :  { %769 = vmatpush1.bf16.msra.mxu1 %v5420_v1  ;;  %729 = vmatprep.subr.bf16.mxu0 %v5422_v2 }
  0x88   :  { %770 = vmatprep.subr.bf16.mxu1 %v5428_v3  ;;  %747 = vmatprep.mubr.bf16.mxu0 %v6189_v0 }
  0x89   :  { %788 = vmatprep.mubr.bf16.mxu1 %v6189_v0 }
  0x8a   :  { %730 = vmatpush1.bf16.msra.mxu0 %v5432_v4 }
  0x8b   :  { %771 = vmatpush1.bf16.msra.mxu1 %v5434_v5  ;;  %1026 = vmatprep.subr.bf16.mxu0 %v5338_v33 }
  0x8c   :  { %1067 = vmatprep.subr.bf16.mxu1 %v5340_v34 }
  0x8d   :  { %748 = vmatmul.mubr.bf16.vlgmr.msra.gmra.mrb[16].mxu0 %v6189_v0 }
  0x8e   :  { %789 = vmatmul.mubr.bf16.vlgmr.msra.gmra.mrb[16].mxu1 %v6189_v0  ;;  %1027 = vmatpush1.bf16.msra.mxu0 %v5342_v36 }
  0x8f   :  { %1068 = vmatpush1.bf16.msra.mxu1 %v5344_v37  ;;  %1028 = vmatprep.subr.bf16.mxu0 %v5348_v38 }
  0x90   :  { %1069 = vmatprep.subr.bf16.mxu1 %v5350_v39  ;;  %1058 = vmatprep.mubr.bf16.mxu0 %v6189_v0 }
  0x91   :  { %1099 = vmatprep.mubr.bf16.mxu1 %v6189_v0 }
  0x92   :  { %1029 = vmatpush1.bf16.msra.mxu0 %v5352_v40 }
  0x93   :  { %1070 = vmatpush1.bf16.msra.mxu1 %v5356_v41  ;;  %1030 = vmatprep.subr.bf16.mxu0 %v5360_v42 }
  0x94   :  { %1071 = vmatprep.subr.bf16.mxu1 %v5362_v43 }
  0x96   :  { %1031 = vmatpush1.bf16.msra.mxu0 %v5366_v45 }
  0x97   :  { %1072 = vmatpush1.bf16.msra.mxu1 %v5368_v46  ;;  %1032 = vmatprep.subr.bf16.mxu0 %v5372_v47 }
  0x98   :  { %1073 = vmatprep.subr.bf16.mxu1 %v5376_v48 }
  0x9a   :  { %1033 = vmatpush1.bf16.msra.mxu0 %v5378_v49 }
  0x9b   :  { %1074 = vmatpush1.bf16.msra.mxu1 %v5380_v50  ;;  %1034 = vmatprep.subr.bf16.mxu0 %v5384_v51 }
  0x9c   :  { %1075 = vmatprep.subr.bf16.mxu1 %v5388_v52 }
  0x9e   :  { %1035 = vmatpush1.bf16.msra.mxu0 %v5392_v54 }
  0x9f   :  { %1076 = vmatpush1.bf16.msra.mxu1 %v5394_v55  ;;  %1036 = vmatprep.subr.bf16.mxu0 %v5396_v56 }
  0xa0   :  { %1077 = vmatprep.subr.bf16.mxu1 %v5398_v57 }
  0xa2   :  { %1037 = vmatpush1.bf16.msra.mxu0 %v5404_v58 }
  0xa3   :  { %1078 = vmatpush1.bf16.msra.mxu1 %v5406_v59  ;;  %1038 = vmatprep.subr.bf16.mxu0 %v5408_v60 }
  0xa4   :  { %1079 = vmatprep.subr.bf16.mxu1 %v5410_v61 }
  0xa6   :  { %1039 = vmatpush1.bf16.msra.mxu0 %v5418_v63 }
  0xa7   :  { %1080 = vmatpush1.bf16.msra.mxu1 %v5420_v1  ;;  %1040 = vmatprep.subr.bf16.mxu0 %v5422_v2 }
  0xa8   :  { %1081 = vmatprep.subr.bf16.mxu1 %v5428_v3 }
  0xaa   :  { %1041 = vmatpush1.bf16.msra.mxu0 %v5432_v4 }
  0xab   :  { %1082 = vmatpush1.bf16.msra.mxu1 %v5434_v5  ;;  %1338 = vmatprep.subr.bf16.mxu0 %v5338_v33 }
  0xac   :  { %1379 = vmatprep.subr.bf16.mxu1 %v5340_v34 }
 0x140   :  { %v5485_v14 = vpop.f32.mrb[0].mxu0 }
 0x141   :  { %v5487_v15 = vpop.f32.mrb[0].mxu1  ;;  %v374_v18 = vpop.f32.mrb[1].mxu0 }
 0x142   :  { %v447_v19 = vpop.f32.mrb[1].mxu1  ;;  %v376_v21 = vpop.f32.mrb[2].mxu0 }
 0x143   :  { %v449_v22 = vpop.f32.mrb[2].mxu1  ;;  %v5491_v23 = vadd.f32 %v376_v21, %v137_v17  ;;  %v378_v24 = vpop.f32.mrb[3].mxu0 }
 0x144   :  { %v5494_v25 = vadd.f32 %v449_v22, %v5483_v13  ;;  %v451_v26 = vpop.f32.mrb[3].mxu1  ;;  %v5496_v27 = vadd.f32 %v378_v24, %v141_v20 }
 0x145   :  { %v5499_v28 = vadd.f32 %v451_v26, %v5489_v16 }
 0x148   :  { %v382_v29 = vpop.f32.mrb[4].mxu0 }
 0x149   :  { %v455_v30 = vpop.f32.mrb[4].mxu1  ;;  %v5501_v31 = vadd.f32 %v382_v29, %v137_v17  ;;  %v384_v32 = vpop.f32.mrb[5].mxu0 }
 0x14a   :  { %v5504_v35 = vadd.f32 %v455_v30, %v5483_v13  ;;  %v457_v44 = vpop.f32.mrb[5].mxu1  ;;  %v5506_v53 = vadd.f32 %v384_v32, %v141_v20  ;;  %v386_v62 = vpop.f32.mrb[6].mxu0 }
 0x14b   :  { %v5509_v6 = vadd.f32 %v457_v44, %v5489_v16  ;;  %v459_v7 = vpop.f32.mrb[6].mxu1  ;;  %v5511_v8 = vadd.f32 %v386_v62, %v137_v17  ;;  %v388_v9 = vpop.f32.mrb[7].mxu0 }
 0x14c   :  { %v5514_v10 = vadd.f32 %v459_v7, %v5483_v13  ;;  %v461_v11 = vpop.f32.mrb[7].mxu1  ;;  %v5516_v12 = vadd.f32 %v388_v9, %v141_v20 }
 0x14d   :  { %6191 = vst [vmem:[#allocation17_spill] sm:$0xff] %v5509_v6  ;;  %6192 = vst [vmem:[#allocation18_spill] sm:$0xff] %v5511_v8  ;;  %v5519_v21 = vadd.f32 %v461_v11, %v5489_v16 }
 0x14e   :  { %6193 = vst [vmem:[#allocation19_spill] sm:$0xff] %v5514_v10  ;;  %6194 = vst [vmem:[#allocation20_spill] sm:$0xff] %v5516_v12 }
 0x14f   :  { %6195 = vst [vmem:[#allocation21_spill] sm:$0xff] %v5519_v21 }
 0x150   :  { %v392_v22 = vpop.f32.mrb[8].mxu0 }
 0x151   :  { %v465_v24 = vpop.f32.mrb[8].mxu1  ;;  %v5521_v26 = vadd.f32 %v392_v22, %v137_v17  ;;  %v394_v29 = vpop.f32.mrb[9].mxu0 }
 0x152   :  { %v5524_v30 = vadd.f32 %v465_v24, %v5483_v13  ;;  %v467_v32 = vpop.f32.mrb[9].mxu1  ;;  %v5526_v44 = vadd.f32 %v394_v29, %v141_v20  ;;  %v396_v62 = vpop.f32.mrb[10].mxu0 }
 0x153   :  { %6196 = vst [vmem:[#allocation22_spill] sm:$0xff] %v5521_v26  ;;  %v5529_v7 = vadd.f32 %v467_v32, %v5489_v16  ;;  %v469_v9 = vpop.f32.mrb[10].mxu1  ;;  %v5531_v0 = vadd.f32 %v396_v62, %v137_v17  ;;  %v398_v11 = vpop.f32.mrb[11].mxu0 }
 0x154   :  { %6197 = vst [vmem:[#allocation23_spill] sm:$0xff] %v5524_v30  ;;  %6198 = vst [vmem:[#allocation24_spill] sm:$0xff] %v5526_v44  ;;  %v5534_v21 = vadd.f32 %v469_v9, %v5483_v13  ;;  %v471_v22 = vpop.f32.mrb[11].mxu1  ;;  %v5536_v26 = vadd.f32 %v398_v11, %v141_v20 }
 0x155   :  { %6199 = vst [vmem:[#allocation25_spill] sm:$0xff] %v5529_v7  ;;  %6200 = vst [vmem:[#allocation26_spill] sm:$0xff] %v5531_v0  ;;  %v5539_v24 = vadd.f32 %v471_v22, %v5489_v16 }
 0x156   :  { %6201 = vst [vmem:[#allocation27_spill] sm:$0xff] %v5534_v21  ;;  %6202 = vst [vmem:[#allocation28_spill] sm:$0xff] %v5536_v26 }
 0x157   :  { %6203 = vst [vmem:[#allocation29_spill] sm:$0xff] %v5539_v24 }
 0x158   :  { %v402_v30 = vpop.f32.mrb[12].mxu0 }
 0x159   :  { %v475_v29 = vpop.f32.mrb[12].mxu1  ;;  %v5541_v44 = vadd.f32 %v402_v30, %v137_v17  ;;  %v404_v12 = vpop.f32.mrb[13].mxu0 }
 0x15a   :  { %v5544_v32 = vadd.f32 %v475_v29, %v5483_v13  ;;  %v477_v62 = vpop.f32.mrb[13].mxu1  ;;  %v5546_v0 = vadd.f32 %v404_v12, %v141_v20  ;;  %v406_v7 = vpop.f32.mrb[14].mxu0  ;;  %v373_v12 = vadd.f32 %v5485_v14, %v137_v17 }
 0x15b   :  { %6204 = vst [vmem:[#allocation30_spill] sm:$0xff] %v5541_v44  ;;  %v5549_v9 = vadd.f32 %v477_v62, %v5489_v16  ;;  %v479_v11 = vpop.f32.mrb[14].mxu1  ;;  %v5551_v26 = vadd.f32 %v406_v7, %v137_v17  ;;  %v408_v22 = vpop.f32.mrb[15].mxu0  ;;  %v375_v62 = vadd.f32 %v374_v18, %v141_v20 }
 0x15c   :  { %6205 = vst [vmem:[#allocation31_spill] sm:$0xff] %v5544_v32  ;;  %6206 = vst [vmem:[#allocation32_spill] sm:$0xff] %v5546_v0  ;;  %v5554_v24 = vadd.f32 %v479_v11, %v5483_v13  ;;  %v481_v30 = vpop.f32.mrb[15].mxu1  ;;  %v5556_v44 = vadd.f32 %v408_v22, %v141_v20  ;;  %v446_v0 = vadd.f32 %v5487_v15, %v5483_v13 }
 0x15d   :  { %6207 = vst [vmem:[#allocation33_spill] sm:$0xff] %v5549_v9  ;;  %6208 = vst [vmem:[#allocation34_spill] sm:$0xff] %v5551_v26  ;;  %v5559_v29 = vadd.f32 %v481_v30, %v5489_v16  ;;  %v448_v9 = vadd.f32 %v447_v19, %v5489_v16 }
 0x15e   :  { %6209 = vst [vmem:[#allocation35_spill] sm:$0xff] %v5554_v24  ;;  %6210 = vst [vmem:[#allocation36_spill] sm:$0xff] %v5556_v44 }
 0x15f   :  { %6211 = vst [vmem:[#allocation37_spill] sm:$0xff] %v5559_v29 }
 0x160   :  { %v749_v7 = vpop.f32.mrb[16].mxu0 }
 0x161   :  { %v790_v26 = vpop.f32.mrb[16].mxu1  ;;  %v797_v32 = vadd.f32 %v749_v7, %v373_v12  ;;  %v751_v11 = vpop.f32.mrb[17].mxu0 }
 0x162   :  { %v799_v21 = vadd.f32 %v790_v26, %v446_v0  ;;  %v792_v24 = vpop.f32.mrb[17].mxu1  ;;  %v798_v10 = vadd.f32 %v751_v11, %v375_v62  ;;  %v753_v44 = vpop.f32.mrb[18].mxu0 }
 0x163   :  { %v800_v22 = vadd.f32 %v792_v24, %v448_v9  ;;  %v794_v8 = vpop.f32.mrb[18].mxu1  ;;  %v3992_v30 = vmul.f32 -1.442695, %v797_v32  ;;  %v754_v29 = vpop.f32.mrb[19].mxu0 }
 0x164   :  { %v795_v6 = vpop.f32.mrb[19].mxu1  ;;  %v3993_v14 = vmul.f32 -1.442695, %v798_v10  ;;  %v6212_v29 = vmov 0  }
 0x165   :  { %4921 = vpow2.f32 %v3992_v30  ;;  %v3994_v13 = vmul.f32 -1.442695, %v800_v22 }
 0x166   :  { %4923 = vpow2.f32 %v3993_v14 }
 0x167   :  { %4925 = vpow2.f32 %v3994_v13 }
 0x168   :  { %4927 = vtanh.f32 %v799_v21 }
 0x16f   :  { %v4922_v15 = vpop.eup %4921 }
 0x170   :  { %v4924_v17 = vpop.eup %4923  ;;  %v804_v16 = vadd.f32 1.0, %v4922_v15 }
 0x171   :  { %v810_v18 = vadd.f32 1.0, %v4924_v17  ;;  %v4926_v0 = vpop.eup %4925 }
 0x172   :  { %4929 = vrcp.f32 %v804_v16  ;;  %v4928_v19 = vpop.eup %4927  ;;  %v817_v44 = vadd.f32 1.0, %v4926_v0 }
 0x173   :  { %4931 = vrcp.f32 %v810_v18 }
 0x174   :  { %4933 = vrcp.f32 %v817_v44 }
 0x17c   :  { %v4930_v20 = vpop.eup %4929 }
 0x17d   :  { %v4932_v26 = vpop.eup %4931  ;;  %v821_v8 = vmul.f32 %v4930_v20, %v4928_v19 }
 0x17e   :  { %v820_v24 = vmul.f32 0.0, %v4932_v26  ;;  %v4934_v10 = vpop.eup %4933 }
 0x180   :  { %v5565_v6 = vadd.f32 %v821_v8, %v820_v24 }
 0x182   :  { %4935 = vtanh.f32 %v5565_v6 }
 0x18c   :  { %v4936_v32 = vpop.eup %4935 }
 0x18d   :  { %v5568_v9 = vmul.f32 %v4936_v32, %v4934_v10 }
 0x18f   :  { %v833_v21 = vpack.c.bf16 %v5568_v9, %v5568_v9 }
 0x191   :  { %1059 = vmatmul.mubr.bf16.vlgmr.msra.gmra.mrb[20].mxu0 %v833_v21  ;;  %1100 = vmatmul.mubr.bf16.vlgmr.msra.gmra.mrb[20].mxu1 %v833_v21 }
 0x192   :  { %1339 = vmatpush1.bf16.msra.mxu0 %v5342_v36  ;;  %1380 = vmatpush1.bf16.msra.mxu1 %v5344_v37 }
 0x193   :  { %1340 = vmatprep.subr.bf16.mxu0 %v5348_v38  ;;  %1381 = vmatprep.subr.bf16.mxu1 %v5350_v39 }
 0x194   :  { %1370 = vmatprep.mubr.bf16.mxu0 %v6212_v29  ;;  %1411 = vmatprep.mubr.bf16.mxu1 %v6212_v29 }
 0x196   :  { %1341 = vmatpush1.bf16.msra.mxu0 %v5352_v40  ;;  %1382 = vmatpush1.bf16.msra.mxu1 %v5356_v41 }
 0x197   :  { %1342 = vmatprep.subr.bf16.mxu0 %v5360_v42  ;;  %1383 = vmatprep.subr.bf16.mxu1 %v5362_v43 }
 0x19a   :  { %1343 = vmatpush1.bf16.msra.mxu0 %v5366_v45  ;;  %1384 = vmatpush1.bf16.msra.mxu1 %v5368_v46 }
 0x19b   :  { %1344 = vmatprep.subr.bf16.mxu0 %v5372_v47  ;;  %1385 = vmatprep.subr.bf16.mxu1 %v5376_v48 }
 0x19e   :  { %1345 = vmatpush1.bf16.msra.mxu0 %v5378_v49  ;;  %1386 = vmatpush1.bf16.msra.mxu1 %v5380_v50 }
 0x19f   :  { %1346 = vmatprep.subr.bf16.mxu0 %v5384_v51  ;;  %1387 = vmatprep.subr.bf16.mxu1 %v5388_v52 }
 0x1a2   :  { %1347 = vmatpush1.bf16.msra.mxu0 %v5392_v54  ;;  %1388 = vmatpush1.bf16.msra.mxu1 %v5394_v55 }
 0x1a3   :  { %1348 = vmatprep.subr.bf16.mxu0 %v5396_v56  ;;  %1389 = vmatprep.subr.bf16.mxu1 %v5398_v57 }
 0x1a6   :  { %1349 = vmatpush1.bf16.msra.mxu0 %v5404_v58  ;;  %1390 = vmatpush1.bf16.msra.mxu1 %v5406_v59 }
 0x1a7   :  { %1350 = vmatprep.subr.bf16.mxu0 %v5408_v60  ;;  %1391 = vmatprep.subr.bf16.mxu1 %v5410_v61 }
 0x1aa   :  { %1351 = vmatpush1.bf16.msra.mxu0 %v5418_v63  ;;  %1392 = vmatpush1.bf16.msra.mxu1 %v5420_v1 }
 0x1ab   :  { %1352 = vmatprep.subr.bf16.mxu0 %v5422_v2  ;;  %1393 = vmatprep.subr.bf16.mxu1 %v5428_v3 }
 0x1ae   :  { %1353 = vmatpush1.bf16.msra.mxu0 %v5432_v4  ;;  %1394 = vmatpush1.bf16.msra.mxu1 %v5434_v5 }
 0x1af   :  { %1650 = vmatprep.subr.bf16.mxu0 %v5338_v33  ;;  %1691 = vmatprep.subr.bf16.mxu1 %v5340_v34 }
 0x264   :  { %v1060_v12 = vpop.f32.mrb[20].mxu0  ;;  %v1101_v62 = vpop.f32.mrb[20].mxu1 }
 0x265   :  { %v1108_v7 = vadd.f32 %v1060_v12, %v5491_v23  ;;  %v1110_v11 = vadd.f32 %v1101_v62, %v5494_v25  ;;  %v1062_v22 = vpop.f32.mrb[21].mxu0  ;;  %v1103_v30 = vpop.f32.mrb[21].mxu1 }
 0x266   :  { %v1109_v14 = vadd.f32 %v1062_v22, %v5496_v27  ;;  %v1111_v13 = vadd.f32 %v1103_v30, %v5499_v28  ;;  %v1064_v15 = vpop.f32.mrb[22].mxu0  ;;  %v1105_v17 = vpop.f32.mrb[22].mxu1  ;;  %v5670_v22 = vld [vmem:[#allocation9 + $0x8] ss:$16 sps:$4 sm:$0xff]   ;;  %v5676_v30 = vld [vmem:[#allocation9 + $0x24] ss:$16 sps:$4 sm:$0xff]  }
 0x267   :  { %v4027_v16 = vmul.f32 -1.442695, %v1108_v7  ;;  %v1065_v18 = vpop.f32.mrb[23].mxu0  ;;  %v1106_v0 = vpop.f32.mrb[23].mxu1  ;;  %v5682_v15 = vld [vmem:[#allocation9 + $0x28] ss:$16 sps:$4 sm:$0xff]  }
 0x268   :  { %v4028_v33 = vmul.f32 -1.442695, %v1109_v14  ;;  %v4029_v34 = vmul.f32 -1.442695, %v1111_v13  ;;  %v5678_v14 = vld [vmem:[#allocation9 + $0x2c] ss:$16 sps:$4 sm:$0xff]  }
 0x269   :  { %4937 = vpow2.f32 %v4027_v16  ;;  %v5680_v13 = vld [vmem:[#allocation9 + $0x20] ss:$16 sps:$4 sm:$0xff]   ;;  %v5688_v17 = vld [vmem:[#allocation9 + $0x44] ss:$16 sps:$4 sm:$0xff]   ;;  %v5690_v16 = vld [vmem:[#allocation9 + $0x4c] ss:$16 sps:$4 sm:$0xff]  }
 0x26a   :  { %4939 = vpow2.f32 %v4028_v33  ;;  %v5692_v18 = vld [vmem:[#allocation9 + $0x40] ss:$16 sps:$4 sm:$0xff]   ;;  %v5694_v0 = vld [vmem:[#allocation9 + $0x48] ss:$16 sps:$4 sm:$0xff]   ;;  %v5700_v33 = vld [vmem:[#allocation9 + $0x64] ss:$16 sps:$4 sm:$0xff]  }
 0x26b   :  { %4941 = vpow2.f32 %v4029_v34  ;;  %v5702_v34 = vld [vmem:[#allocation9 + $0x6c] ss:$16 sps:$4 sm:$0xff]  }
 0x26c   :  { %4943 = vtanh.f32 %v1110_v11  ;;  %v5668_v11 = vld [vmem:[#allocation9] ss:$16 sps:$4 sm:$0xff]  }
 0x273   :  { %v4938_v19 = vpop.eup %4937 }
 0x274   :  { %v4940_v20 = vpop.eup %4939  ;;  %v1115_v23 = vadd.f32 1.0, %v4938_v19  ;;  %v5704_v19 = vld [vmem:[#allocation9 + $0x60] ss:$16 sps:$4 sm:$0xff]  }
 0x275   :  { %v1121_v25 = vadd.f32 1.0, %v4940_v20  ;;  %v4942_v27 = vpop.eup %4941  ;;  %v5706_v20 = vld [vmem:[#allocation9 + $0x68] ss:$16 sps:$4 sm:$0xff]  }
 0x276   :  { %4945 = vrcp.f32 %v1115_v23  ;;  %v4944_v26 = vpop.eup %4943  ;;  %v1128_v24 = vadd.f32 1.0, %v4942_v27  ;;  %v5712_v23 = vld [vmem:[#allocation9 + $0x84] ss:$16 sps:$4 sm:$0xff]   ;;  %v5716_v27 = vld [vmem:[#allocation9 + $0x80] ss:$16 sps:$4 sm:$0xff]  }
 0x277   :  { %4947 = vrcp.f32 %v1121_v25  ;;  %v5714_v25 = vld [vmem:[#allocation9 + $0x8c] ss:$16 sps:$4 sm:$0xff]  }
 0x278   :  { %4949 = vrcp.f32 %v1128_v24  ;;  %v5730_v24 = vld [vmem:[#allocation9 + $0xa8] ss:$16 sps:$4 sm:$0xff]  }
 0x280   :  { %v4946_v28 = vpop.eup %4945 }
 0x281   :  { %v4948_v8 = vpop.eup %4947  ;;  %v1132_v44 = vmul.f32 %v4946_v28, %v4944_v26  ;;  %v5718_v26 = vld [vmem:[#allocation9 + $0x88] ss:$16 sps:$4 sm:$0xff]   ;;  %v5724_v28 = vld [vmem:[#allocation9 + $0xa4] ss:$16 sps:$4 sm:$0xff]  }
 0x282   :  { %v1131_v10 = vmul.f32 %v4948_v8, %v5565_v6  ;;  %v4950_v21 = vpop.eup %4949  ;;  %v5666_v6 = vld [vmem:[#allocation9 + $0xc] ss:$16 sps:$4 sm:$0xff]  }
 0x283   :  { %v5726_v8 = vld [vmem:[#allocation9 + $0xac] ss:$16 sps:$4 sm:$0xff]  }
 0x284   :  { %v5611_v32 = vadd.f32 %v1132_v44, %v1131_v10  ;;  %v5728_v44 = vld [vmem:[#allocation9 + $0xa0] ss:$16 sps:$4 sm:$0xff]   ;;  %v5736_v10 = vld [vmem:[#allocation9 + $0xc4] ss:$16 sps:$4 sm:$0xff]  }
 0x286   :  { %4951 = vtanh.f32 %v5611_v32 }
 0x290   :  { %v4952_v12 = vpop.eup %4951 }
 0x291   :  { %v5614_v62 = vmul.f32 %v4952_v12, %v4950_v21  ;;  %v5740_v21 = vld [vmem:[#allocation9 + $0xc0] ss:$16 sps:$4 sm:$0xff]   ;;  %v5742_v12 = vld [vmem:[#allocation9 + $0xc8] ss:$16 sps:$4 sm:$0xff]  }
 0x293   :  { %v1145_v7 = vpack.c.bf16 %v5614_v62, %v5614_v62 }
 0x295   :  { %1371 = vmatmul.mubr.bf16.vlgmr.msra.gmra.mrb[24].mxu0 %v1145_v7  ;;  %1412 = vmatmul.mubr.bf16.vlgmr.msra.gmra.mrb[24].mxu1 %v1145_v7  ;;  %v5748_v7 = vld [vmem:[#allocation9 + $0xe4] ss:$16 sps:$4 sm:$0xff]  }
 0x296   :  { %1651 = vmatpush1.bf16.msra.mxu0 %v5342_v36  ;;  %1692 = vmatpush1.bf16.msra.mxu1 %v5344_v37 }
 0x297   :  { %1652 = vmatprep.subr.bf16.mxu0 %v5348_v38  ;;  %1693 = vmatprep.subr.bf16.mxu1 %v5350_v39 }
 0x298   :  { %1682 = vmatprep.mubr.bf16.mxu0 %v6212_v29  ;;  %1723 = vmatprep.mubr.bf16.mxu1 %v6212_v29 }
 0x29a   :  { %1653 = vmatpush1.bf16.msra.mxu0 %v5352_v40  ;;  %1694 = vmatpush1.bf16.msra.mxu1 %v5356_v41 }
 0x29b   :  { %1654 = vmatprep.subr.bf16.mxu0 %v5360_v42  ;;  %1695 = vmatprep.subr.bf16.mxu1 %v5362_v43  ;;  %v6213_v43 = vld [vmem:[#allocation17_spill] sm:$0xff] }
 0x29e   :  { %1655 = vmatpush1.bf16.msra.mxu0 %v5366_v45  ;;  %1696 = vmatpush1.bf16.msra.mxu1 %v5368_v46 }
 0x29f   :  { %1656 = vmatprep.subr.bf16.mxu0 %v5372_v47  ;;  %1697 = vmatprep.subr.bf16.mxu1 %v5376_v48 }
 0x2a2   :  { %1657 = vmatpush1.bf16.msra.mxu0 %v5378_v49  ;;  %1698 = vmatpush1.bf16.msra.mxu1 %v5380_v50 }
 0x2a3   :  { %1658 = vmatprep.subr.bf16.mxu0 %v5384_v51  ;;  %1699 = vmatprep.subr.bf16.mxu1 %v5388_v52 }
 0x2a6   :  { %1659 = vmatpush1.bf16.msra.mxu0 %v5392_v54  ;;  %1700 = vmatpush1.bf16.msra.mxu1 %v5394_v55 }
 0x2a7   :  { %1660 = vmatprep.subr.bf16.mxu0 %v5396_v56  ;;  %1701 = vmatprep.subr.bf16.mxu1 %v5398_v57 }
 0x2aa   :  { %1661 = vmatpush1.bf16.msra.mxu0 %v5404_v58  ;;  %1702 = vmatpush1.bf16.msra.mxu1 %v5406_v59 }
 0x2ab   :  { %1662 = vmatprep.subr.bf16.mxu0 %v5408_v60  ;;  %1703 = vmatprep.subr.bf16.mxu1 %v5410_v61 }
 0x2ae   :  { %1663 = vmatpush1.bf16.msra.mxu0 %v5418_v63  ;;  %1704 = vmatpush1.bf16.msra.mxu1 %v5420_v1 }
 0x2af   :  { %1664 = vmatprep.subr.bf16.mxu0 %v5422_v2  ;;  %1705 = vmatprep.subr.bf16.mxu1 %v5428_v3 }
 0x2b2   :  { %1665 = vmatpush1.bf16.msra.mxu0 %v5432_v4  ;;  %1706 = vmatpush1.bf16.msra.mxu1 %v5434_v5 }
 0x2b3   :  { %2003 = vmatprep.subr.bf16.mxu1 %v5666_v6 }
 0x368   :  { %v1372_v36 = vpop.f32.mrb[24].mxu0  ;;  %v1413_v37 = vpop.f32.mrb[24].mxu1 }
 0x369   :  { %v1420_v38 = vadd.f32 %v1372_v36, %v5501_v31  ;;  %v1422_v39 = vadd.f32 %v1413_v37, %v5504_v35  ;;  %v1374_v40 = vpop.f32.mrb[25].mxu0  ;;  %v1415_v41 = vpop.f32.mrb[25].mxu1  ;;  %v5750_v36 = vld [vmem:[#allocation9 + $0xec] ss:$16 sps:$4 sm:$0xff]   ;;  %v5752_v37 = vld [vmem:[#allocation9 + $0xe0] ss:$16 sps:$4 sm:$0xff]  }
 0x36a   :  { %v1421_v42 = vadd.f32 %v1374_v40, %v5506_v53  ;;  %v1423_v45 = vadd.f32 %v1415_v41, %v6213_v43  ;;  %v1376_v46 = vpop.f32.mrb[26].mxu0  ;;  %v1417_v47 = vpop.f32.mrb[26].mxu1  ;;  %v5664_v53 = vld [vmem:[#allocation9 + $0x4] ss:$16 sps:$4 sm:$0xff]   ;;  %v6215_v43 = vld [vmem:[#allocation19_spill] sm:$0xff] }
 0x36b   :  { %v4062_v48 = vmul.f32 -1.442695, %v1420_v38  ;;  %v1377_v49 = vpop.f32.mrb[27].mxu0  ;;  %v1418_v50 = vpop.f32.mrb[27].mxu1  ;;  %1962 = vmatprep.subr.bf16.mxu0 %v5664_v53  ;;  %v5754_v38 = vld [vmem:[#allocation9 + $0xe8] ss:$16 sps:$4 sm:$0xff]  }
 0x36c   :  { %v4063_v51 = vmul.f32 -1.442695, %v1421_v42  ;;  %v4064_v52 = vmul.f32 -1.442695, %v1423_v45  ;;  %v6214_v41 = vld [vmem:[#allocation18_spill] sm:$0xff]  ;;  %v6217_v50 = vld [vmem:[#allocation21_spill] sm:$0xff] }
 0x36d   :  { %4953 = vpow2.f32 %v4062_v48  ;;  %v6216_v48 = vld [vmem:[#allocation20_spill] sm:$0xff] }
 0x36e   :  { %4955 = vpow2.f32 %v4063_v51 }
 0x36f   :  { %4957 = vpow2.f32 %v4064_v52 }
 0x370   :  { %4959 = vtanh.f32 %v1422_v39 }
 0x377   :  { %v4954_v54 = vpop.eup %4953 }
 0x378   :  { %v4956_v55 = vpop.eup %4955  ;;  %v1427_v56 = vadd.f32 1.0, %v4954_v54 }
 0x379   :  { %v1433_v57 = vadd.f32 1.0, %v4956_v55  ;;  %v4958_v58 = vpop.eup %4957 }
 0x37a   :  { %4961 = vrcp.f32 %v1427_v56  ;;  %v4960_v59 = vpop.eup %4959  ;;  %v1440_v1 = vadd.f32 1.0, %v4958_v58 }
 0x37b   :  { %4963 = vrcp.f32 %v1433_v57 }
 0x37c   :  { %4965 = vrcp.f32 %v1440_v1 }
 0x384   :  { %v4962_v60 = vpop.eup %4961 }
 0x385   :  { %v4964_v61 = vpop.eup %4963  ;;  %v1444_v63 = vmul.f32 %v4962_v60, %v4960_v59 }
 0x386   :  { %v1443_v2 = vmul.f32 %v4964_v61, %v5611_v32  ;;  %v4966_v4 = vpop.eup %4965  ;;  %v5738_v32 = vld [vmem:[#allocation9 + $0xcc] ss:$16 sps:$4 sm:$0xff]  }
 0x388   :  { %v5655_v3 = vadd.f32 %v1444_v63, %v1443_v2 }
 0x38a   :  { %4967 = vtanh.f32 %v5655_v3 }
 0x394   :  { %v4968_v5 = vpop.eup %4967 }
 0x395   :  { %v5658_v31 = vmul.f32 %v4968_v5, %v4966_v4 }
 0x397   :  { %v1457_v35 = vpack.c.bf16 %v5658_v31, %v5658_v31 }
 0x399   :  { %1683 = vmatmul.mubr.bf16.vlgmr.msra.gmra.mrb[28].mxu0 %v1457_v35  ;;  %1724 = vmatmul.mubr.bf16.vlgmr.msra.gmra.mrb[28].mxu1 %v1457_v35 }
 0x39a   :  { %1994 = vmatprep.mubr.bf16.mxu0 %v6212_v29  ;;  %2035 = vmatprep.mubr.bf16.mxu1 %v6212_v29 }
 0x39b   :  { %1963 = vmatpush1.bf16.msra.mxu0 %v5668_v11  ;;  %2004 = vmatpush1.bf16.msra.mxu1 %v5670_v22 }
 0x39c   :  { %1964 = vmatprep.subr.bf16.mxu0 %v5676_v30  ;;  %2005 = vmatprep.subr.bf16.mxu1 %v5678_v14 }
 0x39f   :  { %1965 = vmatpush1.bf16.msra.mxu0 %v5680_v13  ;;  %2006 = vmatpush1.bf16.msra.mxu1 %v5682_v15 }
 0x3a0   :  { %1966 = vmatprep.subr.bf16.mxu0 %v5688_v17  ;;  %2007 = vmatprep.subr.bf16.mxu1 %v5690_v16 }
 0x3a3   :  { %1967 = vmatpush1.bf16.msra.mxu0 %v5692_v18  ;;  %2008 = vmatpush1.bf16.msra.mxu1 %v5694_v0 }
 0x3a4   :  { %1968 = vmatprep.subr.bf16.mxu0 %v5700_v33  ;;  %2009 = vmatprep.subr.bf16.mxu1 %v5702_v34 }
 0x3a7   :  { %1969 = vmatpush1.bf16.msra.mxu0 %v5704_v19  ;;  %2010 = vmatpush1.bf16.msra.mxu1 %v5706_v20 }
 0x3a8   :  { %1970 = vmatprep.subr.bf16.mxu0 %v5712_v23  ;;  %2011 = vmatprep.subr.bf16.mxu1 %v5714_v25 }
 0x3ab   :  { %1971 = vmatpush1.bf16.msra.mxu0 %v5716_v27  ;;  %2012 = vmatpush1.bf16.msra.mxu1 %v5718_v26 }
 0x3ac   :  { %1972 = vmatprep.subr.bf16.mxu0 %v5724_v28  ;;  %2013 = vmatprep.subr.bf16.mxu1 %v5726_v8 }
 0x3af   :  { %1973 = vmatpush1.bf16.msra.mxu0 %v5728_v44  ;;  %2014 = vmatpush1.bf16.msra.mxu1 %v5730_v24 }
 0x3b0   :  { %1974 = vmatprep.subr.bf16.mxu0 %v5736_v10  ;;  %2015 = vmatprep.subr.bf16.mxu1 %v5738_v32 }
 0x3b3   :  { %1975 = vmatpush1.bf16.msra.mxu0 %v5740_v21  ;;  %2016 = vmatpush1.bf16.msra.mxu1 %v5742_v12 }
 0x3b4   :  { %1976 = vmatprep.subr.bf16.mxu0 %v5748_v7  ;;  %2017 = vmatprep.subr.bf16.mxu1 %v5750_v36 }
 0x3b7   :  { %1977 = vmatpush1.bf16.msra.mxu0 %v5752_v37  ;;  %2018 = vmatpush1.bf16.msra.mxu1 %v5754_v38 }
 0x3b8   :  { %2274 = vmatprep.subr.bf16.mxu0 %v5664_v53  ;;  %2315 = vmatprep.subr.bf16.mxu1 %v5666_v6 }
 0x46c   :  { %v1684_v39 = vpop.f32.mrb[28].mxu0  ;;  %v1725_v40 = vpop.f32.mrb[28].mxu1 }
 0x46d   :  { %v1732_v42 = vadd.f32 %v1684_v39, %v6214_v41  ;;  %v1734_v45 = vadd.f32 %v1725_v40, %v6215_v43  ;;  %v1686_v46 = vpop.f32.mrb[29].mxu0  ;;  %v1727_v47 = vpop.f32.mrb[29].mxu1 }
 0x46e   :  { %v1733_v49 = vadd.f32 %v1686_v46, %v6216_v48  ;;  %v1735_v51 = vadd.f32 %v1727_v47, %v6217_v50  ;;  %v1688_v52 = vpop.f32.mrb[30].mxu0  ;;  %v1729_v54 = vpop.f32.mrb[30].mxu1 }
 0x46f   :  { %v4097_v55 = vmul.f32 -1.442695, %v1732_v42  ;;  %v1689_v56 = vpop.f32.mrb[31].mxu0  ;;  %v1730_v57 = vpop.f32.mrb[31].mxu1 }
 0x470   :  { %v4098_v58 = vmul.f32 -1.442695, %v1733_v49  ;;  %v4099_v59 = vmul.f32 -1.442695, %v1735_v51  ;;  %v6218_v49 = vld [vmem:[#allocation22_spill] sm:$0xff]  ;;  %v6219_v51 = vld [vmem:[#allocation23_spill] sm:$0xff] }
 0x471   :  { %4969 = vpow2.f32 %v4097_v55  ;;  %v6220_v56 = vld [vmem:[#allocation24_spill] sm:$0xff] }
 0x472   :  { %4971 = vpow2.f32 %v4098_v58  ;;  %v6221_v58 = vld [vmem:[#allocation25_spill] sm:$0xff] }
 0x473   :  { %4973 = vpow2.f32 %v4099_v59 }
 0x474   :  { %4975 = vtanh.f32 %v1734_v45 }
 0x47b   :  { %v4970_v60 = vpop.eup %4969 }
 0x47c   :  { %v4972_v61 = vpop.eup %4971  ;;  %v1739_v63 = vadd.f32 1.0, %v4970_v60 }
 0x47d   :  { %v1745_v1 = vadd.f32 1.0, %v4972_v61  ;;  %v4974_v2 = vpop.eup %4973 }
 0x47e   :  { %4977 = vrcp.f32 %v1739_v63  ;;  %v4976_v4 = vpop.eup %4975  ;;  %v1752_v40 = vadd.f32 1.0, %v4974_v2 }
 0x47f   :  { %4979 = vrcp.f32 %v1745_v1 }
 0x480   :  { %4981 = vrcp.f32 %v1752_v40 }
 0x488   :  { %v4978_v5 = vpop.eup %4977 }
 0x489   :  { %v4980_v35 = vpop.eup %4979  ;;  %v1756_v39 = vmul.f32 %v4978_v5, %v4976_v4 }
 0x48a   :  { %v1755_v41 = vmul.f32 %v4980_v35, %v5655_v3  ;;  %v4982_v43 = vpop.eup %4981 }
 0x48c   :  { %v5767_v42 = vadd.f32 %v1756_v39, %v1755_v41 }
 0x48e   :  { %4983 = vtanh.f32 %v5767_v42 }
 0x498   :  { %v4984_v46 = vpop.eup %4983 }
 0x499   :  { %v5770_v47 = vmul.f32 %v4984_v46, %v4982_v43 }
 0x49b   :  { %v1769_v45 = vpack.c.bf16 %v5770_v47, %v5770_v47 }
 0x49d   :  { %1995 = vmatmul.mubr.bf16.vlgmr.msra.gmra.mrb[32].mxu0 %v1769_v45  ;;  %2036 = vmatmul.mubr.bf16.vlgmr.msra.gmra.mrb[32].mxu1 %v1769_v45 }
 0x49e   :  { %2275 = vmatpush1.bf16.msra.mxu0 %v5668_v11  ;;  %2316 = vmatpush1.bf16.msra.mxu1 %v5670_v22 }
 0x49f   :  { %2276 = vmatprep.subr.bf16.mxu0 %v5676_v30  ;;  %2317 = vmatprep.subr.bf16.mxu1 %v5678_v14 }
 0x4a0   :  { %2306 = vmatprep.mubr.bf16.mxu0 %v6212_v29  ;;  %2347 = vmatprep.mubr.bf16.mxu1 %v6212_v29 }
 0x4a2   :  { %2277 = vmatpush1.bf16.msra.mxu0 %v5680_v13  ;;  %2318 = vmatpush1.bf16.msra.mxu1 %v5682_v15 }
 0x4a3   :  { %2278 = vmatprep.subr.bf16.mxu0 %v5688_v17  ;;  %2319 = vmatprep.subr.bf16.mxu1 %v5690_v16 }
 0x4a6   :  { %2279 = vmatpush1.bf16.msra.mxu0 %v5692_v18  ;;  %2320 = vmatpush1.bf16.msra.mxu1 %v5694_v0 }
 0x4a7   :  { %2280 = vmatprep.subr.bf16.mxu0 %v5700_v33  ;;  %2321 = vmatprep.subr.bf16.mxu1 %v5702_v34 }
 0x4aa   :  { %2281 = vmatpush1.bf16.msra.mxu0 %v5704_v19  ;;  %2322 = vmatpush1.bf16.msra.mxu1 %v5706_v20 }
 0x4ab   :  { %2282 = vmatprep.subr.bf16.mxu0 %v5712_v23  ;;  %2323 = vmatprep.subr.bf16.mxu1 %v5714_v25 }
 0x4ae   :  { %2283 = vmatpush1.bf16.msra.mxu0 %v5716_v27  ;;  %2324 = vmatpush1.bf16.msra.mxu1 %v5718_v26 }
 0x4af   :  { %2284 = vmatprep.subr.bf16.mxu0 %v5724_v28  ;;  %2325 = vmatprep.subr.bf16.mxu1 %v5726_v8 }
 0x4b2   :  { %2285 = vmatpush1.bf16.msra.mxu0 %v5728_v44  ;;  %2326 = vmatpush1.bf16.msra.mxu1 %v5730_v24 }
 0x4b3   :  { %2286 = vmatprep.subr.bf16.mxu0 %v5736_v10  ;;  %2327 = vmatprep.subr.bf16.mxu1 %v5738_v32 }
 0x4b6   :  { %2287 = vmatpush1.bf16.msra.mxu0 %v5740_v21  ;;  %2328 = vmatpush1.bf16.msra.mxu1 %v5742_v12 }
 0x4b7   :  { %2288 = vmatprep.subr.bf16.mxu0 %v5748_v7  ;;  %2329 = vmatprep.subr.bf16.mxu1 %v5750_v36 }
 0x4ba   :  { %2289 = vmatpush1.bf16.msra.mxu0 %v5752_v37  ;;  %2330 = vmatpush1.bf16.msra.mxu1 %v5754_v38 }
 0x4bb   :  { %2586 = vmatprep.subr.bf16.mxu0 %v5664_v53  ;;  %2627 = vmatprep.subr.bf16.mxu1 %v5666_v6 }
 0x570   :  { %v1996_v3 = vpop.f32.mrb[32].mxu0  ;;  %v2037_v48 = vpop.f32.mrb[32].mxu1 }
 0x571   :  { %v2044_v50 = vadd.f32 %v1996_v3, %v6218_v49  ;;  %v2046_v52 = vadd.f32 %v2037_v48, %v6219_v51  ;;  %v1998_v54 = vpop.f32.mrb[33].mxu0  ;;  %v2039_v55 = vpop.f32.mrb[33].mxu1 }
 0x572   :  { %v2045_v57 = vadd.f32 %v1998_v54, %v6220_v56  ;;  %v2047_v59 = vadd.f32 %v2039_v55, %v6221_v58  ;;  %v2000_v60 = vpop.f32.mrb[34].mxu0  ;;  %v2041_v61 = vpop.f32.mrb[34].mxu1  ;;  %v6222_v58 = vld [vmem:[#allocation26_spill] sm:$0xff] }
 0x573   :  { %v4132_v63 = vmul.f32 -1.442695, %v2044_v50  ;;  %v2001_v1 = vpop.f32.mrb[35].mxu0  ;;  %v2042_v2 = vpop.f32.mrb[35].mxu1  ;;  %v6223_v60 = vld [vmem:[#allocation27_spill] sm:$0xff] }
 0x574   :  { %v4133_v4 = vmul.f32 -1.442695, %v2045_v57  ;;  %v4134_v5 = vmul.f32 -1.442695, %v2047_v59  ;;  %v6224_v2 = vld [vmem:[#allocation28_spill] sm:$0xff] }
 0x575   :  { %4985 = vpow2.f32 %v4132_v63 }
 0x576   :  { %4987 = vpow2.f32 %v4133_v4 }
 0x577   :  { %4989 = vpow2.f32 %v4134_v5  ;;  %v6225_v5 = vld [vmem:[#allocation29_spill] sm:$0xff] }
 0x578   :  { %4991 = vtanh.f32 %v2046_v52 }
 0x57f   :  { %v4986_v35 = vpop.eup %4985 }
 0x580   :  { %v4988_v39 = vpop.eup %4987  ;;  %v2051_v40 = vadd.f32 1.0, %v4986_v35 }
 0x581   :  { %v2057_v41 = vadd.f32 1.0, %v4988_v39  ;;  %v4990_v43 = vpop.eup %4989 }
 0x582   :  { %4993 = vrcp.f32 %v2051_v40  ;;  %v4992_v46 = vpop.eup %4991  ;;  %v2064_v49 = vadd.f32 1.0, %v4990_v43 }
 0x583   :  { %4995 = vrcp.f32 %v2057_v41 }
 0x584   :  { %4997 = vrcp.f32 %v2064_v49 }
 0x58c   :  { %v4994_v45 = vpop.eup %4993 }
 0x58d   :  { %v4996_v3 = vpop.eup %4995  ;;  %v2068_v48 = vmul.f32 %v4994_v45, %v4992_v46 }
 0x58e   :  { %v2067_v50 = vmul.f32 %v4996_v3, %v5767_v42  ;;  %v4998_v54 = vpop.eup %4997 }
 0x590   :  { %v5813_v51 = vadd.f32 %v2068_v48, %v2067_v50 }
 0x592   :  { %4999 = vtanh.f32 %v5813_v51 }
 0x59c   :  { %v5000_v55 = vpop.eup %4999 }
 0x59d   :  { %v5816_v56 = vmul.f32 %v5000_v55, %v4998_v54 }
 0x59f   :  { %v2081_v52 = vpack.c.bf16 %v5816_v56, %v5816_v56 }
 0x5a1   :  { %2307 = vmatmul.mubr.bf16.vlgmr.msra.gmra.mrb[36].mxu0 %v2081_v52  ;;  %2348 = vmatmul.mubr.bf16.vlgmr.msra.gmra.mrb[36].mxu1 %v2081_v52 }
 0x5a2   :  { %2587 = vmatpush1.bf16.msra.mxu0 %v5668_v11  ;;  %2628 = vmatpush1.bf16.msra.mxu1 %v5670_v22 }
 0x5a3   :  { %2588 = vmatprep.subr.bf16.mxu0 %v5676_v30  ;;  %2629 = vmatprep.subr.bf16.mxu1 %v5678_v14 }
 0x5a4   :  { %2618 = vmatprep.mubr.bf16.mxu0 %v6212_v29  ;;  %2659 = vmatprep.mubr.bf16.mxu1 %v6212_v29 }
 0x5a6   :  { %2589 = vmatpush1.bf16.msra.mxu0 %v5680_v13  ;;  %2630 = vmatpush1.bf16.msra.mxu1 %v5682_v15 }
 0x5a7   :  { %2590 = vmatprep.subr.bf16.mxu0 %v5688_v17  ;;  %2631 = vmatprep.subr.bf16.mxu1 %v5690_v16 }
 0x5aa   :  { %2591 = vmatpush1.bf16.msra.mxu0 %v5692_v18  ;;  %2632 = vmatpush1.bf16.msra.mxu1 %v5694_v0 }
 0x5ab   :  { %2592 = vmatprep.subr.bf16.mxu0 %v5700_v33  ;;  %2633 = vmatprep.subr.bf16.mxu1 %v5702_v34 }
 0x5ae   :  { %2593 = vmatpush1.bf16.msra.mxu0 %v5704_v19  ;;  %2634 = vmatpush1.bf16.msra.mxu1 %v5706_v20 }
 0x5af   :  { %2594 = vmatprep.subr.bf16.mxu0 %v5712_v23  ;;  %2635 = vmatprep.subr.bf16.mxu1 %v5714_v25 }
 0x5b2   :  { %2595 = vmatpush1.bf16.msra.mxu0 %v5716_v27  ;;  %2636 = vmatpush1.bf16.msra.mxu1 %v5718_v26 }
 0x5b3   :  { %2596 = vmatprep.subr.bf16.mxu0 %v5724_v28  ;;  %2637 = vmatprep.subr.bf16.mxu1 %v5726_v8 }
 0x5b6   :  { %2597 = vmatpush1.bf16.msra.mxu0 %v5728_v44  ;;  %2638 = vmatpush1.bf16.msra.mxu1 %v5730_v24 }
 0x5b7   :  { %2598 = vmatprep.subr.bf16.mxu0 %v5736_v10  ;;  %2639 = vmatprep.subr.bf16.mxu1 %v5738_v32 }
 0x5ba   :  { %2599 = vmatpush1.bf16.msra.mxu0 %v5740_v21  ;;  %2640 = vmatpush1.bf16.msra.mxu1 %v5742_v12 }
 0x5bb   :  { %2600 = vmatprep.subr.bf16.mxu0 %v5748_v7  ;;  %2641 = vmatprep.subr.bf16.mxu1 %v5750_v36 }
 0x5be   :  { %2601 = vmatpush1.bf16.msra.mxu0 %v5752_v37  ;;  %2642 = vmatpush1.bf16.msra.mxu1 %v5754_v38 }
 0x5bf   :  { %2898 = vmatprep.subr.bf16.mxu0 %v5664_v53  ;;  %2939 = vmatprep.subr.bf16.mxu1 %v5666_v6 }
 0x674   :  { %v2308_v42 = vpop.f32.mrb[36].mxu0  ;;  %v2349_v57 = vpop.f32.mrb[36].mxu1 }
 0x675   :  { %v2356_v59 = vadd.f32 %v2308_v42, %v6222_v58  ;;  %v2358_v61 = vadd.f32 %v2349_v57, %v6223_v60  ;;  %v2310_v63 = vpop.f32.mrb[37].mxu0  ;;  %v2351_v1 = vpop.f32.mrb[37].mxu1 }
 0x676   :  { %v2357_v4 = vadd.f32 %v2310_v63, %v6224_v2  ;;  %v2359_v35 = vadd.f32 %v2351_v1, %v6225_v5  ;;  %v2312_v39 = vpop.f32.mrb[38].mxu0  ;;  %v2353_v40 = vpop.f32.mrb[38].mxu1 }
 0x677   :  { %v4167_v41 = vmul.f32 -1.442695, %v2356_v59  ;;  %v2313_v43 = vpop.f32.mrb[39].mxu0  ;;  %v2354_v46 = vpop.f32.mrb[39].mxu1  ;;  %v3020_v39 = vld [vmem:[%s6182_s4 + $0x10] sm:$0xff]  ;;  %v3021_v40 = vld [vmem:[%s6182_s4 + $0x18] sm:$0xff] }
 0x678   :  { %v4168_v53 = vmul.f32 -1.442695, %v2357_v4  ;;  %v4169_v6 = vmul.f32 -1.442695, %v2359_v35  ;;  %v4591_v46 = vpack.c.bf16 %v3021_v40, %v3020_v39  ;;  %v6233_v39 = vld [vmem:[#allocation37_spill] sm:$0xff] }
 0x679   :  { %5001 = vpow2.f32 %v4167_v41 }
 0x67a   :  { %5003 = vpow2.f32 %v4168_v53  ;;  %v3022_v53 = vld [vmem:[%s6182_s4 + $0x20] sm:$0xff] }
 0x67b   :  { %5005 = vpow2.f32 %v4169_v6  ;;  %v3023_v6 = vld [vmem:[%s6182_s4 + $0x28] sm:$0xff] }
 0x67c   :  { %5007 = vtanh.f32 %v2358_v61 }
 0x683   :  { %v5002_v45 = vpop.eup %5001 }
 0x684   :  { %v5004_v3 = vpop.eup %5003  ;;  %v2363_v48 = vadd.f32 1.0, %v5002_v45  ;;  %v4595_v45 = vpack.c.bf16 %v3023_v6, %v3022_v53 }
 0x685   :  { %v2369_v49 = vadd.f32 1.0, %v5004_v3  ;;  %v5006_v50 = vpop.eup %5005  ;;  %v3024_v3 = vld [vmem:[%s6182_s4 + $0x30] sm:$0xff] }
 0x686   :  { %5009 = vrcp.f32 %v2363_v48  ;;  %v5008_v54 = vpop.eup %5007  ;;  %v2376_v57 = vadd.f32 1.0, %v5006_v50  ;;  %v3025_v48 = vld [vmem:[%s6182_s4 + $0x38] sm:$0xff]  ;;  %v3026_v50 = vld [vmem:[%s6182_s4 + $0x40] sm:$0xff] }
 0x687   :  { %5011 = vrcp.f32 %v2369_v49  ;;  %v4599_v49 = vpack.c.bf16 %v3025_v48, %v3024_v3 }
 0x688   :  { %5013 = vrcp.f32 %v2376_v57 }
 0x690   :  { %v5010_v55 = vpop.eup %5009 }
 0x691   :  { %v5012_v52 = vpop.eup %5011  ;;  %v2380_v42 = vmul.f32 %v5010_v55, %v5008_v54  ;;  %v3027_v54 = vld [vmem:[%s6182_s4 + $0x48] sm:$0xff] }
 0x692   :  { %v2379_v58 = vmul.f32 %v5012_v52, %v5813_v51  ;;  %v5014_v60 = vpop.eup %5013  ;;  %v4603_v55 = vpack.c.bf16 %v3027_v54, %v3026_v50  ;;  %v3028_v52 = vld [vmem:[%s6182_s4 + $0x50] sm:$0xff] }
 0x694   :  { %v5859_v59 = vadd.f32 %v2380_v42, %v2379_v58  ;;  %v3029_v42 = vld [vmem:[%s6182_s4 + $0x58] sm:$0xff]  ;;  %v3030_v58 = vld [vmem:[%s6182_s4 + $0x60] sm:$0xff] }
 0x695   :  { %v4607_v57 = vpack.c.bf16 %v3029_v42, %v3028_v52 }
 0x696   :  { %5015 = vtanh.f32 %v5859_v59 }
 0x6a0   :  { %v5016_v63 = vpop.eup %5015 }
 0x6a1   :  { %v5862_v1 = vmul.f32 %v5016_v63, %v5014_v60  ;;  %v3032_v63 = vld [vmem:[%s6182_s4 + $0x70] sm:$0xff] }
 0x6a3   :  { %v2393_v61 = vpack.c.bf16 %v5862_v1, %v5862_v1 }
 0x6a5   :  { %2619 = vmatmul.mubr.bf16.vlgmr.msra.gmra.mrb[40].mxu0 %v2393_v61  ;;  %2660 = vmatmul.mubr.bf16.vlgmr.msra.gmra.mrb[40].mxu1 %v2393_v61  ;;  %v3033_v61 = vld [vmem:[%s6182_s4 + $0x78] sm:$0xff] }
 0x6a6   :  { %2899 = vmatpush1.bf16.msra.mxu0 %v5668_v11  ;;  %2940 = vmatpush1.bf16.msra.mxu1 %v5670_v22  ;;  %v3019_v11 = vld [vmem:[%s6182_s4 + $0x8] sm:$0xff] }
 0x6a7   :  { %2900 = vmatprep.subr.bf16.mxu0 %v5676_v30  ;;  %2941 = vmatprep.subr.bf16.mxu1 %v5678_v14 }
 0x6a8   :  { %2930 = vmatprep.mubr.bf16.mxu0 %v6212_v29  ;;  %2971 = vmatprep.mubr.bf16.mxu1 %v6212_v29  ;;  %v3018_v29 = vld [vmem:[%s6182_s4] sm:$0xff] }
 0x6a9   :  { %v4587_v22 = vpack.c.bf16 %v3019_v11, %v3018_v29  ;;  %v4615_v29 = vpack.c.bf16 %v3033_v61, %v3032_v63  ;;  %v3154_v11 = vld [vmem:[%s6184_s6] sm:$0xff] }
 0x6aa   :  { %2901 = vmatpush1.bf16.msra.mxu0 %v5680_v13  ;;  %2942 = vmatpush1.bf16.msra.mxu1 %v5682_v15  ;;  %v6226_v13 = vld [vmem:[#allocation30_spill] sm:$0xff]  ;;  %v4240_v61 = vld [vmem:[%s6183_s5] ss:$0 sm:$0xff] }
 0x6ab   :  { %2902 = vmatprep.subr.bf16.mxu0 %v5688_v17  ;;  %2943 = vmatprep.subr.bf16.mxu1 %v5690_v16  ;;  %v6227_v17 = vld [vmem:[#allocation31_spill] sm:$0xff] }
 0x6ae   :  { %2903 = vmatpush1.bf16.msra.mxu0 %v5692_v18  ;;  %2944 = vmatpush1.bf16.msra.mxu1 %v5694_v0 }
 0x6af   :  { %2904 = vmatprep.subr.bf16.mxu0 %v5700_v33  ;;  %2945 = vmatprep.subr.bf16.mxu1 %v5702_v34  ;;  %v6228_v33 = vld [vmem:[#allocation32_spill] sm:$0xff] }
 0x6b2   :  { %2905 = vmatpush1.bf16.msra.mxu0 %v5704_v19  ;;  %2946 = vmatpush1.bf16.msra.mxu1 %v5706_v20  ;;  %v6229_v19 = vld [vmem:[#allocation33_spill] sm:$0xff] }
 0x6b3   :  { %2906 = vmatprep.subr.bf16.mxu0 %v5712_v23  ;;  %2947 = vmatprep.subr.bf16.mxu1 %v5714_v25 }
 0x6b6   :  { %2907 = vmatpush1.bf16.msra.mxu0 %v5716_v27  ;;  %2948 = vmatpush1.bf16.msra.mxu1 %v5718_v26 }
 0x6b7   :  { %2908 = vmatprep.subr.bf16.mxu0 %v5724_v28  ;;  %2949 = vmatprep.subr.bf16.mxu1 %v5726_v8 }
 0x6ba   :  { %2909 = vmatpush1.bf16.msra.mxu0 %v5728_v44  ;;  %2950 = vmatpush1.bf16.msra.mxu1 %v5730_v24 }
 0x6bb   :  { %2910 = vmatprep.subr.bf16.mxu0 %v5736_v10  ;;  %2951 = vmatprep.subr.bf16.mxu1 %v5738_v32 }
 0x6be   :  { %2911 = vmatpush1.bf16.msra.mxu0 %v5740_v21  ;;  %2952 = vmatpush1.bf16.msra.mxu1 %v5742_v12 }
 0x6bf   :  { %2912 = vmatprep.subr.bf16.mxu0 %v5748_v7  ;;  %2953 = vmatprep.subr.bf16.mxu1 %v5750_v36 }
 0x6c2   :  { %2913 = vmatpush1.bf16.msra.mxu0 %v5752_v37  ;;  %2954 = vmatpush1.bf16.msra.mxu1 %v5754_v38 }
 0x6c3   :  { %4588 = vmatprep.subr.bf16.mxu0 %v4587_v22 }
 0x778   :  { %v2620_v30 = vpop.f32.mrb[40].mxu0  ;;  %v2661_v14 = vpop.f32.mrb[40].mxu1 }
 0x779   :  { %v2668_v15 = vadd.f32 %v2620_v30, %v6226_v13  ;;  %v2670_v16 = vadd.f32 %v2661_v14, %v6227_v17  ;;  %v2622_v18 = vpop.f32.mrb[41].mxu0  ;;  %v2663_v0 = vpop.f32.mrb[41].mxu1  ;;  %v3156_v14 = vld [vmem:[%s6184_s6 + $0x10] sm:$0xff]  ;;  %v3157_v13 = vld [vmem:[%s6184_s6 + $0x18] sm:$0xff]  ;;  %v3158_v17 = vld [vmem:[%s6184_s6 + $0x20] sm:$0xff] }
 0x77a   :  { %v2669_v34 = vadd.f32 %v2622_v18, %v6228_v33  ;;  %v2671_v20 = vadd.f32 %v2663_v0, %v6229_v19  ;;  %v2624_v23 = vpop.f32.mrb[42].mxu0  ;;  %v2665_v25 = vpop.f32.mrb[42].mxu1  ;;  %v3160_v0 = vld [vmem:[%s6184_s6 + $0x30] sm:$0xff]  ;;  %v3161_v33 = vld [vmem:[%s6184_s6 + $0x38] sm:$0xff]  ;;  %v3162_v19 = vld [vmem:[%s6184_s6 + $0x40] sm:$0xff] }
 0x77b   :  { %v4202_v27 = vmul.f32 -1.442695, %v2668_v15  ;;  %v2625_v26 = vpop.f32.mrb[43].mxu0  ;;  %v2666_v28 = vpop.f32.mrb[43].mxu1  ;;  %v4623_v15 = vpack.c.bf16 %v3157_v13, %v3156_v14  ;;  %v3164_v25 = vld [vmem:[%s6184_s6 + $0x50] sm:$0xff] }
 0x77c   :  { %v4203_v8 = vmul.f32 -1.442695, %v2669_v34  ;;  %v4204_v44 = vmul.f32 -1.442695, %v2671_v20  ;;  %v4631_v34 = vpack.c.bf16 %v3161_v33, %v3160_v0  ;;  %v3163_v20 = vld [vmem:[%s6184_s6 + $0x48] sm:$0xff]  ;;  %v3166_v28 = vld [vmem:[%s6184_s6 + $0x60] sm:$0xff] }
 0x77d   :  { %5017 = vpow2.f32 %v4202_v27  ;;  %v4635_v23 = vpack.c.bf16 %v3163_v20, %v3162_v19  ;;  %v3165_v27 = vld [vmem:[%s6184_s6 + $0x58] sm:$0xff] }
 0x77e   :  { %5019 = vpow2.f32 %v4203_v8  ;;  %v4639_v26 = vpack.c.bf16 %v3165_v27, %v3164_v25  ;;  %v3167_v8 = vld [vmem:[%s6184_s6 + $0x68] sm:$0xff] }
 0x77f   :  { %5021 = vpow2.f32 %v4204_v44  ;;  %v4643_v44 = vpack.c.bf16 %v3167_v8, %v3166_v28 }
 0x780   :  { %5023 = vtanh.f32 %v2670_v16  ;;  %v3159_v16 = vld [vmem:[%s6184_s6 + $0x28] sm:$0xff] }
 0x781   :  { %v4627_v18 = vpack.c.bf16 %v3159_v16, %v3158_v17 }
 0x787   :  { %v5018_v24 = vpop.eup %5017 }
 0x788   :  { %v5020_v10 = vpop.eup %5019  ;;  %v2675_v32 = vadd.f32 1.0, %v5018_v24  ;;  %v3168_v24 = vld [vmem:[%s6184_s6 + $0x70] sm:$0xff] }
 0x789   :  { %v2681_v21 = vadd.f32 1.0, %v5020_v10  ;;  %v5022_v12 = vpop.eup %5021  ;;  %v3169_v10 = vld [vmem:[%s6184_s6 + $0x78] sm:$0xff] }
 0x78a   :  { %5025 = vrcp.f32 %v2675_v32  ;;  %v5024_v7 = vpop.eup %5023  ;;  %v2688_v51 = vadd.f32 1.0, %v5022_v12  ;;  %v4647_v32 = vpack.c.bf16 %v3169_v10, %v3168_v24 }
 0x78b   :  { %5027 = vrcp.f32 %v2681_v21 }
 0x78c   :  { %5029 = vrcp.f32 %v2688_v51 }
 0x794   :  { %v5026_v36 = vpop.eup %5025 }
 0x795   :  { %v5028_v37 = vpop.eup %5027  ;;  %v2692_v38 = vmul.f32 %v5026_v36, %v5024_v7  ;;  %v6230_v7 = vld [vmem:[#allocation34_spill] sm:$0xff] }
 0x796   :  { %v2691_v2 = vmul.f32 %v5028_v37, %v5859_v59  ;;  %v5030_v5 = vpop.eup %5029  ;;  %v3031_v59 = vld [vmem:[%s6182_s4 + $0x68] sm:$0xff]  ;;  %v6231_v37 = vld [vmem:[#allocation35_spill] sm:$0xff] }
 0x797   :  { %v4611_v60 = vpack.c.bf16 %v3031_v59, %v3030_v58 }
 0x798   :  { %v5909_v4 = vadd.f32 %v2692_v38, %v2691_v2 }
 0x79a   :  { %5031 = vtanh.f32 %v5909_v4 }
 0x7a4   :  { %v5032_v35 = vpop.eup %5031 }
 0x7a5   :  { %v5918_v41 = vmul.f32 %v5032_v35, %v5030_v5  ;;  %v6232_v5 = vld [vmem:[#allocation36_spill] sm:$0xff] }
 0x7a7   :  { %v2705_v43 = vpack.c.bf16 %v5918_v41, %v5918_v41 }
 0x7a9   :  { %2931 = vmatmul.mubr.bf16.vlgmr.msra.gmra.mrb[44].mxu0 %v2705_v43  ;;  %2972 = vmatmul.mubr.bf16.vlgmr.msra.gmra.mrb[44].mxu1 %v2705_v43 }
 0x7aa   :  { %4590 = vmatpush3.bf16.msra.mxu0 %v4587_v22  ;;  %4391 = vmatprep.mubr.f32.mxu0 %v5568_v9  ;;  %v3155_v22 = vld [vmem:[%s6184_s6 + $0x8] sm:$0xff] }
 0x7ab   :  { %4592 = vmatprep.subr.bf16.mxu0 %v4591_v46  ;;  %v4619_v30 = vpack.c.bf16 %v3155_v22, %v3154_v11 }
 0x7ad   :  { %4620 = vmatprep.subr.bf16.mxu1 %v4619_v30 }
 0x7ae   :  { %4594 = vmatpush3.bf16.msra.mxu0 %v4591_v46  ;;  %4622 = vmatpush3.bf16.msra.mxu1 %v4619_v30 }
 0x7af   :  { %4596 = vmatprep.subr.bf16.mxu0 %v4595_v45  ;;  %4624 = vmatprep.subr.bf16.mxu1 %v4623_v15 }
 0x7b2   :  { %4598 = vmatpush3.bf16.msra.mxu0 %v4595_v45  ;;  %4626 = vmatpush3.bf16.msra.mxu1 %v4623_v15 }
 0x7b3   :  { %4600 = vmatprep.subr.bf16.mxu0 %v4599_v49  ;;  %4628 = vmatprep.subr.bf16.mxu1 %v4627_v18 }
 0x7b6   :  { %4602 = vmatpush3.bf16.msra.mxu0 %v4599_v49  ;;  %4630 = vmatpush3.bf16.msra.mxu1 %v4627_v18 }
 0x7b7   :  { %4604 = vmatprep.subr.bf16.mxu0 %v4603_v55  ;;  %4632 = vmatprep.subr.bf16.mxu1 %v4631_v34 }
 0x7ba   :  { %4606 = vmatpush3.bf16.msra.mxu0 %v4603_v55  ;;  %4634 = vmatpush3.bf16.msra.mxu1 %v4631_v34 }
 0x7bb   :  { %4608 = vmatprep.subr.bf16.mxu0 %v4607_v57  ;;  %4636 = vmatprep.subr.bf16.mxu1 %v4635_v23 }
 0x7be   :  { %4610 = vmatpush3.bf16.msra.mxu0 %v4607_v57  ;;  %4638 = vmatpush3.bf16.msra.mxu1 %v4635_v23 }
 0x7bf   :  { %4612 = vmatprep.subr.bf16.mxu0 %v4611_v60  ;;  %4640 = vmatprep.subr.bf16.mxu1 %v4639_v26 }
 0x7c2   :  { %4614 = vmatpush3.bf16.msra.mxu0 %v4611_v60  ;;  %4642 = vmatpush3.bf16.msra.mxu1 %v4639_v26 }
 0x7c3   :  { %4616 = vmatprep.subr.bf16.mxu0 %v4615_v29  ;;  %4644 = vmatprep.subr.bf16.mxu1 %v4643_v44 }
 0x7c6   :  { %4618 = vmatpush3.bf16.msra.mxu0 %v4615_v29  ;;  %4646 = vmatpush3.bf16.msra.mxu1 %v4643_v44 }
 0x7c7   :  { %4648 = vmatprep.subr.bf16.mxu1 %v4647_v32 }
 0x7c9   :  { %4392 = vmatmul.mubr.f32.vlgmr.msra.gmra.mrb[48].mxu0 %v5614_v62 }
 0x7ca   :  { %4394 = vmatprep.mubr.f32.mxu0 %v5658_v31  ;;  %4650 = vmatpush3.bf16.msra.mxu1 %v4647_v32 }
 0x7cd   :  { %4395 = vmatmul.mubr.f32.gmra.mrb[50].mxu0 %v5770_v47 }
 0x7ce   :  { %4397 = vmatprep.mubr.f32.mxu0 %v5816_v56 }
 0x7d1   :  { %4398 = vmatmul.mubr.f32.gmra.mrb[52].mxu0 %v5862_v1 }
 0x7d2   :  { %4400 = vmatprep.mubr.f32.mxu0 %v5918_v41 }
 0x87c   :  { %v2932_v21 = vpop.f32.mrb[44].mxu0  ;;  %v2973_v12 = vpop.f32.mrb[44].mxu1 }
 0x87d   :  { %v2980_v36 = vadd.f32 %v2932_v21, %v6230_v7  ;;  %v2982_v38 = vadd.f32 %v2973_v12, %v6231_v37  ;;  %v2934_v51 = vpop.f32.mrb[45].mxu0  ;;  %v2975_v2 = vpop.f32.mrb[45].mxu1  ;;  %v4241_v7 = vld [vmem:[%s6185_s7] ss:$0 sm:$0xff] }
 0x87e   :  { %v2981_v35 = vadd.f32 %v2934_v51, %v6232_v5  ;;  %v2983_v40 = vadd.f32 %v2975_v2, %v6233_v39  ;;  %v2936_v43 = vpop.f32.mrb[46].mxu0  ;;  %v2977_v46 = vpop.f32.mrb[46].mxu1 }
 0x87f   :  { %v4237_v53 = vmul.f32 -1.442695, %v2980_v36  ;;  %v2937_v6 = vpop.f32.mrb[47].mxu0  ;;  %v2978_v45 = vpop.f32.mrb[47].mxu1 }
 0x880   :  { %v4238_v3 = vmul.f32 -1.442695, %v2981_v35  ;;  %v4239_v48 = vmul.f32 -1.442695, %v2983_v40 }
 0x881   :  { %5033 = vpow2.f32 %v4237_v53 }
 0x882   :  { %5035 = vpow2.f32 %v4238_v3 }
 0x883   :  { %5037 = vpow2.f32 %v4239_v48 }
 0x884   :  { %5039 = vtanh.f32 %v2982_v38 }
 0x88b   :  { %v5034_v49 = vpop.eup %5033 }
 0x88c   :  { %v5036_v50 = vpop.eup %5035  ;;  %v2987_v54 = vadd.f32 1.0, %v5034_v49 }
 0x88d   :  { %v2993_v55 = vadd.f32 1.0, %v5036_v50  ;;  %v5038_v52 = vpop.eup %5037  ;;  %v5212_v50 = vmov 1  }
 0x88e   :  { %5041 = vrcp.f32 %v2987_v54  ;;  %v5040_v42 = vpop.eup %5039  ;;  %v3000_v60 = vadd.f32 1.0, %v5038_v52  ;;  %4765 = vset.pattern.permute.xlu0 %v5212_v50 }
 0x88f   :  { %5043 = vrcp.f32 %v2993_v55 }
 0x890   :  { %5045 = vrcp.f32 %v3000_v60 }
 0x898   :  { %v5042_v57 = vpop.eup %5041 }
 0x899   :  { %v5044_v58 = vpop.eup %5043  ;;  %v3004_v59 = vmul.f32 %v5042_v57, %v5040_v42 }
 0x89a   :  { %v3003_v63 = vmul.f32 %v5044_v58, %v5909_v4  ;;  %v5046_v34 = vpop.eup %5045 }
 0x89c   :  { %v3005_v29 = vadd.f32 %v3004_v59, %v3003_v63  ;;  %v4393_v11 = vpop.f32.mrb[48].mxu0 }
 0x89d   :  { %v3113_v22 = vadd.f32 %v4393_v11, %v4240_v61  ;;  %v3107_v30 = vpop.f32.mrb[49].mxu0 }
 0x89e   :  { %5047 = vtanh.f32 %v3005_v29  ;;  %v3108_v14 = vadd.f32 %v4240_v61, %v3107_v30 }
 0x8a0   :  { %5049 = vtanh.f32 %v3108_v14  ;;  %v4396_v13 = vpop.f32.mrb[50].mxu0 }
 0x8a1   :  { %5051 = vtanh.f32 %v3113_v22  ;;  %v3123_v15 = vadd.f32 %v4396_v13, %v4240_v61  ;;  %v3117_v17 = vpop.f32.mrb[51].mxu0 }
 0x8a2   :  { %v3118_v16 = vadd.f32 %v4240_v61, %v3117_v17 }
 0x8a4   :  { %5053 = vtanh.f32 %v3118_v16  ;;  %v4399_v18 = vpop.f32.mrb[52].mxu0 }
 0x8a5   :  { %5055 = vtanh.f32 %v3123_v15  ;;  %v3133_v4 = vadd.f32 %v4399_v18, %v4240_v61  ;;  %v3127_v0 = vpop.f32.mrb[53].mxu0 }
 0x8a6   :  { %v3128_v33 = vadd.f32 %v4240_v61, %v3127_v0 }
 0x8a8   :  { %v5048_v19 = vpop.eup %5047  ;;  %5057 = vtanh.f32 %v3128_v33 }
 0x8a9   :  { %5059 = vtanh.f32 %v3133_v4  ;;  %v6021_v20 = vmul.f32 %v5048_v19, %v5046_v34 }
 0x8aa   :  { %v5050_v23 = vpop.eup %5049 }
 0x8ab   :  { %v5052_v25 = vpop.eup %5051  ;;  %4435 = vmatprep.mubr.f32.mxu1 %v5050_v23  ;;  %4401 = vmatmul.mubr.f32.gmra.mrb[54].mxu0 %v6021_v20 }
 0x8ac   :  { %4436 = vmatmul.mubr.f32.vlgmr.msra.gmra.mrb[48].mxu1 %v5052_v25 }
 0x8ae   :  { %v5054_v27 = vpop.eup %5053 }
 0x8af   :  { %v5056_v26 = vpop.eup %5055  ;;  %4438 = vmatprep.mubr.f32.mxu1 %v5054_v27 }
 0x8b0   :  { %4439 = vmatmul.mubr.f32.gmra.mrb[50].mxu1 %v5056_v26 }
 0x8b2   :  { %v5058_v28 = vpop.eup %5057 }
 0x8b3   :  { %v5060_v8 = vpop.eup %5059  ;;  %4441 = vmatprep.mubr.f32.mxu1 %v5058_v28 }
 0x8b4   :  { %4442 = vmatmul.mubr.f32.gmra.mrb[52].mxu1 %v5060_v8 }
 0x97e   :  { %v4402_v44 = vpop.f32.mrb[54].mxu0 }
 0x97f   :  { %v3143_v24 = vadd.f32 %v4402_v44, %v4240_v61  ;;  %v4437_v10 = vpop.f32.mrb[48].mxu1  ;;  %v3137_v32 = vpop.f32.mrb[55].mxu0 }
 0x980   :  { %v3138_v21 = vadd.f32 %v4240_v61, %v3137_v32  ;;  %v3243_v12 = vpop.f32.mrb[49].mxu1  ;;  %v3249_v38 = vadd.f32 %v4437_v10, %v4241_v7 }
 0x981   :  { %v3244_v51 = vadd.f32 %v4241_v7, %v3243_v12 }
 0x982   :  { %5061 = vtanh.f32 %v3138_v21  ;;  %v3284_v40 = vsel %vm3282_vm0, %v3249_v38, -inf }
 0x983   :  { %5063 = vtanh.f32 %v3143_v24  ;;  %v4440_v36 = vpop.f32.mrb[50].mxu1  ;;  %v3283_v46 = vsel %vm3282_vm0, %v3244_v51, -inf }
 0x984   :  { %v3253_v37 = vpop.f32.mrb[51].mxu1  ;;  %v3259_v54 = vadd.f32 %v4440_v36, %v4241_v7 }
 0x985   :  { %v3254_v55 = vadd.f32 %v4241_v7, %v3253_v37 }
 0x986   :  { %v3286_v59 = vsel %vm3282_vm0, %v3259_v54, -inf }
 0x987   :  { %v4443_v2 = vpop.f32.mrb[52].mxu1  ;;  %v3285_v63 = vsel %vm3282_vm0, %v3254_v55, -inf }
 0x988   :  { %v3269_v5 = vadd.f32 %v4443_v2, %v4241_v7  ;;  %v3263_v35 = vpop.f32.mrb[53].mxu1 }
 0x989   :  { %v3264_v39 = vadd.f32 %v4241_v7, %v3263_v35 }
 0x98a   :  { %v3289_v43 = vsel %vm3282_vm0, %v3269_v5, -inf }
 0x98b   :  { %v3290_v53 = vmax.f32 %v3284_v40, %v3289_v43  ;;  %v3287_v6 = vsel %vm3282_vm0, %v3264_v39, -inf }
 0x98c   :  { %v5062_v45 = vpop.eup %5061  ;;  %v3288_v3 = vmax.f32 %v3283_v46, %v3287_v6 }
 0x98d   :  { %v5064_v48 = vpop.eup %5063  ;;  %4444 = vmatprep.mubr.f32.mxu1 %v5062_v45 }
 0x98e   :  { %v3295_v49 = vmax.f32 %v3288_v3, %v3290_v53  ;;  %4445 = vmatmul.mubr.f32.gmra.mrb[54].mxu1 %v5064_v48 }
 0xa61   :  { %v4446_v52 = vpop.f32.mrb[54].mxu1 }
 0xa62   :  { %v3279_v42 = vadd.f32 %v4446_v52, %v4241_v7  ;;  %v3273_v57 = vpop.f32.mrb[55].mxu1 }
 0xa63   :  { %v3274_v58 = vadd.f32 %v4241_v7, %v3273_v57 }
 0xa64   :  { %v3293_v60 = vsel %vm3282_vm0, %v3279_v42, -inf }
 0xa65   :  { %v3294_v61 = vmax.f32 %v3286_v59, %v3293_v60  ;;  %v3291_v29 = vsel %vm3282_vm0, %v3274_v58, -inf  ;;  %v3465_v59 = vld [vmem:[#allocation10 + $0x80] sm:$0xff]  ;;  %v3466_v60 = vld [vmem:[#allocation10 + $0x88] sm:$0xff] }
 0xa66   :  { %v3292_v11 = vmax.f32 %v3285_v63, %v3291_v29  ;;  %v3401_v63 = vld [vmem:[#allocation10] sm:$0xff]  ;;  %v4652_v29 = vpack.c.bf16 %v3466_v60, %v3465_v59  ;;  %v5215_v59 = vmov 0.0   ;;  %v5216_v60 = vmov 2  }
 0xa67   :  { %4479 = vmatprep.mubr.msk.f32.mxu0 %vm5214_vm1, %v5215_v59  ;;  %4514 = vmatprep.mubr.msk.f32.mxu1 %vm5214_vm1, %v5215_v59 }
 0xa68   :  { %v3296_v22 = vmax.f32 %v3292_v11, %v3294_v61  ;;  %v5213_v61 = vmov 0.0|0.0   ;;  %v3402_v11 = vld [vmem:[#allocation10 + $0x8] sm:$0xff] }
 0xa69   :  { %4651 = vmatprep.subr.bf16.mxu0 %v5213_v61  ;;  %4675 = vmatprep.subr.bf16.mxu1 %v5213_v61 }
 0xa6a   :  { %v3297_v30 = vmax.f32 %v3295_v49, %v3296_v22  ;;  %v4676_v22 = vpack.c.bf16 %v3402_v11, %v3401_v63  ;;  %4653 = vmatpush3.bf16.msra.mxu0 %v4652_v29  ;;  %v5217_v29 = vmov 3  }
 0xa6b   :  { %4654 = vmatprep.subr.bf16.mxu0 %v5213_v61 }
 0xa6c   :  { %v3298_v14 = vsub.f32 %v3244_v51, %v3297_v30  ;;  %v3299_v13 = vsub.f32 %v3249_v38, %v3297_v30  ;;  %v3300_v15 = vsub.f32 %v3254_v55, %v3297_v30  ;;  %v3301_v17 = vsub.f32 %v3259_v54, %v3297_v30  ;;  %4677 = vmatpush3.bf16.msra.mxu1 %v4676_v22 }
 0xa6d   :  { %v3302_v16 = vsub.f32 %v3264_v39, %v3297_v30  ;;  %v3303_v18 = vsub.f32 %v3269_v5, %v3297_v30  ;;  %v3304_v4 = vsub.f32 %v3274_v58, %v3297_v30  ;;  %v3305_v0 = vsub.f32 %v3279_v42, %v3297_v30  ;;  %4678 = vmatprep.subr.bf16.mxu1 %v5213_v61  ;;  %v3467_v30 = vld [vmem:[#allocation10 + $0x90] sm:$0xff] }
 0xa6e   :  { %v3306_v33 = vmul.f32 1.442695, %v3298_v14  ;;  %v3308_v34 = vmul.f32 1.442695, %v3299_v13  ;;  %v3310_v19 = vmul.f32 1.442695, %v3300_v15 }
 0xa6f   :  { %v3312_v23 = vmul.f32 1.442695, %v3301_v17  ;;  %v3314_v25 = vmul.f32 1.442695, %v3302_v16  ;;  %v3316_v27 = vmul.f32 1.442695, %v3303_v18 }
 0xa70   :  { %5065 = vpow2.f32 %v3306_v33  ;;  %v3318_v26 = vmul.f32 1.442695, %v3304_v4  ;;  %v3320_v28 = vmul.f32 1.442695, %v3305_v0  ;;  %v3468_v14 = vld [vmem:[#allocation10 + $0x98] sm:$0xff]  ;;  %v3403_v13 = vld [vmem:[#allocation10 + $0x10] sm:$0xff] }
 0xa71   :  { %5067 = vpow2.f32 %v3308_v34  ;;  %v4655_v15 = vpack.c.bf16 %v3468_v14, %v3467_v30  ;;  %v3404_v17 = vld [vmem:[#allocation10 + $0x18] sm:$0xff]  ;;  %v3469_v18 = vld [vmem:[#allocation10 + $0xa0] sm:$0xff]  ;;  %v3470_v4 = vld [vmem:[#allocation10 + $0xa8] sm:$0xff] }
 0xa72   :  { %5069 = vpow2.f32 %v3310_v19  ;;  %v4679_v16 = vpack.c.bf16 %v3404_v17, %v3403_v13  ;;  %v3405_v0 = vld [vmem:[#allocation10 + $0x20] sm:$0xff]  ;;  %v4658_v33 = vpack.c.bf16 %v3470_v4, %v3469_v18  ;;  %v3406_v34 = vld [vmem:[#allocation10 + $0x28] sm:$0xff] }
 0xa73   :  { %5071 = vpow2.f32 %v3312_v23  ;;  %4656 = vmatpush3.bf16.msra.mxu0 %v4655_v15  ;;  %v4682_v19 = vpack.c.bf16 %v3406_v34, %v3405_v0  ;;  %v3471_v23 = vld [vmem:[#allocation10 + $0xb0] sm:$0xff] }
 0xa74   :  { %5073 = vpow2.f32 %v3314_v25  ;;  %4680 = vmatpush3.bf16.msra.mxu1 %v4679_v16  ;;  %4657 = vmatprep.subr.bf16.mxu0 %v5213_v61  ;;  %v3472_v25 = vld [vmem:[#allocation10 + $0xb8] sm:$0xff] }
 0xa75   :  { %5075 = vpow2.f32 %v3316_v27  ;;  %4681 = vmatprep.subr.bf16.mxu1 %v5213_v61  ;;  %v3407_v27 = vld [vmem:[#allocation10 + $0x30] sm:$0xff] }
 0xa76   :  { %5077 = vpow2.f32 %v3318_v26  ;;  %v4661_v26 = vpack.c.bf16 %v3472_v25, %v3471_v23 }
 0xa77   :  { %5079 = vpow2.f32 %v3320_v28  ;;  %4659 = vmatpush3.bf16.msra.mxu0 %v4658_v33  ;;  %v3408_v28 = vld [vmem:[#allocation10 + $0x38] sm:$0xff] }
 0xa78   :  { %4683 = vmatpush3.bf16.msra.mxu1 %v4682_v19  ;;  %4660 = vmatprep.subr.bf16.mxu0 %v5213_v61 }
 0xa79   :  { %4684 = vmatprep.subr.bf16.mxu1 %v5213_v61 }
 0xa7a   :  { %v5066_v8 = vpop.eup %5065 }
 0xa7b   :  { %v5068_v44 = vpop.eup %5067  ;;  %v3322_v24 = vsel %vm3282_vm0, %v5066_v8, 0.0  ;;  %4662 = vmatpush3.bf16.msra.mxu0 %v4661_v26 }
 0xa7c   :  { %v5070_v10 = vpop.eup %5069  ;;  %v3323_v32 = vsel %vm3282_vm0, %v5068_v44, 0.0  ;;  %4663 = vmatprep.subr.bf16.mxu0 %v5213_v61 }
 0xa7d   :  { %v5072_v21 = vpop.eup %5071  ;;  %v3324_v12 = vadd.f32 %v3323_v32, %v3322_v24  ;;  %v3325_v7 = vsel %vm3282_vm0, %v5070_v10, 0.0  ;;  %v3474_v24 = vld [vmem:[#allocation10 + $0xc8] sm:$0xff] }
 0xa7e   :  { %v5074_v36 = vpop.eup %5073  ;;  %v3327_v38 = vsel %vm3282_vm0, %v5072_v21, 0.0 }
 0xa7f   :  { %v3326_v37 = vadd.f32 %v3325_v7, %v3324_v12  ;;  %v5076_v51 = vpop.eup %5075  ;;  %v3329_v5 = vsel %vm3282_vm0, %v5074_v36, 0.0  ;;  %v3475_v7 = vld [vmem:[#allocation10 + $0xd0] sm:$0xff] }
 0xa80   :  { %v5078_v35 = vpop.eup %5077  ;;  %v3331_v40 = vsel %vm3282_vm0, %v5076_v51, 0.0 }
 0xa81   :  { %v3328_v2 = vadd.f32 %v3327_v38, %v3326_v37  ;;  %v5080_v43 = vpop.eup %5079  ;;  %v3333_v53 = vsel %vm3282_vm0, %v5078_v35, 0.0  ;;  %v3411_v37 = vld [vmem:[#allocation10 + $0x50] sm:$0xff] }
 0xa82   :  { %v3335_v45 = vsel %vm3282_vm0, %v5080_v43, 0.0 }
 0xa83   :  { %v3330_v39 = vadd.f32 %v3329_v5, %v3328_v2  ;;  %v3477_v5 = vld [vmem:[#allocation10 + $0xe0] sm:$0xff] }
 0xa85   :  { %v3332_v46 = vadd.f32 %v3331_v40, %v3330_v39  ;;  %v3413_v39 = vld [vmem:[#allocation10 + $0x60] sm:$0xff] }
 0xa87   :  { %v3334_v6 = vadd.f32 %v3333_v53, %v3332_v46  ;;  %v3479_v53 = vld [vmem:[#allocation10 + $0xf0] sm:$0xff] }
 0xa89   :  { %v3336_v3 = vadd.f32 %v3335_v45, %v3334_v6  ;;  %v3480_v6 = vld [vmem:[#allocation10 + $0xf8] sm:$0xff]  ;;  %v3415_v45 = vld [vmem:[#allocation10 + $0x70] sm:$0xff] }
 0xa8b   :  { %5081 = vrcp.f32 %v3336_v3  ;;  %v4673_v3 = vpack.c.bf16 %v3480_v6, %v3479_v53 }
 0xa95   :  { %v5082_v48 = vpop.eup %5081 }
 0xa96   :  { %v6043_v49 = vmul.f32 %v5082_v48, %v5066_v8  ;;  %v6045_v50 = vmul.f32 %v5082_v48, %v5068_v44  ;;  %v6047_v54 = vmul.f32 %v5082_v48, %v5070_v10  ;;  %v6049_v55 = vmul.f32 %v5082_v48, %v5072_v21  ;;  %v3473_v44 = vld [vmem:[#allocation10 + $0xc0] sm:$0xff]  ;;  %v3410_v21 = vld [vmem:[#allocation10 + $0x48] sm:$0xff] }
 0xa97   :  { %v6051_v52 = vmul.f32 %v5082_v48, %v5074_v36  ;;  %v6053_v42 = vmul.f32 %v5082_v48, %v5076_v51  ;;  %v6055_v57 = vmul.f32 %v5082_v48, %v5078_v35  ;;  %v6057_v58 = vmul.f32 %v5082_v48, %v5080_v43  ;;  %v3409_v10 = vld [vmem:[#allocation10 + $0x40] sm:$0xff]  ;;  %v3476_v36 = vld [vmem:[#allocation10 + $0xd8] sm:$0xff]  ;;  %v3478_v35 = vld [vmem:[#allocation10 + $0xe8] sm:$0xff] }
 0xa98   :  { %3348 = vperm.xlu1 %4766, %v6043_v49   ;;  %3418 = vperm.xlu0 %4765, %v6043_v49   ;;  %v4685_v8 = vpack.c.bf16 %v3408_v28, %v3407_v27  ;;  %v4664_v32 = vpack.c.bf16 %v3474_v24, %v3473_v44  ;;  %v4688_v12 = vpack.c.bf16 %v3410_v21, %v3409_v10  ;;  %v3412_v51 = vld [vmem:[#allocation10 + $0x58] sm:$0xff]  ;;  %v3414_v43 = vld [vmem:[#allocation10 + $0x68] sm:$0xff] }
 0xa99   :  { %v4667_v38 = vpack.c.bf16 %v3476_v36, %v3475_v7  ;;  %v4691_v2 = vpack.c.bf16 %v3412_v51, %v3411_v37  ;;  %v4670_v40 = vpack.c.bf16 %v3478_v35, %v3477_v5  ;;  %v4694_v46 = vpack.c.bf16 %v3414_v43, %v3413_v39  ;;  %v3416_v48 = vld [vmem:[#allocation10 + $0x78] sm:$0xff]  ;;  %v3669_v37 = vld [vmem:[#allocation10 + $0x100] sm:$0xff]  ;;  %v3805_v35 = vld [vmem:[#allocation10 + $0x188] sm:$0xff] }
 0xa9a   :  { %4686 = vmatpush3.bf16.msra.mxu1 %v4685_v8  ;;  %4665 = vmatpush3.bf16.msra.mxu0 %v4664_v32  ;;  %v4697_v63 = vpack.c.bf16 %v3416_v48, %v3415_v45  ;;  %v3804_v5 = vld [vmem:[#allocation10 + $0x180] sm:$0xff] }
 0xa9b   :  { %4687 = vmatprep.subr.bf16.mxu1 %v5213_v61  ;;  %4666 = vmatprep.subr.bf16.mxu0 %v5213_v61  ;;  %v4724_v48 = vpack.c.bf16 %v3805_v35, %v3804_v5 }
 0xa9c   :  { %3353 = vperm.xlu1 %4766, %v6045_v50   ;;  %3422 = vperm.xlu0 %4765, %v6045_v50  }
 0xa9e   :  { %4689 = vmatpush3.bf16.msra.mxu1 %v4688_v12  ;;  %4668 = vmatpush3.bf16.msra.mxu0 %v4667_v38 }
 0xa9f   :  { %4690 = vmatprep.subr.bf16.mxu1 %v5213_v61  ;;  %4669 = vmatprep.subr.bf16.mxu0 %v5213_v61 }
 0xaa0   :  { %3358 = vperm.xlu1 %4766, %v6047_v54   ;;  %3426 = vperm.xlu0 %4765, %v6047_v54  }
 0xaa2   :  { %4692 = vmatpush3.bf16.msra.mxu1 %v4691_v2  ;;  %4671 = vmatpush3.bf16.msra.mxu0 %v4670_v40  ;;  %v3670_v2 = vld [vmem:[#allocation10 + $0x108] sm:$0xff] }
 0xaa3   :  { %4693 = vmatprep.subr.bf16.mxu1 %v5213_v61  ;;  %4672 = vmatprep.subr.bf16.mxu0 %v5213_v61  ;;  %v4700_v45 = vpack.c.bf16 %v3670_v2, %v3669_v37 }
 0xaa4   :  { %3363 = vperm.xlu1 %4766, %v6049_v55   ;;  %3430 = vperm.xlu0 %4765, %v6049_v55  }
 0xaa6   :  { %4695 = vmatpush3.bf16.msra.mxu1 %v4694_v46  ;;  %4674 = vmatpush3.bf16.msra.mxu0 %v4673_v3  ;;  %v3671_v3 = vld [vmem:[#allocation10 + $0x110] sm:$0xff] }
 0xaa7   :  { %4696 = vmatprep.subr.bf16.mxu1 %v5213_v61  ;;  %4699 = vmatprep.subr.bf16.mxu0 %v5213_v61 }
 0xaa8   :  { %3368 = vperm.xlu1 %4766, %v6051_v52   ;;  %3434 = vperm.xlu0 %4765, %v6051_v52  }
 0xaaa   :  { %4698 = vmatpush3.bf16.msra.mxu1 %v4697_v63 }
 0xaab   :  { %4723 = vmatprep.subr.bf16.mxu1 %v5213_v61 }
 0xaac   :  { %3373 = vperm.xlu1 %4766, %v6053_v42   ;;  %3438 = vperm.xlu0 %4765, %v6053_v42  }
 0xab0   :  { %3378 = vperm.xlu1 %4766, %v6055_v57   ;;  %3442 = vperm.xlu0 %4765, %v6055_v57  }
 0xab4   :  { %3383 = vperm.xlu1 %4766, %v6057_v58   ;;  %3446 = vperm.xlu0 %4765, %v6057_v58  }
 0xab8   :  { %4768 = vset.pattern.permute.xlu1 %v5216_v60  ;;  %4767 = vset.pattern.permute.xlu0 %v5216_v60 }
 0xab9   :  { %3626 = vperm.xlu1 %4768, %v6045_v50   ;;  %3622 = vperm.xlu0 %4767, %v6043_v49  }
 0xabd   :  { %3630 = vperm.xlu1 %4768, %v6047_v54   ;;  %4769 = vset.pattern.permute.xlu0 %v5217_v29 }
 0xabe   :  { %3757 = vperm.xlu0 %4769, %v6043_v49  }
 0xac1   :  { %4770 = vset.pattern.permute.xlu1 %v5217_v29 }
 0xac2   :  { %3761 = vperm.xlu1 %4770, %v6045_v50   ;;  %3765 = vperm.xlu0 %4769, %v6047_v54  }
 0xac6   :  { %4771 = vset.pattern.permute.xlu1 %v5216_v60  ;;  %3769 = vperm.xlu0 %4769, %v6049_v55  }
 0xac7   :  { %3634 = vperm.xlu1 %4771, %v6049_v55  }
 0xaca   :  { %3773 = vperm.xlu0 %4769, %v6051_v52  }
 0xacb   :  { %3638 = vperm.xlu1 %4771, %v6051_v52  }
 0xace   :  { %3777 = vperm.xlu0 %4769, %v6053_v42  }
 0xacf   :  { %3642 = vperm.xlu1 %4771, %v6053_v42  }
 0xad2   :  { %3781 = vperm.xlu0 %4769, %v6055_v57  }
 0xad3   :  { %3646 = vperm.xlu1 %4771, %v6055_v57  }
 0xad7   :  { %3650 = vperm.xlu1 %4771, %v6057_v58  }
 0xadb   :  { %4772 = vset.pattern.permute.xlu1 %v5217_v29  ;;  %v3672_v29 = vld [vmem:[#allocation10 + $0x118] sm:$0xff] }
 0xadc   :  { %3785 = vperm.xlu1 %4772, %v6057_v58  }
 0xb17   :  { %v3349_v49 = vpop.permute.xlu1 %3348  ;;  %v3419_v50 = vpop.permute.xlu0 %3418 }
 0xb18   :  { %v3386_v57 = vmul.f32 %v3349_v49, %v5568_v9  ;;  %v3449_v17 = vmul.f32 %v3419_v50, %v5568_v9  ;;  %v3806_v49 = vld [vmem:[#allocation10 + $0x190] sm:$0xff]  ;;  %v3807_v50 = vld [vmem:[#allocation10 + $0x198] sm:$0xff] }
 0xb1b   :  { %v3354_v54 = vpop.permute.xlu1 %3353  ;;  %v3423_v55 = vpop.permute.xlu0 %3422 }
 0xb1c   :  { %v3387_v14 = vmul.f32 %v3354_v54, %v5614_v62  ;;  %v3450_v42 = vmul.f32 %v3423_v55, %v5614_v62 }
 0xb1e   :  { %v3394_v18 = vadd.f32 %v3387_v14, %v3386_v57  ;;  %v3457_v4 = vadd.f32 %v3450_v42, %v3449_v17  ;;  %v3808_v14 = vld [vmem:[#allocation10 + $0x1a0] sm:$0xff]  ;;  %v3809_v42 = vld [vmem:[#allocation10 + $0x1a8] sm:$0xff]  ;;  %v3675_v17 = vld [vmem:[#allocation10 + $0x130] sm:$0xff] }
 0xb1f   :  { %v3359_v11 = vpop.permute.xlu1 %3358  ;;  %v3427_v22 = vpop.permute.xlu0 %3426 }
 0xb20   :  { %v3388_v58 = vmul.f32 %v3359_v11, %v5658_v31  ;;  %v3451_v16 = vmul.f32 %v3427_v22, %v5658_v31  ;;  %v4703_v11 = vpack.c.bf16 %v3672_v29, %v3671_v3  ;;  %v3673_v22 = vld [vmem:[#allocation10 + $0x120] sm:$0xff]  ;;  %v3683_v3 = vld [vmem:[#allocation10 + $0x170] sm:$0xff] }
 0xb21   :  { %v3818_v29 = vld [vmem:[#allocation10 + $0x1f0] sm:$0xff] }
 0xb22   :  { %v3395_v23 = vadd.f32 %v3394_v18, %v3388_v58  ;;  %v3458_v25 = vadd.f32 %v3457_v4, %v3451_v16  ;;  %v4730_v58 = vpack.c.bf16 %v3809_v42, %v3808_v14  ;;  %v3676_v16 = vld [vmem:[#allocation10 + $0x138] sm:$0xff]  ;;  %v3810_v18 = vld [vmem:[#allocation10 + $0x1b0] sm:$0xff] }
 0xb23   :  { %v3364_v52 = vpop.permute.xlu1 %3363  ;;  %v3431_v30 = vpop.permute.xlu0 %3430  ;;  %v3811_v4 = vld [vmem:[#allocation10 + $0x1b8] sm:$0xff] }
 0xb24   :  { %v3389_v0 = vmul.f32 %v3364_v52, %v5770_v47  ;;  %v3452_v33 = vmul.f32 %v3431_v30, %v5770_v47  ;;  %v4727_v52 = vpack.c.bf16 %v3807_v50, %v3806_v49  ;;  %v3674_v30 = vld [vmem:[#allocation10 + $0x128] sm:$0xff]  ;;  %v3819_v49 = vld [vmem:[#allocation10 + $0x1f8] sm:$0xff] }
 0xb25   :  { %v4706_v57 = vpack.c.bf16 %v3674_v30, %v3673_v22  ;;  %v4745_v30 = vpack.c.bf16 %v3819_v49, %v3818_v29 }
 0xb26   :  { %v3396_v28 = vadd.f32 %v3395_v23, %v3389_v0  ;;  %v3459_v8 = vadd.f32 %v3458_v25, %v3452_v33  ;;  %v3678_v23 = vld [vmem:[#allocation10 + $0x148] sm:$0xff]  ;;  %v3812_v25 = vld [vmem:[#allocation10 + $0x1c0] sm:$0xff] }
 0xb27   :  { %v3369_v13 = vpop.permute.xlu1 %3368  ;;  %v3435_v15 = vpop.permute.xlu0 %3434 }
 0xb28   :  { %v3390_v27 = vmul.f32 %v3369_v13, %v5816_v56  ;;  %v3453_v26 = vmul.f32 %v3435_v15, %v5816_v56 }
 0xb2a   :  { %v3397_v21 = vadd.f32 %v3396_v28, %v3390_v27  ;;  %v3460_v12 = vadd.f32 %v3459_v8, %v3453_v26  ;;  %v3813_v27 = vld [vmem:[#allocation10 + $0x1c8] sm:$0xff]  ;;  %v3679_v8 = vld [vmem:[#allocation10 + $0x150] sm:$0xff] }
 0xb2b   :  { %v3374_v34 = vpop.permute.xlu1 %3373  ;;  %v3439_v19 = vpop.permute.xlu0 %3438 }
 0xb2c   :  { %v3391_v44 = vmul.f32 %v3374_v34, %v5862_v1  ;;  %v3454_v24 = vmul.f32 %v3439_v19, %v5862_v1  ;;  %v4709_v34 = vpack.c.bf16 %v3676_v16, %v3675_v17  ;;  %v4733_v19 = vpack.c.bf16 %v3811_v4, %v3810_v18 }
 0xb2e   :  { %v3398_v38 = vadd.f32 %v3397_v21, %v3391_v44  ;;  %v3461_v51 = vadd.f32 %v3460_v12, %v3454_v24  ;;  %v3680_v44 = vld [vmem:[#allocation10 + $0x158] sm:$0xff]  ;;  %v4736_v24 = vpack.c.bf16 %v3813_v27, %v3812_v25 }
 0xb2f   :  { %v3379_v10 = vpop.permute.xlu1 %3378  ;;  %v3443_v32 = vpop.permute.xlu0 %3442  ;;  %v3815_v21 = vld [vmem:[#allocation10 + $0x1d8] sm:$0xff]  ;;  %v4715_v12 = vpack.c.bf16 %v3680_v44, %v3679_v8 }
 0xb30   :  { %v3392_v7 = vmul.f32 %v3379_v10, %v5918_v41  ;;  %v3455_v36 = vmul.f32 %v3443_v32, %v5918_v41  ;;  %v3814_v32 = vld [vmem:[#allocation10 + $0x1d0] sm:$0xff] }
 0xb31   :  { %v4739_v2 = vpack.c.bf16 %v3815_v21, %v3814_v32 }
 0xb32   :  { %v3399_v43 = vadd.f32 %v3398_v38, %v3392_v7  ;;  %v3462_v46 = vadd.f32 %v3461_v51, %v3455_v36  ;;  %v3681_v38 = vld [vmem:[#allocation10 + $0x160] sm:$0xff]  ;;  %v3682_v51 = vld [vmem:[#allocation10 + $0x168] sm:$0xff] }
 0xb33   :  { %v3384_v39 = vpop.permute.xlu1 %3383  ;;  %v3447_v40 = vpop.permute.xlu0 %3446 }
 0xb34   :  { %v3393_v53 = vmul.f32 %v3384_v39, %v6021_v20  ;;  %v3456_v6 = vmul.f32 %v3447_v40, %v6021_v20  ;;  %v3816_v39 = vld [vmem:[#allocation10 + $0x1e0] sm:$0xff]  ;;  %v3817_v40 = vld [vmem:[#allocation10 + $0x1e8] sm:$0xff] }
 0xb36   :  { %v3400_v60 = vadd.f32 %v3399_v43, %v3393_v53  ;;  %v3463_v63 = vadd.f32 %v3462_v46, %v3456_v6  ;;  %v4718_v53 = vpack.c.bf16 %v3682_v51, %v3681_v38 }
 0xb38   :  { %4515 = vmatmul.mubr.f32.vlgmr.msra.gmra.mrb[56].mxu1 %v3400_v60  ;;  %v3627_v54 = vpop.permute.xlu1 %3626  ;;  %4480 = vmatmul.mubr.f32.vlgmr.msra.gmra.mrb[56].mxu0 %v3463_v63  ;;  %v3623_v55 = vpop.permute.xlu0 %3622 }
 0xb39   :  { %4701 = vmatpush3.bf16.msra.mxu0 %v4700_v45  ;;  %4725 = vmatpush3.bf16.msra.mxu1 %v4724_v48  ;;  %v3654_v7 = vmul.f32 %v3627_v54, %v5614_v62  ;;  %v3653_v36 = vmul.f32 %v3623_v55, %v5568_v9  ;;  %v3684_v48 = vld [vmem:[#allocation10 + $0x178] sm:$0xff] }
 0xb3a   :  { %4702 = vmatprep.subr.bf16.mxu0 %v5213_v61  ;;  %4726 = vmatprep.subr.bf16.mxu1 %v5213_v61 }
 0xb3b   :  { %4549 = vmatprep.mubr.msk.f32.mxu0 %vm5214_vm1, %v5215_v59  ;;  %4584 = vmatprep.mubr.msk.f32.mxu1 %vm5214_vm1, %v5215_v59  ;;  %v3677_v59 = vld [vmem:[#allocation10 + $0x140] sm:$0xff]  ;;  %v3661_v6 = vadd.f32 %v3654_v7, %v3653_v36 }
 0xb3c   :  { %v3631_v13 = vpop.permute.xlu1 %3630  ;;  %v4712_v28 = vpack.c.bf16 %v3678_v23, %v3677_v59 }
 0xb3d   :  { %v3758_v15 = vpop.permute.xlu0 %3757  ;;  %4704 = vmatpush3.bf16.msra.mxu0 %v4703_v11  ;;  %4728 = vmatpush3.bf16.msra.mxu1 %v4727_v52  ;;  %v3655_v43 = vmul.f32 %v3631_v13, %v5658_v31  ;;  %v4721_v11 = vpack.c.bf16 %v3684_v48, %v3683_v3 }
 0xb3e   :  { %4705 = vmatprep.subr.bf16.mxu0 %v5213_v61  ;;  %4729 = vmatprep.subr.bf16.mxu1 %v5213_v61  ;;  %v3788_v46 = vmul.f32 %v3758_v15, %v5568_v9 }
 0xb3f   :  { %v3662_v50 = vadd.f32 %v3661_v6, %v3655_v43 }
 0xb41   :  { %v3762_v0 = vpop.permute.xlu1 %3761  ;;  %v3766_v33 = vpop.permute.xlu0 %3765  ;;  %4707 = vmatpush3.bf16.msra.mxu0 %v4706_v57  ;;  %4731 = vmatpush3.bf16.msra.mxu1 %v4730_v58 }
 0xb42   :  { %4708 = vmatprep.subr.bf16.mxu0 %v5213_v61  ;;  %4732 = vmatprep.subr.bf16.mxu1 %v5213_v61  ;;  %v3789_v5 = vmul.f32 %v3762_v0, %v5614_v62  ;;  %v4742_v62 = vpack.c.bf16 %v3817_v40, %v3816_v39  ;;  %v3790_v55 = vmul.f32 %v3766_v33, %v5658_v31 }
 0xb44   :  { %v3796_v60 = vadd.f32 %v3789_v5, %v3788_v46 }
 0xb45   :  { %v3770_v26 = vpop.permute.xlu0 %3769  ;;  %4710 = vmatpush3.bf16.msra.mxu0 %v4709_v34  ;;  %4734 = vmatpush3.bf16.msra.mxu1 %v4733_v19 }
 0xb46   :  { %v3635_v10 = vpop.permute.xlu1 %3634  ;;  %4711 = vmatprep.subr.bf16.mxu0 %v5213_v61  ;;  %4735 = vmatprep.subr.bf16.mxu1 %v5213_v61  ;;  %v3797_v14 = vadd.f32 %v3796_v60, %v3790_v55  ;;  %v3791_v42 = vmul.f32 %v3770_v26, %v5770_v47 }
 0xb47   :  { %v3656_v45 = vmul.f32 %v3635_v10, %v5770_v47 }
 0xb48   :  { %v3798_v16 = vadd.f32 %v3797_v14, %v3791_v42 }
 0xb49   :  { %v3774_v37 = vpop.permute.xlu0 %3773  ;;  %4713 = vmatpush3.bf16.msra.mxu0 %v4712_v28  ;;  %4737 = vmatpush3.bf16.msra.mxu1 %v4736_v24  ;;  %v3663_v22 = vadd.f32 %v3662_v50, %v3656_v45 }
 0xb4a   :  { %v3639_v35 = vpop.permute.xlu1 %3638  ;;  %4714 = vmatprep.subr.bf16.mxu0 %v5213_v61  ;;  %4738 = vmatprep.subr.bf16.mxu1 %v5213_v61  ;;  %v3792_v31 = vmul.f32 %v3774_v37, %v5816_v56 }
 0xb4b   :  { %v3657_v9 = vmul.f32 %v3639_v35, %v5816_v56 }
 0xb4c   :  { %v3799_v33 = vadd.f32 %v3798_v16, %v3792_v31 }
 0xb4d   :  { %4716 = vmatpush3.bf16.msra.mxu0 %v4715_v12  ;;  %4740 = vmatpush3.bf16.msra.mxu1 %v4739_v2  ;;  %v3778_v54 = vpop.permute.xlu0 %3777  ;;  %v3664_v15 = vadd.f32 %v3663_v22, %v3657_v9 }
 0xb4e   :  { %v3643_v63 = vpop.permute.xlu1 %3642  ;;  %4717 = vmatprep.subr.bf16.mxu0 %v5213_v61  ;;  %4741 = vmatprep.subr.bf16.mxu1 %v5213_v61  ;;  %v3793_v18 = vmul.f32 %v3778_v54, %v5862_v1 }
 0xb4f   :  { %v3658_v52 = vmul.f32 %v3643_v63, %v5862_v1 }
 0xb50   :  { %v3800_v59 = vadd.f32 %v3799_v33, %v3793_v18 }
 0xb51   :  { %4719 = vmatpush3.bf16.msra.mxu0 %v4718_v53  ;;  %4743 = vmatpush3.bf16.msra.mxu1 %v4742_v62  ;;  %v3665_v17 = vadd.f32 %v3664_v15, %v3658_v52  ;;  %v3782_v58 = vpop.permute.xlu0 %3781 }
 0xb52   :  { %v3647_v13 = vpop.permute.xlu1 %3646  ;;  %4720 = vmatprep.subr.bf16.mxu0 %v5213_v61  ;;  %4744 = vmatprep.subr.bf16.mxu1 %v5213_v61  ;;  %v3794_v34 = vmul.f32 %v3782_v58, %v5918_v41 }
 0xb53   :  { %v3659_v57 = vmul.f32 %v3647_v13, %v5918_v41  ;;  %v4242_v41 = vld [vmem:[%s6187_s9] ss:$0 sm:$0xff] }
 0xb54   :  { %v3801_v23 = vadd.f32 %v3800_v59, %v3794_v34 }
 0xb55   :  { %4722 = vmatpush3.bf16.msra.mxu0 %v4721_v11  ;;  %4746 = vmatpush3.bf16.msra.mxu1 %v4745_v30  ;;  %v3666_v0 = vadd.f32 %v3665_v17, %v3659_v57 }
 0xb56   :  { %v3651_v4 = vpop.permute.xlu1 %3650 }
 0xb57   :  { %v3660_v47 = vmul.f32 %v3651_v4, %v6021_v20 }
 0xb59   :  { %v3667_v61 = vadd.f32 %v3666_v0, %v3660_v47 }
 0xb5b   :  { %v3786_v19 = vpop.permute.xlu1 %3785  ;;  %4550 = vmatmul.mubr.f32.vlgmr.msra.gmra.mrb[58].mxu0 %v3667_v61 }
 0xb5c   :  { %v3795_v56 = vmul.f32 %v3786_v19, %v6021_v20 }
 0xb5e   :  { %v3802_v25 = vadd.f32 %v3801_v23, %v3795_v56 }
 0xb60   :  { %4585 = vmatmul.mubr.f32.vlgmr.msra.gmra.mrb[58].mxu1 %v3802_v25 }
 0xc0b   :  { %v3547_v27 = vpop.f32.mrb[56].mxu0  ;;  %v3617_v26 = vpop.f32.mrb[56].mxu1 }
 0xc0c   :  { %v3618_v28 = vadd.f32 %v3617_v26, %v3547_v27  ;;  %v4481_v1 = vpop.f32.mrb[57].mxu0  ;;  %v4516_v8 = vpop.f32.mrb[57].mxu1 }
 0xc2e   :  { %v3751_v44 = vpop.f32.mrb[58].mxu0 }
 0xc2f   :  { %v3755_v24 = vadd.f32 %v3751_v44, %v3618_v28  ;;  %v4551_v10 = vpop.f32.mrb[59].mxu0 }
 0xc33   :  { %v3886_v32 = vpop.f32.mrb[58].mxu1 }
 0xc34   :  { %v3890_v21 = vadd.f32 %v3886_v32, %v3755_v24  ;;  %v4586_v12 = vpop.f32.mrb[59].mxu1 }
 0xc36   :  { %v3898_v20 = vadd.f32 %v4242_v41, %v3890_v21 }
 0xc38   :  { %3899 = vst [vmem:[#allocation12] sm:$0xff] %v3898_v20 }
 0xc39   :  { %5182 = shalt.err (!%p5179_p8)
}
 0xc3a   :  { %s5183_s23 = scalar_lea.hbm %s6188_s10, 128 }
 0xc3b   :  { %p5184_p9 = scmp.ne.s32.totalorder %s6188_s10, %s5183_s23  ;;  %p5187_p10 = scmp.lt.u32.totalorder %s5183_s23, %s6188_s10 }
 0xc3d   :  { %p5189_p11 = pnand %p5187_p10, %p5184_p9 }
 0xc3f   :  { %5192 = shalt.err (!%p5189_p11)
}
 0xc40   :  { %3909 = dma.vmem_to_hbm [thread:$0]  %s3907_s19, 128, %s6188_s10, [#allocation6]  }
 0xc41   :  { %5199 = dma.done.wait [#allocation6], 128  }
 0xc42   :  { %5200 = vsyncadd [#allocation6], 4294967168 }
 0xc43   :  { %3913 = vsyncpa [#allocation5], 1 }
 0xc44   :  { %3914 = vsyncpa [#allocation8], 1 }
 0xc45   :  { %3915 = vsyncpa [#allocation11], 1 }
 0xc46   :  { %3916 = vsyncpa [#allocation6], 1 }

</bundles_post_ra>
